<compile_context>
chip_gen: v6e
topology: v6e:2x2x1
jax: 0.10.0
libtpu: 0.0.40
codegen_flags: <defaults>
</compile_context>

<pallas_src>
import functools

import jax
import jax.numpy as jnp
from jax.experimental import pallas as pl
from jax.experimental.pallas import tpu as pltpu


# ----------------------------------------------------------------------------
# Pallas kernel: fused (embedding -> T x GRU step -> batched Linear+LogSoftmax)
# ----------------------------------------------------------------------------
def _decoder_seq_kernel(tok_ref,                       # SMEM (T,) int32 token ids
                        emb_ref, h0_ref,               # VMEM inputs
                        wih_ref, whh_ref, bih_ref, bhh_ref,
                        wout_ref, bout_ref,
                        logp_ref, hout_ref,            # VMEM outputs
                        gi_tbl, h_all,                 # VMEM scratch
                        *, hidden_size, vocab_size, seq_len):
    H = hidden_size
    T = seq_len

    # ---- Hoisted input-to-hidden projection (independent of the carry) ----
    # gi_table[v] = bf16(emb[v]) @ bf16(W_ih^T) + b_ih for every (padded)
    # vocab row at once: one tiny (Vr,H)@(H,3H) MXU matmul instead of T GEMVs
    # sitting on the serial chain.
    gi_tbl[...] = (jnp.dot(emb_ref[...].astype(jnp.bfloat16), wih_ref[...],
                           preferred_element_type=jnp.float32)
                   + bih_ref[...])

    # Deterministic padded rows for the batched projection below.
    h_all[...] = jnp.zeros_like(h_all)

    whh = whh_ref[...]                                 # (H, 3H) bf16, resident
    bhh = bhh_ref[...]                                 # (1, 3H) f32

    # ---- Serial GRU recurrence, fully unrolled (small static T) -----------
    # Only h -> W_hh -> gates -> h remains per step; all stores are static.
    # TODO(synk): for long decodes switch to lax.fori_loop(..., unroll=k) to
    # bound live ranges; at T<=8 full unrolling is strictly better.
    h = h0_ref[...]                                    # (1, H) f32 carry
    for t in range(T):
        tok = jnp.clip(tok_ref[t], 0, vocab_size - 1)  # bounds-safe lookup
        gi = gi_tbl[pl.ds(tok, 1), :]                  # (1, 3H) lane read
        gh = (jnp.dot(h.astype(jnp.bfloat16), whh,
                      preferred_element_type=jnp.float32) + bhh)

        # PyTorch GRU gate order: r (reset), z (update), n (new).
        # H is a multiple of 128 -> lane-aligned slices, pure VPU/EUP work.
        i_r, i_z, i_n = gi[:, 0:H], gi[:, H:2 * H], gi[:, 2 * H:3 * H]
        h_r, h_z, h_n = gh[:, 0:H], gh[:, H:2 * H], gh[:, 2 * H:3 * H]
        r = jax.nn.sigmoid(i_r + h_r)
        z = jax.nn.sigmoid(i_z + h_z)
        n = jnp.tanh(i_n + r * h_n)
        h = (1.0 - z) * n + z * h                      # (1, H) f32

        h_all[pl.ds(t, 1), :] = h                      # static-offset store

    # Final hidden written exactly once (only the last value is observable).
    hout_ref[...] = h.astype(hout_ref.dtype)

    # ---- Batched output projection + log-softmax over all T steps ---------
    # One (T_pad,H)@(H,Vp) matmul; padded vocab lanes carry b_out = -1e30 so
    # exp underflows to 0 in f32 and no explicit mask is needed.
    logits = (jnp.dot(h_all[...].astype(jnp.bfloat16), wout_ref[...],
                      preferred_element_type=jnp.float32)
              + bout_ref[...])                         # (T_pad, Vp) f32
    m = jnp.max(logits, axis=-1, keepdims=True)
    s = logits - m
    lse = jnp.log(jnp.sum(jnp.exp(s), axis=-1, keepdims=True))
    logp_ref[...] = (s - lse).astype(logp_ref.dtype)   # lane-dense slab store


# ----------------------------------------------------------------------------
# Wrappers
# ----------------------------------------------------------------------------
def decoder_forward_fused(tokens, hidden, params):
    """Run T chained Decoder.forward steps in a single fused pallas_call.

    tokens : (T,) int32 token ids fed at each step (teacher forcing)
    hidden : (1, 1, H) f32 initial hidden state
    Returns (log_probs (T, V) f32, hidden (1, 1, H) f32).
    """
    tokens = jnp.asarray(tokens, jnp.int32).reshape(-1)
    T = int(tokens.shape[0])
    T_pad = max(8, pl.cdiv(T, 8) * 8)                  # sublane-aligned rows
    emb_pad = params["embedding_pad"]
    V, H = params["embedding"].shape
    Vr = emb_pad.shape[0]
    Vp = params["w_out_t"].shape[1]

    h0 = hidden.reshape(1, H).astype(jnp.float32)

    kernel = functools.partial(_decoder_seq_kernel,
                               hidden_size=H, vocab_size=V, seq_len=T)

    vmem = pl.BlockSpec(memory_space=pltpu.MemorySpace.VMEM)
    smem = pl.BlockSpec(memory_space=pltpu.MemorySpace.SMEM)

    flops = (2 * Vr * H * 3 * H                        # hoisted gi table
             + T * 2 * H * 3 * H                       # W_hh GEMVs (serial)
             + 2 * T_pad * H * Vp                      # batched vocab proj
             + T * 12 * H)                             # gate elementwise
    transcendentals = T * 3 * H + T_pad * (Vp + 1)
    bytes_accessed = ((2 * H * 3 * H + H * Vp) * 2     # bf16 weights, once
                      + Vr * H * 4                     # embedding table
                      + (2 * 3 * H + Vp + 2 * H) * 4   # biases + hidden in/out
                      + T_pad * Vp * 4 + T * 4)        # log-prob slab + tokens

    logp_pad, h_new = pl.pallas_call(
        kernel,
        out_shape=(
            jax.ShapeDtypeStruct((T_pad, Vp), jnp.float32),   # log-probs slab
            jax.ShapeDtypeStruct((1, H), jnp.float32),        # final hidden
        ),
        in_specs=[smem,                                # token ids -> SMEM
                  vmem, vmem,                          # embedding, h0
                  vmem, vmem, vmem, vmem,              # GRU weights/biases
                  vmem, vmem],                         # out proj weight/bias
        out_specs=(vmem, vmem),
        scratch_shapes=[
            pltpu.VMEM((Vr, 3 * H), jnp.float32),      # hoisted gi table
            pltpu.VMEM((T_pad, H), jnp.float32),       # all hidden states
        ],
        compiler_params=pltpu.CompilerParams(
            vmem_limit_bytes=32 * 1024 * 1024),        # far above ~1 MiB footprint
        cost_estimate=pl.CostEstimate(flops=flops,
                                      transcendentals=transcendentals,
                                      bytes_accessed=bytes_accessed),
    )(tokens, emb_pad, h0,
      params["w_ih_t"], params["w_hh_t"], params["b_ih"], params["b_hh"],
      params["w_out_t"], params["b_out"])

    return logp_pad[:T, :V], h_new.reshape(1, 1, H)


def decoder_forward(token, hidden, params):
    """Exact equivalent of Decoder.forward(input, hidden): one step."""
    log_probs, h_new = decoder_forward_fused(
        jnp.asarray(token, jnp.int32).reshape(1), hidden, params)
    return log_probs, h_new


# ----------------------------------------------------------------------------
# Deterministic parameter init (PyTorch shapes; bf16 weights, padded vocab)
# ----------------------------------------------------------------------------
def init_params(key, hidden_size, output_size):
    H, V = hidden_size, output_size
    Vp = max(128, pl.cdiv(V, 128) * 128)               # vocab padded to 128 lanes
    Vr = max(8, pl.cdiv(V, 8) * 8)                     # emb rows padded to 8 sublanes
    k_emb, k_wih, k_whh, k_bih, k_bhh, k_wo, k_bo = jax.random.split(key, 7)
    bound = 1.0 / jnp.sqrt(jnp.float32(H))

    def uni(k, shape):
        return jax.random.uniform(k, shape, jnp.float32, -bound, bound)

    embedding = jax.random.normal(k_emb, (V, H), jnp.float32)      # nn.Embedding: N(0,1)
    embedding_pad = jnp.zeros((Vr, H), jnp.float32).at[:V].set(embedding)

    w_out = uni(k_wo, (V, H))                                      # nn.Linear weight (V,H)
    b_out = uni(k_bo, (1, V))
    w_out_t = jnp.zeros((H, Vp), jnp.float32).at[:, :V].set(w_out.T)
    # Padding mask folded into the bias: padded lanes get -1e30 (f32), so the
    # kernel needs no per-step iota / where and exp underflows cleanly to 0.
    b_out_p = jnp.full((1, Vp), -1e30, jnp.float32).at[:, :V].set(b_out)

    return {
        "embedding": embedding,                                    # (V, H) f32
        "embedding_pad": embedding_pad,                            # (Vr, H) f32 (kernel)
        "w_ih_t": uni(k_wih, (3 * H, H)).T.astype(jnp.bfloat16),   # (H, 3H) bf16
        "w_hh_t": uni(k_whh, (3 * H, H)).T.astype(jnp.bfloat16),   # (H, 3H) bf16
        "b_ih": uni(k_bih, (1, 3 * H)),                            # f32
        "b_hh": uni(k_bhh, (1, 3 * H)),                            # f32
        "w_out_t": w_out_t.astype(jnp.bfloat16),                   # (H, Vp) bf16
        "b_out": b_out_p,                                          # (1, Vp) f32
    }


# ----------------------------------------------------------------------------
# Pure-JAX reference (mirrors the kernel's bf16 weight/input rounding)
# ----------------------------------------------------------------------------
def decoder_forward_ref(tokens, hidden, params):
    H = params["w_ih_t"].shape[0]
    V = params["embedding"].shape[0]
    wih = params["w_ih_t"].astype(jnp.float32)
    whh = params["w_hh_t"].astype(jnp.float32)
    wout = params["w_out_t"].astype(jnp.float32)[:, :V]
    bout = params["b_out"][:, :V]
    h = hidden.reshape(1, H).astype(jnp.float32)
    outs = []
    for tok in [int(t) for t in jnp.asarray(tokens).reshape(-1)]:
        x = params["embedding"][tok].reshape(1, H)
        x16 = x.astype(jnp.bfloat16).astype(jnp.float32)
        h16 = h.astype(jnp.bfloat16).astype(jnp.float32)
        gi = x16 @ wih + params["b_ih"]
        gh = h16 @ whh + params["b_hh"]
        i_r, i_z, i_n = gi[:, :H], gi[:, H:2 * H], gi[:, 2 * H:]
        h_r, h_z, h_n = gh[:, :H], gh[:, H:2 * H], gh[:, 2 * H:]
        r = jax.nn.sigmoid(i_r + h_r)
        z = jax.nn.sigmoid(i_z + h_z)
        n = jnp.tanh(i_n + r * h_n)
        h = (1.0 - z) * n + z * h
        logits = h.astype(jnp.bfloat16).astype(jnp.float32) @ wout + bout
        outs.append(jax.nn.log_softmax(logits, axis=1))
    return jnp.concatenate(outs, axis=0), h.reshape(1, 1, H)


if __name__ == "__main__":
    hidden_size = 256          # matches the module's hidden_size = 256
    output_size = 2            # len(word_to_index) = {SOS, EOS}
    seq_len = 8                # small teacher-forced decode

    key = jax.random.PRNGKey(0)
    params = init_params(key, hidden_size, output_size)

    tokens = jnp.array([0, 1, 0, 0, 1, 1, 0, 1], jnp.int32)        # SOS/EOS ids
    hidden0 = jnp.zeros((1, 1, hidden_size), jnp.float32)          # initHidden()

    # Fused multi-step decode: one pallas_call, one unrolled in-kernel loop.
    log_probs, h_final = decoder_forward_fused(tokens, hidden0, params)
    log_probs = jax.block_until_ready(log_probs)
    h_final = jax.block_until_ready(h_final)

    ref_lp, ref_h = decoder_forward_ref(tokens, hidden0, params)
    assert log_probs.shape == (seq_len, output_size)
    assert h_final.shape == (1, 1, hidden_size)
    assert jnp.allclose(log_probs, ref_lp, atol=2e-3, rtol=2e-3), "log_probs mismatch"
    assert jnp.allclose(h_final, ref_h, atol=2e-3, rtol=2e-3), "hidden mismatch"

    # Single-step path matches the original module's forward signature exactly.
    lp1, h1 = decoder_forward(jnp.int32(0), hidden0, params)
    lp1 = jax.block_until_ready(lp1)
    ref1_lp, _ = decoder_forward_ref(jnp.array([0], jnp.int32), hidden0, params)
    assert lp1.shape == (1, output_size) and h1.shape == (1, 1, hidden_size)
    assert jnp.allclose(lp1, ref1_lp, atol=2e-3, rtol=2e-3), "single-step mismatch"

    print("KERNEL_OK")
</pallas_src>

<mosaic_0001>
module attributes {stable_mosaic.version = 11 : i64} {
  func.func @_decoder_seq_kernel(%arg0: memref<8xi32, #tpu.memory_space<smem>>, %arg1: memref<8x256xf32, #tpu.memory_space<vmem>>, %arg2: memref<1x256xf32, #tpu.memory_space<vmem>>, %arg3: memref<256x768xbf16, #tpu.memory_space<vmem>>, %arg4: memref<256x768xbf16, #tpu.memory_space<vmem>>, %arg5: memref<1x768xf32, #tpu.memory_space<vmem>>, %arg6: memref<1x768xf32, #tpu.memory_space<vmem>>, %arg7: memref<256x128xbf16, #tpu.memory_space<vmem>>, %arg8: memref<1x128xf32, #tpu.memory_space<vmem>>, %arg9: memref<8x128xf32, #tpu.memory_space<vmem>>, %arg10: memref<1x256xf32, #tpu.memory_space<vmem>>, %arg11: memref<8x768xf32, #tpu.memory_space<vmem>>, %arg12: memref<8x256xf32, #tpu.memory_space<vmem>>) attributes {dimension_semantics = [], scalar_prefetch = 0 : i64, scratch_operands = 2 : i64, tpu.core_type = #tpu.core_type<tc>} {
    %c0 = arith.constant 0 : index
    %c0_0 = arith.constant 0 : index
    %0 = vector.load %arg1[%c0, %c0_0] : memref<8x256xf32, #tpu.memory_space<vmem>>, vector<8x256xf32>
    %1 = arith.truncf %0 : vector<8x256xf32> to vector<8x256xbf16>
    %c0_1 = arith.constant 0 : index
    %c0_2 = arith.constant 0 : index
    %2 = vector.load %arg3[%c0_1, %c0_2] : memref<256x768xbf16, #tpu.memory_space<vmem>>, vector<256x768xbf16>
    %cst = arith.constant dense<0.000000e+00> : vector<8x768xf32>
    %3 = tpu.matmul %1, %2, %cst {dimension_numbers = #tpu.dot_dimension_numbers<[1], [0], [0], [1], [0, 0, 1, 1], [], []>} : vector<8x256xbf16>, vector<256x768xbf16>, vector<8x768xf32> -> vector<8x768xf32>
    %c0_3 = arith.constant 0 : index
    %c0_4 = arith.constant 0 : index
    %4 = vector.load %arg5[%c0_3, %c0_4] : memref<1x768xf32, #tpu.memory_space<vmem>>, vector<1x768xf32>
    %5 = vector.broadcast %4 : vector<1x768xf32> to vector<8x768xf32>
    %6 = arith.addf %3, %5 : vector<8x768xf32>
    %c0_5 = arith.constant 0 : index
    %c0_6 = arith.constant 0 : index
    %7 = vector.load %arg11[%c0_5, %c0_6] : memref<8x768xf32, #tpu.memory_space<vmem>>, vector<8x768xf32>
    tpu.vector_store %arg11[%c0_5, %c0_6], %6 {strides = array<i32>} : memref<8x768xf32, #tpu.memory_space<vmem>>, vector<8x768xf32>,
    %cst_7 = arith.constant 0.000000e+00 : f32
    %8 = vector.broadcast %cst_7 : f32 to vector<8x256xf32>
    %c0_8 = arith.constant 0 : index
    %c0_9 = arith.constant 0 : index
    %9 = vector.load %arg12[%c0_8, %c0_9] : memref<8x256xf32, #tpu.memory_space<vmem>>, vector<8x256xf32>
    tpu.vector_store %arg12[%c0_8, %c0_9], %8 {strides = array<i32>} : memref<8x256xf32, #tpu.memory_space<vmem>>, vector<8x256xf32>,
    %c0_10 = arith.constant 0 : index
    %c0_11 = arith.constant 0 : index
    %10 = vector.load %arg4[%c0_10, %c0_11] : memref<256x768xbf16, #tpu.memory_space<vmem>>, vector<256x768xbf16>
    %c0_12 = arith.constant 0 : index
    %c0_13 = arith.constant 0 : index
    %11 = vector.load %arg6[%c0_12, %c0_13] : memref<1x768xf32, #tpu.memory_space<vmem>>, vector<1x768xf32>
    %c0_14 = arith.constant 0 : index
    %c0_15 = arith.constant 0 : index
    %12 = vector.load %arg2[%c0_14, %c0_15] : memref<1x256xf32, #tpu.memory_space<vmem>>, vector<1x256xf32>
    %c0_16 = arith.constant 0 : index
    %13 = memref.load %arg0[%c0_16] : memref<8xi32, #tpu.memory_space<smem>>
    %c0_i32 = arith.constant 0 : i32
    %c1_i32 = arith.constant 1 : i32
    %14 = arith.maxsi %c0_i32, %13 : i32
    %15 = arith.minsi %c1_i32, %14 : i32
    %16 = arith.index_cast %15 : i32 to index
    %c0_17 = arith.constant 0 : index
    %17 = vector.load %arg11[%16, %c0_17] : memref<8x768xf32, #tpu.memory_space<vmem>>, vector<1x768xf32>
    %18 = arith.truncf %12 : vector<1x256xf32> to vector<1x256xbf16>
    %cst_18 = arith.constant dense<0.000000e+00> : vector<1x768xf32>
    %19 = tpu.matmul %18, %10, %cst_18 {dimension_numbers = #tpu.dot_dimension_numbers<[1], [0], [0], [1], [0, 0, 1, 1], [], []>} : vector<1x256xbf16>, vector<256x768xbf16>, vector<1x768xf32> -> vector<1x768xf32>
    %20 = arith.addf %19, %11 : vector<1x768xf32>
    %21 = vector.extract_strided_slice %17 {offsets = [0, 0], sizes = [1, 256], strides = [1, 1]} : vector<1x768xf32> to vector<1x256xf32>
    %22 = vector.extract_strided_slice %17 {offsets = [0, 256], sizes = [1, 256], strides = [1, 1]} : vector<1x768xf32> to vector<1x256xf32>
    %23 = vector.extract_strided_slice %17 {offsets = [0, 512], sizes = [1, 256], strides = [1, 1]} : vector<1x768xf32> to vector<1x256xf32>
    %24 = vector.extract_strided_slice %20 {offsets = [0, 0], sizes = [1, 256], strides = [1, 1]} : vector<1x768xf32> to vector<1x256xf32>
    %25 = vector.extract_strided_slice %20 {offsets = [0, 256], sizes = [1, 256], strides = [1, 1]} : vector<1x768xf32> to vector<1x256xf32>
    %26 = vector.extract_strided_slice %20 {offsets = [0, 512], sizes = [1, 256], strides = [1, 1]} : vector<1x768xf32> to vector<1x256xf32>
    %27 = arith.addf %21, %24 : vector<1x256xf32>
    %28 = arith.negf %27 : vector<1x256xf32>
    %29 = math.exp %28 : vector<1x256xf32>
    %cst_19 = arith.constant 1.000000e+00 : f32
    %30 = vector.broadcast %cst_19 : f32 to vector<1x256xf32>
    %31 = arith.addf %30, %29 : vector<1x256xf32>
    %32 = arith.divf %30, %31 : vector<1x256xf32>
    %33 = arith.addf %22, %25 : vector<1x256xf32>
    %34 = arith.negf %33 : vector<1x256xf32>
    %35 = math.exp %34 : vector<1x256xf32>
    %cst_20 = arith.constant 1.000000e+00 : f32
    %36 = vector.broadcast %cst_20 : f32 to vector<1x256xf32>
    %37 = arith.addf %36, %35 : vector<1x256xf32>
    %38 = arith.divf %36, %37 : vector<1x256xf32>
    %39 = arith.mulf %32, %26 : vector<1x256xf32>
    %40 = arith.addf %23, %39 : vector<1x256xf32>
    %41 = math.tanh %40 : vector<1x256xf32>
    %cst_21 = arith.constant 1.000000e+00 : f32
    %42 = vector.broadcast %cst_21 : f32 to vector<1x256xf32>
    %43 = arith.subf %42, %38 : vector<1x256xf32>
    %44 = arith.mulf %43, %41 : vector<1x256xf32>
    %45 = arith.mulf %38, %12 : vector<1x256xf32>
    %46 = arith.addf %44, %45 : vector<1x256xf32>
    %c0_22 = arith.constant 0 : index
    %c0_23 = arith.constant 0 : index
    %47 = vector.load %arg12[%c0_22, %c0_23] : memref<8x256xf32, #tpu.memory_space<vmem>>, vector<1x256xf32>
    tpu.vector_store %arg12[%c0_22, %c0_23], %46 {strides = array<i32>} : memref<8x256xf32, #tpu.memory_space<vmem>>, vector<1x256xf32>,
    %c1 = arith.constant 1 : index
    %48 = memref.load %arg0[%c1] : memref<8xi32, #tpu.memory_space<smem>>
    %c0_i32_24 = arith.constant 0 : i32
    %c1_i32_25 = arith.constant 1 : i32
    %49 = arith.maxsi %c0_i32_24, %48 : i32
    %50 = arith.minsi %c1_i32_25, %49 : i32
    %51 = arith.index_cast %50 : i32 to index
    %c0_26 = arith.constant 0 : index
    %52 = vector.load %arg11[%51, %c0_26] : memref<8x768xf32, #tpu.memory_space<vmem>>, vector<1x768xf32>
    %53 = arith.truncf %46 : vector<1x256xf32> to vector<1x256xbf16>
    %cst_27 = arith.constant dense<0.000000e+00> : vector<1x768xf32>
    %54 = tpu.matmul %53, %10, %cst_27 {dimension_numbers = #tpu.dot_dimension_numbers<[1], [0], [0], [1], [0, 0, 1, 1], [], []>} : vector<1x256xbf16>, vector<256x768xbf16>, vector<1x768xf32> -> vector<1x768xf32>
    %55 = arith.addf %54, %11 : vector<1x768xf32>
    %56 = vector.extract_strided_slice %52 {offsets = [0, 0], sizes = [1, 256], strides = [1, 1]} : vector<1x768xf32> to vector<1x256xf32>
    %57 = vector.extract_strided_slice %52 {offsets = [0, 256], sizes = [1, 256], strides = [1, 1]} : vector<1x768xf32> to vector<1x256xf32>
    %58 = vector.extract_strided_slice %52 {offsets = [0, 512], sizes = [1, 256], strides = [1, 1]} : vector<1x768xf32> to vector<1x256xf32>
    %59 = vector.extract_strided_slice %55 {offsets = [0, 0], sizes = [1, 256], strides = [1, 1]} : vector<1x768xf32> to vector<1x256xf32>
    %60 = vector.extract_strided_slice %55 {offsets = [0, 256], sizes = [1, 256], strides = [1, 1]} : vector<1x768xf32> to vector<1x256xf32>
    %61 = vector.extract_strided_slice %55 {offsets = [0, 512], sizes = [1, 256], strides = [1, 1]} : vector<1x768xf32> to vector<1x256xf32>
    %62 = arith.addf %56, %59 : vector<1x256xf32>
    %63 = arith.negf %62 : vector<1x256xf32>
    %64 = math.exp %63 : vector<1x256xf32>
    %cst_28 = arith.constant 1.000000e+00 : f32
    %65 = vector.broadcast %cst_28 : f32 to vector<1x256xf32>
    %66 = arith.addf %65, %64 : vector<1x256xf32>
    %67 = arith.divf %65, %66 : vector<1x256xf32>
    %68 = arith.addf %57, %60 : vector<1x256xf32>
    %69 = arith.negf %68 : vector<1x256xf32>
    %70 = math.exp %69 : vector<1x256xf32>
    %cst_29 = arith.constant 1.000000e+00 : f32
    %71 = vector.broadcast %cst_29 : f32 to vector<1x256xf32>
    %72 = arith.addf %71, %70 : vector<1x256xf32>
    %73 = arith.divf %71, %72 : vector<1x256xf32>
    %74 = arith.mulf %67, %61 : vector<1x256xf32>
    %75 = arith.addf %58, %74 : vector<1x256xf32>
    %76 = math.tanh %75 : vector<1x256xf32>
    %cst_30 = arith.constant 1.000000e+00 : f32
    %77 = vector.broadcast %cst_30 : f32 to vector<1x256xf32>
    %78 = arith.subf %77, %73 : vector<1x256xf32>
    %79 = arith.mulf %78, %76 : vector<1x256xf32>
    %80 = arith.mulf %73, %46 : vector<1x256xf32>
    %81 = arith.addf %79, %80 : vector<1x256xf32>
    %c1_31 = arith.constant 1 : index
    %c0_32 = arith.constant 0 : index
    %82 = vector.load %arg12[%c1_31, %c0_32] : memref<8x256xf32, #tpu.memory_space<vmem>>, vector<1x256xf32>
    tpu.vector_store %arg12[%c1_31, %c0_32], %81 {strides = array<i32>} : memref<8x256xf32, #tpu.memory_space<vmem>>, vector<1x256xf32>,
    %c2 = arith.constant 2 : index
    %83 = memref.load %arg0[%c2] : memref<8xi32, #tpu.memory_space<smem>>
    %c0_i32_33 = arith.constant 0 : i32
    %c1_i32_34 = arith.constant 1 : i32
    %84 = arith.maxsi %c0_i32_33, %83 : i32
    %85 = arith.minsi %c1_i32_34, %84 : i32
    %86 = arith.index_cast %85 : i32 to index
    %c0_35 = arith.constant 0 : index
    %87 = vector.load %arg11[%86, %c0_35] : memref<8x768xf32, #tpu.memory_space<vmem>>, vector<1x768xf32>
    %88 = arith.truncf %81 : vector<1x256xf32> to vector<1x256xbf16>
    %cst_36 = arith.constant dense<0.000000e+00> : vector<1x768xf32>
    %89 = tpu.matmul %88, %10, %cst_36 {dimension_numbers = #tpu.dot_dimension_numbers<[1], [0], [0], [1], [0, 0, 1, 1], [], []>} : vector<1x256xbf16>, vector<256x768xbf16>, vector<1x768xf32> -> vector<1x768xf32>
    %90 = arith.addf %89, %11 : vector<1x768xf32>
    %91 = vector.extract_strided_slice %87 {offsets = [0, 0], sizes = [1, 256], strides = [1, 1]} : vector<1x768xf32> to vector<1x256xf32>
    %92 = vector.extract_strided_slice %87 {offsets = [0, 256], sizes = [1, 256], strides = [1, 1]} : vector<1x768xf32> to vector<1x256xf32>
    %93 = vector.extract_strided_slice %87 {offsets = [0, 512], sizes = [1, 256], strides = [1, 1]} : vector<1x768xf32> to vector<1x256xf32>
    %94 = vector.extract_strided_slice %90 {offsets = [0, 0], sizes = [1, 256], strides = [1, 1]} : vector<1x768xf32> to vector<1x256xf32>
    %95 = vector.extract_strided_slice %90 {offsets = [0, 256], sizes = [1, 256], strides = [1, 1]} : vector<1x768xf32> to vector<1x256xf32>
    %96 = vector.extract_strided_slice %90 {offsets = [0, 512], sizes = [1, 256], strides = [1, 1]} : vector<1x768xf32> to vector<1x256xf32>
    %97 = arith.addf %91, %94 : vector<1x256xf32>
    %98 = arith.negf %97 : vector<1x256xf32>
    %99 = math.exp %98 : vector<1x256xf32>
    %cst_37 = arith.constant 1.000000e+00 : f32
    %100 = vector.broadcast %cst_37 : f32 to vector<1x256xf32>
    %101 = arith.addf %100, %99 : vector<1x256xf32>
    %102 = arith.divf %100, %101 : vector<1x256xf32>
    %103 = arith.addf %92, %95 : vector<1x256xf32>
    %104 = arith.negf %103 : vector<1x256xf32>
    %105 = math.exp %104 : vector<1x256xf32>
    %cst_38 = arith.constant 1.000000e+00 : f32
    %106 = vector.broadcast %cst_38 : f32 to vector<1x256xf32>
    %107 = arith.addf %106, %105 : vector<1x256xf32>
    %108 = arith.divf %106, %107 : vector<1x256xf32>
    %109 = arith.mulf %102, %96 : vector<1x256xf32>
    %110 = arith.addf %93, %109 : vector<1x256xf32>
    %111 = math.tanh %110 : vector<1x256xf32>
    %cst_39 = arith.constant 1.000000e+00 : f32
    %112 = vector.broadcast %cst_39 : f32 to vector<1x256xf32>
    %113 = arith.subf %112, %108 : vector<1x256xf32>
    %114 = arith.mulf %113, %111 : vector<1x256xf32>
    %115 = arith.mulf %108, %81 : vector<1x256xf32>
    %116 = arith.addf %114, %115 : vector<1x256xf32>
    %c2_40 = arith.constant 2 : index
    %c0_41 = arith.constant 0 : index
    %117 = vector.load %arg12[%c2_40, %c0_41] : memref<8x256xf32, #tpu.memory_space<vmem>>, vector<1x256xf32>
    tpu.vector_store %arg12[%c2_40, %c0_41], %116 {strides = array<i32>} : memref<8x256xf32, #tpu.memory_space<vmem>>, vector<1x256xf32>,
    %c3 = arith.constant 3 : index
    %118 = memref.load %arg0[%c3] : memref<8xi32, #tpu.memory_space<smem>>
    %c0_i32_42 = arith.constant 0 : i32
    %c1_i32_43 = arith.constant 1 : i32
    %119 = arith.maxsi %c0_i32_42, %118 : i32
    %120 = arith.minsi %c1_i32_43, %119 : i32
    %121 = arith.index_cast %120 : i32 to index
    %c0_44 = arith.constant 0 : index
    %122 = vector.load %arg11[%121, %c0_44] : memref<8x768xf32, #tpu.memory_space<vmem>>, vector<1x768xf32>
    %123 = arith.truncf %116 : vector<1x256xf32> to vector<1x256xbf16>
    %cst_45 = arith.constant dense<0.000000e+00> : vector<1x768xf32>
    %124 = tpu.matmul %123, %10, %cst_45 {dimension_numbers = #tpu.dot_dimension_numbers<[1], [0], [0], [1], [0, 0, 1, 1], [], []>} : vector<1x256xbf16>, vector<256x768xbf16>, vector<1x768xf32> -> vector<1x768xf32>
    %125 = arith.addf %124, %11 : vector<1x768xf32>
    %126 = vector.extract_strided_slice %122 {offsets = [0, 0], sizes = [1, 256], strides = [1, 1]} : vector<1x768xf32> to vector<1x256xf32>
    %127 = vector.extract_strided_slice %122 {offsets = [0, 256], sizes = [1, 256], strides = [1, 1]} : vector<1x768xf32> to vector<1x256xf32>
    %128 = vector.extract_strided_slice %122 {offsets = [0, 512], sizes = [1, 256], strides = [1, 1]} : vector<1x768xf32> to vector<1x256xf32>
    %129 = vector.extract_strided_slice %125 {offsets = [0, 0], sizes = [1, 256], strides = [1, 1]} : vector<1x768xf32> to vector<1x256xf32>
    %130 = vector.extract_strided_slice %125 {offsets = [0, 256], sizes = [1, 256], strides = [1, 1]} : vector<1x768xf32> to vector<1x256xf32>
    %131 = vector.extract_strided_slice %125 {offsets = [0, 512], sizes = [1, 256], strides = [1, 1]} : vector<1x768xf32> to vector<1x256xf32>
    %132 = arith.addf %126, %129 : vector<1x256xf32>
    %133 = arith.negf %132 : vector<1x256xf32>
    %134 = math.exp %133 : vector<1x256xf32>
    %cst_46 = arith.constant 1.000000e+00 : f32
    %135 = vector.broadcast %cst_46 : f32 to vector<1x256xf32>
    %136 = arith.addf %135, %134 : vector<1x256xf32>
    %137 = arith.divf %135, %136 : vector<1x256xf32>
    %138 = arith.addf %127, %130 : vector<1x256xf32>
    %139 = arith.negf %138 : vector<1x256xf32>
    %140 = math.exp %139 : vector<1x256xf32>
    %cst_47 = arith.constant 1.000000e+00 : f32
    %141 = vector.broadcast %cst_47 : f32 to vector<1x256xf32>
    %142 = arith.addf %141, %140 : vector<1x256xf32>
    %143 = arith.divf %141, %142 : vector<1x256xf32>
    %144 = arith.mulf %137, %131 : vector<1x256xf32>
    %145 = arith.addf %128, %144 : vector<1x256xf32>
    %146 = math.tanh %145 : vector<1x256xf32>
    %cst_48 = arith.constant 1.000000e+00 : f32
    %147 = vector.broadcast %cst_48 : f32 to vector<1x256xf32>
    %148 = arith.subf %147, %143 : vector<1x256xf32>
    %149 = arith.mulf %148, %146 : vector<1x256xf32>
    %150 = arith.mulf %143, %116 : vector<1x256xf32>
    %151 = arith.addf %149, %150 : vector<1x256xf32>
    %c3_49 = arith.constant 3 : index
    %c0_50 = arith.constant 0 : index
    %152 = vector.load %arg12[%c3_49, %c0_50] : memref<8x256xf32, #tpu.memory_space<vmem>>, vector<1x256xf32>
    tpu.vector_store %arg12[%c3_49, %c0_50], %151 {strides = array<i32>} : memref<8x256xf32, #tpu.memory_space<vmem>>, vector<1x256xf32>,
    %c4 = arith.constant 4 : index
    %153 = memref.load %arg0[%c4] : memref<8xi32, #tpu.memory_space<smem>>
    %c0_i32_51 = arith.constant 0 : i32
    %c1_i32_52 = arith.constant 1 : i32
    %154 = arith.maxsi %c0_i32_51, %153 : i32
    %155 = arith.minsi %c1_i32_52, %154 : i32
    %156 = arith.index_cast %155 : i32 to index
    %c0_53 = arith.constant 0 : index
    %157 = vector.load %arg11[%156, %c0_53] : memref<8x768xf32, #tpu.memory_space<vmem>>, vector<1x768xf32>
    %158 = arith.truncf %151 : vector<1x256xf32> to vector<1x256xbf16>
    %cst_54 = arith.constant dense<0.000000e+00> : vector<1x768xf32>
    %159 = tpu.matmul %158, %10, %cst_54 {dimension_numbers = #tpu.dot_dimension_numbers<[1], [0], [0], [1], [0, 0, 1, 1], [], []>} : vector<1x256xbf16>, vector<256x768xbf16>, vector<1x768xf32> -> vector<1x768xf32>
    %160 = arith.addf %159, %11 : vector<1x768xf32>
    %161 = vector.extract_strided_slice %157 {offsets = [0, 0], sizes = [1, 256], strides = [1, 1]} : vector<1x768xf32> to vector<1x256xf32>
    %162 = vector.extract_strided_slice %157 {offsets = [0, 256], sizes = [1, 256], strides = [1, 1]} : vector<1x768xf32> to vector<1x256xf32>
    %163 = vector.extract_strided_slice %157 {offsets = [0, 512], sizes = [1, 256], strides = [1, 1]} : vector<1x768xf32> to vector<1x256xf32>
    %164 = vector.extract_strided_slice %160 {offsets = [0, 0], sizes = [1, 256], strides = [1, 1]} : vector<1x768xf32> to vector<1x256xf32>
    %165 = vector.extract_strided_slice %160 {offsets = [0, 256], sizes = [1, 256], strides = [1, 1]} : vector<1x768xf32> to vector<1x256xf32>
    %166 = vector.extract_strided_slice %160 {offsets = [0, 512], sizes = [1, 256], strides = [1, 1]} : vector<1x768xf32> to vector<1x256xf32>
    %167 = arith.addf %161, %164 : vector<1x256xf32>
    %168 = arith.negf %167 : vector<1x256xf32>
    %169 = math.exp %168 : vector<1x256xf32>
    %cst_55 = arith.constant 1.000000e+00 : f32
    %170 = vector.broadcast %cst_55 : f32 to vector<1x256xf32>
    %171 = arith.addf %170, %169 : vector<1x256xf32>
    %172 = arith.divf %170, %171 : vector<1x256xf32>
    %173 = arith.addf %162, %165 : vector<1x256xf32>
    %174 = arith.negf %173 : vector<1x256xf32>
    %175 = math.exp %174 : vector<1x256xf32>
    %cst_56 = arith.constant 1.000000e+00 : f32
    %176 = vector.broadcast %cst_56 : f32 to vector<1x256xf32>
    %177 = arith.addf %176, %175 : vector<1x256xf32>
    %178 = arith.divf %176, %177 : vector<1x256xf32>
    %179 = arith.mulf %172, %166 : vector<1x256xf32>
    %180 = arith.addf %163, %179 : vector<1x256xf32>
    %181 = math.tanh %180 : vector<1x256xf32>
    %cst_57 = arith.constant 1.000000e+00 : f32
    %182 = vector.broadcast %cst_57 : f32 to vector<1x256xf32>
    %183 = arith.subf %182, %178 : vector<1x256xf32>
    %184 = arith.mulf %183, %181 : vector<1x256xf32>
    %185 = arith.mulf %178, %151 : vector<1x256xf32>
    %186 = arith.addf %184, %185 : vector<1x256xf32>
    %c4_58 = arith.constant 4 : index
    %c0_59 = arith.constant 0 : index
    %187 = vector.load %arg12[%c4_58, %c0_59] : memref<8x256xf32, #tpu.memory_space<vmem>>, vector<1x256xf32>
    tpu.vector_store %arg12[%c4_58, %c0_59], %186 {strides = array<i32>} : memref<8x256xf32, #tpu.memory_space<vmem>>, vector<1x256xf32>,
    %c5 = arith.constant 5 : index
    %188 = memref.load %arg0[%c5] : memref<8xi32, #tpu.memory_space<smem>>
    %c0_i32_60 = arith.constant 0 : i32
    %c1_i32_61 = arith.constant 1 : i32
    %189 = arith.maxsi %c0_i32_60, %188 : i32
    %190 = arith.minsi %c1_i32_61, %189 : i32
    %191 = arith.index_cast %190 : i32 to index
    %c0_62 = arith.constant 0 : index
    %192 = vector.load %arg11[%191, %c0_62] : memref<8x768xf32, #tpu.memory_space<vmem>>, vector<1x768xf32>
    %193 = arith.truncf %186 : vector<1x256xf32> to vector<1x256xbf16>
    %cst_63 = arith.constant dense<0.000000e+00> : vector<1x768xf32>
    %194 = tpu.matmul %193, %10, %cst_63 {dimension_numbers = #tpu.dot_dimension_numbers<[1], [0], [0], [1], [0, 0, 1, 1], [], []>} : vector<1x256xbf16>, vector<256x768xbf16>, vector<1x768xf32> -> vector<1x768xf32>
    %195 = arith.addf %194, %11 : vector<1x768xf32>
    %196 = vector.extract_strided_slice %192 {offsets = [0, 0], sizes = [1, 256], strides = [1, 1]} : vector<1x768xf32> to vector<1x256xf32>
    %197 = vector.extract_strided_slice %192 {offsets = [0, 256], sizes = [1, 256], strides = [1, 1]} : vector<1x768xf32> to vector<1x256xf32>
    %198 = vector.extract_strided_slice %192 {offsets = [0, 512], sizes = [1, 256], strides = [1, 1]} : vector<1x768xf32> to vector<1x256xf32>
    %199 = vector.extract_strided_slice %195 {offsets = [0, 0], sizes = [1, 256], strides = [1, 1]} : vector<1x768xf32> to vector<1x256xf32>
    %200 = vector.extract_strided_slice %195 {offsets = [0, 256], sizes = [1, 256], strides = [1, 1]} : vector<1x768xf32> to vector<1x256xf32>
    %201 = vector.extract_strided_slice %195 {offsets = [0, 512], sizes = [1, 256], strides = [1, 1]} : vector<1x768xf32> to vector<1x256xf32>
    %202 = arith.addf %196, %199 : vector<1x256xf32>
    %203 = arith.negf %202 : vector<1x256xf32>
    %204 = math.exp %203 : vector<1x256xf32>
    %cst_64 = arith.constant 1.000000e+00 : f32
    %205 = vector.broadcast %cst_64 : f32 to vector<1x256xf32>
    %206 = arith.addf %205, %204 : vector<1x256xf32>
    %207 = arith.divf %205, %206 : vector<1x256xf32>
    %208 = arith.addf %197, %200 : vector<1x256xf32>
    %209 = arith.negf %208 : vector<1x256xf32>
    %210 = math.exp %209 : vector<1x256xf32>
    %cst_65 = arith.constant 1.000000e+00 : f32
    %211 = vector.broadcast %cst_65 : f32 to vector<1x256xf32>
    %212 = arith.addf %211, %210 : vector<1x256xf32>
    %213 = arith.divf %211, %212 : vector<1x256xf32>
    %214 = arith.mulf %207, %201 : vector<1x256xf32>
    %215 = arith.addf %198, %214 : vector<1x256xf32>
    %216 = math.tanh %215 : vector<1x256xf32>
    %cst_66 = arith.constant 1.000000e+00 : f32
    %217 = vector.broadcast %cst_66 : f32 to vector<1x256xf32>
    %218 = arith.subf %217, %213 : vector<1x256xf32>
    %219 = arith.mulf %218, %216 : vector<1x256xf32>
    %220 = arith.mulf %213, %186 : vector<1x256xf32>
    %221 = arith.addf %219, %220 : vector<1x256xf32>
    %c5_67 = arith.constant 5 : index
    %c0_68 = arith.constant 0 : index
    %222 = vector.load %arg12[%c5_67, %c0_68] : memref<8x256xf32, #tpu.memory_space<vmem>>, vector<1x256xf32>
    tpu.vector_store %arg12[%c5_67, %c0_68], %221 {strides = array<i32>} : memref<8x256xf32, #tpu.memory_space<vmem>>, vector<1x256xf32>,
    %c6 = arith.constant 6 : index
    %223 = memref.load %arg0[%c6] : memref<8xi32, #tpu.memory_space<smem>>
    %c0_i32_69 = arith.constant 0 : i32
    %c1_i32_70 = arith.constant 1 : i32
    %224 = arith.maxsi %c0_i32_69, %223 : i32
    %225 = arith.minsi %c1_i32_70, %224 : i32
    %226 = arith.index_cast %225 : i32 to index
    %c0_71 = arith.constant 0 : index
    %227 = vector.load %arg11[%226, %c0_71] : memref<8x768xf32, #tpu.memory_space<vmem>>, vector<1x768xf32>
    %228 = arith.truncf %221 : vector<1x256xf32> to vector<1x256xbf16>
    %cst_72 = arith.constant dense<0.000000e+00> : vector<1x768xf32>
    %229 = tpu.matmul %228, %10, %cst_72 {dimension_numbers = #tpu.dot_dimension_numbers<[1], [0], [0], [1], [0, 0, 1, 1], [], []>} : vector<1x256xbf16>, vector<256x768xbf16>, vector<1x768xf32> -> vector<1x768xf32>
    %230 = arith.addf %229, %11 : vector<1x768xf32>
    %231 = vector.extract_strided_slice %227 {offsets = [0, 0], sizes = [1, 256], strides = [1, 1]} : vector<1x768xf32> to vector<1x256xf32>
    %232 = vector.extract_strided_slice %227 {offsets = [0, 256], sizes = [1, 256], strides = [1, 1]} : vector<1x768xf32> to vector<1x256xf32>
    %233 = vector.extract_strided_slice %227 {offsets = [0, 512], sizes = [1, 256], strides = [1, 1]} : vector<1x768xf32> to vector<1x256xf32>
    %234 = vector.extract_strided_slice %230 {offsets = [0, 0], sizes = [1, 256], strides = [1, 1]} : vector<1x768xf32> to vector<1x256xf32>
    %235 = vector.extract_strided_slice %230 {offsets = [0, 256], sizes = [1, 256], strides = [1, 1]} : vector<1x768xf32> to vector<1x256xf32>
    %236 = vector.extract_strided_slice %230 {offsets = [0, 512], sizes = [1, 256], strides = [1, 1]} : vector<1x768xf32> to vector<1x256xf32>
    %237 = arith.addf %231, %234 : vector<1x256xf32>
    %238 = arith.negf %237 : vector<1x256xf32>
    %239 = math.exp %238 : vector<1x256xf32>
    %cst_73 = arith.constant 1.000000e+00 : f32
    %240 = vector.broadcast %cst_73 : f32 to vector<1x256xf32>
    %241 = arith.addf %240, %239 : vector<1x256xf32>
    %242 = arith.divf %240, %241 : vector<1x256xf32>
    %243 = arith.addf %232, %235 : vector<1x256xf32>
    %244 = arith.negf %243 : vector<1x256xf32>
    %245 = math.exp %244 : vector<1x256xf32>
    %cst_74 = arith.constant 1.000000e+00 : f32
    %246 = vector.broadcast %cst_74 : f32 to vector<1x256xf32>
    %247 = arith.addf %246, %245 : vector<1x256xf32>
    %248 = arith.divf %246, %247 : vector<1x256xf32>
    %249 = arith.mulf %242, %236 : vector<1x256xf32>
    %250 = arith.addf %233, %249 : vector<1x256xf32>
    %251 = math.tanh %250 : vector<1x256xf32>
    %cst_75 = arith.constant 1.000000e+00 : f32
    %252 = vector.broadcast %cst_75 : f32 to vector<1x256xf32>
    %253 = arith.subf %252, %248 : vector<1x256xf32>
    %254 = arith.mulf %253, %251 : vector<1x256xf32>
    %255 = arith.mulf %248, %221 : vector<1x256xf32>
    %256 = arith.addf %254, %255 : vector<1x256xf32>
    %c6_76 = arith.constant 6 : index
    %c0_77 = arith.constant 0 : index
    %257 = vector.load %arg12[%c6_76, %c0_77] : memref<8x256xf32, #tpu.memory_space<vmem>>, vector<1x256xf32>
    tpu.vector_store %arg12[%c6_76, %c0_77], %256 {strides = array<i32>} : memref<8x256xf32, #tpu.memory_space<vmem>>, vector<1x256xf32>,
    %c7 = arith.constant 7 : index
    %258 = memref.load %arg0[%c7] : memref<8xi32, #tpu.memory_space<smem>>
    %c0_i32_78 = arith.constant 0 : i32
    %c1_i32_79 = arith.constant 1 : i32
    %259 = arith.maxsi %c0_i32_78, %258 : i32
    %260 = arith.minsi %c1_i32_79, %259 : i32
    %261 = arith.index_cast %260 : i32 to index
    %c0_80 = arith.constant 0 : index
    %262 = vector.load %arg11[%261, %c0_80] : memref<8x768xf32, #tpu.memory_space<vmem>>, vector<1x768xf32>
    %263 = arith.truncf %256 : vector<1x256xf32> to vector<1x256xbf16>
    %cst_81 = arith.constant dense<0.000000e+00> : vector<1x768xf32>
    %264 = tpu.matmul %263, %10, %cst_81 {dimension_numbers = #tpu.dot_dimension_numbers<[1], [0], [0], [1], [0, 0, 1, 1], [], []>} : vector<1x256xbf16>, vector<256x768xbf16>, vector<1x768xf32> -> vector<1x768xf32>
    %265 = arith.addf %264, %11 : vector<1x768xf32>
    %266 = vector.extract_strided_slice %262 {offsets = [0, 0], sizes = [1, 256], strides = [1, 1]} : vector<1x768xf32> to vector<1x256xf32>
    %267 = vector.extract_strided_slice %262 {offsets = [0, 256], sizes = [1, 256], strides = [1, 1]} : vector<1x768xf32> to vector<1x256xf32>
    %268 = vector.extract_strided_slice %262 {offsets = [0, 512], sizes = [1, 256], strides = [1, 1]} : vector<1x768xf32> to vector<1x256xf32>
    %269 = vector.extract_strided_slice %265 {offsets = [0, 0], sizes = [1, 256], strides = [1, 1]} : vector<1x768xf32> to vector<1x256xf32>
    %270 = vector.extract_strided_slice %265 {offsets = [0, 256], sizes = [1, 256], strides = [1, 1]} : vector<1x768xf32> to vector<1x256xf32>
    %271 = vector.extract_strided_slice %265 {offsets = [0, 512], sizes = [1, 256], strides = [1, 1]} : vector<1x768xf32> to vector<1x256xf32>
    %272 = arith.addf %266, %269 : vector<1x256xf32>
    %273 = arith.negf %272 : vector<1x256xf32>
    %274 = math.exp %273 : vector<1x256xf32>
    %cst_82 = arith.constant 1.000000e+00 : f32
    %275 = vector.broadcast %cst_82 : f32 to vector<1x256xf32>
    %276 = arith.addf %275, %274 : vector<1x256xf32>
    %277 = arith.divf %275, %276 : vector<1x256xf32>
    %278 = arith.addf %267, %270 : vector<1x256xf32>
    %279 = arith.negf %278 : vector<1x256xf32>
    %280 = math.exp %279 : vector<1x256xf32>
    %cst_83 = arith.constant 1.000000e+00 : f32
    %281 = vector.broadcast %cst_83 : f32 to vector<1x256xf32>
    %282 = arith.addf %281, %280 : vector<1x256xf32>
    %283 = arith.divf %281, %282 : vector<1x256xf32>
    %284 = arith.mulf %277, %271 : vector<1x256xf32>
    %285 = arith.addf %268, %284 : vector<1x256xf32>
    %286 = math.tanh %285 : vector<1x256xf32>
    %cst_84 = arith.constant 1.000000e+00 : f32
    %287 = vector.broadcast %cst_84 : f32 to vector<1x256xf32>
    %288 = arith.subf %287, %283 : vector<1x256xf32>
    %289 = arith.mulf %288, %286 : vector<1x256xf32>
    %290 = arith.mulf %283, %256 : vector<1x256xf32>
    %291 = arith.addf %289, %290 : vector<1x256xf32>
    %c7_85 = arith.constant 7 : index
    %c0_86 = arith.constant 0 : index
    %292 = vector.load %arg12[%c7_85, %c0_86] : memref<8x256xf32, #tpu.memory_space<vmem>>, vector<1x256xf32>
    tpu.vector_store %arg12[%c7_85, %c0_86], %291 {strides = array<i32>} : memref<8x256xf32, #tpu.memory_space<vmem>>, vector<1x256xf32>,
    %c0_87 = arith.constant 0 : index
    %c0_88 = arith.constant 0 : index
    %293 = vector.load %arg10[%c0_87, %c0_88] : memref<1x256xf32, #tpu.memory_space<vmem>>, vector<1x256xf32>
    tpu.vector_store %arg10[%c0_87, %c0_88], %291 {strides = array<i32>} : memref<1x256xf32, #tpu.memory_space<vmem>>, vector<1x256xf32>,
    %c0_89 = arith.constant 0 : index
    %c0_90 = arith.constant 0 : index
    %294 = vector.load %arg12[%c0_89, %c0_90] : memref<8x256xf32, #tpu.memory_space<vmem>>, vector<8x256xf32>
    %295 = arith.truncf %294 : vector<8x256xf32> to vector<8x256xbf16>
    %c0_91 = arith.constant 0 : index
    %c0_92 = arith.constant 0 : index
    %296 = vector.load %arg7[%c0_91, %c0_92] : memref<256x128xbf16, #tpu.memory_space<vmem>>, vector<256x128xbf16>
    %cst_93 = arith.constant dense<0.000000e+00> : vector<8x128xf32>
    %297 = tpu.matmul %295, %296, %cst_93 {dimension_numbers = #tpu.dot_dimension_numbers<[1], [0], [0], [1], [0, 0, 1, 1], [], []>} : vector<8x256xbf16>, vector<256x128xbf16>, vector<8x128xf32> -> vector<8x128xf32>
    %c0_94 = arith.constant 0 : index
    %c0_95 = arith.constant 0 : index
    %298 = vector.load %arg8[%c0_94, %c0_95] : memref<1x128xf32, #tpu.memory_space<vmem>>, vector<1x128xf32>
    %299 = vector.broadcast %298 : vector<1x128xf32> to vector<8x128xf32>
    %300 = arith.addf %297, %299 : vector<8x128xf32>
    %cst_96 = arith.constant dense<0xFF800000> : vector<8xf32>
    %301 = vector.multi_reduction <maximumf>, %300, %cst_96 [1] : vector<8x128xf32> to vector<8xf32>
    %302 = vector.shape_cast %301 : vector<8xf32> to vector<8x1xf32>
    %303 = vector.broadcast %302 : vector<8x1xf32> to vector<8x128xf32>
    %304 = arith.subf %300, %303 : vector<8x128xf32>
    %305 = math.exp %304 : vector<8x128xf32>
    %cst_97 = arith.constant dense<0.000000e+00> : vector<8xf32>
    %306 = vector.multi_reduction <add>, %305, %cst_97 [1] : vector<8x128xf32> to vector<8xf32>
    %307 = vector.shape_cast %306 : vector<8xf32> to vector<8x1xf32>
    %308 = math.log %307 : vector<8x1xf32>
    %309 = vector.broadcast %308 : vector<8x1xf32> to vector<8x128xf32>
    %310 = arith.subf %304, %309 : vector<8x128xf32>
    %c0_98 = arith.constant 0 : index
    %c0_99 = arith.constant 0 : index
    %311 = vector.load %arg9[%c0_98, %c0_99] : memref<8x128xf32, #tpu.memory_space<vmem>>, vector<8x128xf32>
    tpu.vector_store %arg9[%c0_98, %c0_99], %310 {strides = array<i32>} : memref<8x128xf32, #tpu.memory_space<vmem>>, vector<8x128xf32>,
    return
  }
}

</mosaic_0001>

<bundles_post_ra>
// kernel: tpu_custom_call.1
= control target key start
LH: loop header
LB: loop body
LE: loop exit
PB: predicated region body
PF: predicated region fallthrough
CT: control target
= control target key end

     0   :  { %16 = vsyncpa [#allocation7], 0  ;;  %s6337_s0 = inlined_call_operand.hbm [shape: s32[8], index: 0, kind: input, shape index: {}]   ;;  %s6338_s1 = inlined_call_operand.hbm [shape: f32[8,256], index: 1, kind: input, shape index: {}]   ;;  %s6339_s2 = inlined_call_operand.vmem [shape: f32[1,256], index: 2, kind: input, shape index: {}]   ;;  %s6340_s3 = inlined_call_operand.hbm [shape: bf16[256,768], index: 3, kind: input, shape index: {}]   ;;  %s6341_s4 = inlined_call_operand.hbm [shape: bf16[256,768], index: 4, kind: input, shape index: {}]   ;;  %s6342_s5 = inlined_call_operand.vmem [shape: f32[1,768], index: 5, kind: input, shape index: {}]   ;;  %s6343_s6 = inlined_call_operand.hbm [shape: f32[1,768], index: 6, kind: input, shape index: {}]   ;;  %s6344_s7 = inlined_call_operand.hbm [shape: bf16[256,128], index: 7, kind: input, shape index: {}]   ;;  %s6345_s8 = inlined_call_operand.vmem [shape: f32[1,128], index: 8, kind: input, shape index: {}]   ;;  %s6346_s9 = inlined_call_operand.hbm [shape: f32[8,128], index: 9, kind: output, shape index: {0}]   ;;  %s6347_s10 = inlined_call_operand.hbm [shape: f32[1,256], index: 10, kind: output, shape index: {1}]  }
   0x1   :  { %17 = vsyncpa [#allocation5], 0 }
   0x2   :  { %18 = vsyncpa [#allocation10], 0 }
   0x3   :  { %19 = vsyncpa [#allocation13], 0 }
   0x4   :  { %20 = vsyncpa [#allocation6], 0 }
   0x5   :  { %21 = vsyncpa [#allocation17], 0  ;;  %s4666_s13 = smov [#allocation9]  }
   0x6   :  { %s47_s14 = sshll.u32 %s4666_s13, 4  ;;  %s48_s14 = int_to_ptr.vmem [resolvable:$true] %s47_s14 }
   0x7   :  { %s4514_s15 = scalar_lea.vmem %s48_s14, 12288  ;;  %p4519_p1 = scmp.lt.s32.totalorder %s48_s14, %s48_s14 }
   0x8   :  { %p4515_p0 = scmp.ne.s32.totalorder %s48_s14, %s4514_s15  ;;  %p4520_p2 = scmp.lt.s32.totalorder %s4514_s15, %s4514_s15 }
   0xa   :  { %p4521_p3 = por %p4520_p2, %p4519_p1 }
   0xc   :  { %p4522_p4 = pnand %p4521_p3, %p4515_p0 }
   0xe   :  { %4525 = shalt.err (!%p4522_p4)
}
   0xf   :  { %s4667_s16 = smov 384   ;;  %s4668_s17 = smov 24  }
  0x10   :  { %53 = dma.hbm_to_vmem [thread:$0]  %s6340_s3, 12288, %s48_s14, [#allocation10], %s4667_s16, %s4667_s16, %s4668_s17  }
  0x11   :  { %s4669_s20 = smov [#allocation12]  }
  0x12   :  { %s74_s21 = sshll.u32 %s4669_s20, 4  ;;  %s75_s21 = int_to_ptr.vmem [resolvable:$true] %s74_s21 }
  0x13   :  { %s4534_s22 = scalar_lea.vmem %s75_s21, 96  ;;  %p4539_p6 = scmp.lt.s32.totalorder %s75_s21, %s75_s21 }
  0x14   :  { %p4535_p5 = scmp.ne.s32.totalorder %s75_s21, %s4534_s22  ;;  %p4540_p7 = scmp.lt.s32.totalorder %s4534_s22, %s4534_s22 }
  0x16   :  { %p4541_p8 = por %p4540_p7, %p4539_p6 }
  0x18   :  { %p4542_p9 = pnand %p4541_p8, %p4535_p5 }
  0x1a   :  { %4545 = shalt.err (!%p4542_p9)
}
  0x1b   :  { %77 = dma.hbm_to_vmem [thread:$0]  %s6343_s6, 96, %s75_s21, [#allocation13]  }
  0x1c   :  { %s4670_s25 = smov [#allocation4]   ;;  %s4671_s3 = smov [#allocation8]  }
  0x1d   :  { %29 = dma.hbm_to_smem %s6337_s0, 16, %s4670_s25, [#allocation7]  }
  0x1e   :  { %s36_s28 = sshll.u32 %s4671_s3, 4  ;;  %s4672_s29 = smov [#allocation11]   ;;  %s37_s28 = int_to_ptr.vmem [resolvable:$true] %s36_s28 }
  0x1f   :  { %s59_s30 = sshll.u32 %s4672_s29, 4  ;;  %s4562_s11 = scalar_lea.vmem %s37_s28, 256  ;;  %s60_s30 = int_to_ptr.vmem [resolvable:$true] %s59_s30 }
  0x20   :  { %p4563_p10 = scmp.ne.s32.totalorder %s37_s28, %s4562_s11  ;;  %p4567_p11 = scmp.lt.s32.totalorder %s37_s28, %s37_s28 }
  0x21   :  { %p4568_p12 = scmp.lt.s32.totalorder %s4562_s11, %s4562_s11 }
  0x23   :  { %p4569_p13 = por %p4568_p12, %p4567_p11 }
  0x25   :  { %p4570_p0 = pnand %p4569_p13, %p4563_p10 }
  0x27   :  { %4573 = shalt.err (!%p4570_p0)
}
  0x28   :  { %39 = dma.hbm_to_vmem [thread:$0]  %s6338_s1, 256, %s37_s28, [#allocation5]  }
  0x29   :  { %s4582_s6 = scalar_lea.vmem %s60_s30, 12288  ;;  %p4587_p2 = scmp.lt.s32.totalorder %s60_s30, %s60_s30 }
  0x2a   :  { %p4583_p1 = scmp.ne.s32.totalorder %s60_s30, %s4582_s6  ;;  %p4588_p3 = scmp.lt.s32.totalorder %s4582_s6, %s4582_s6 }
  0x2c   :  { %p4589_p4 = por %p4588_p3, %p4587_p2 }
  0x2e   :  { %p4590_p5 = pnand %p4589_p4, %p4583_p1 }
  0x30   :  { %4593 = shalt.err (!%p4590_p5)
}
  0x31   :  { %65 = dma.hbm_to_vmem [thread:$0]  %s6341_s4, 12288, %s60_s30, [#allocation10], %s4667_s16, %s4667_s16, %s4668_s17  }
  0x32   :  { %s4673_s15 = smov [#allocation14]  }
  0x33   :  { %s83_s18 = sshll.u32 %s4673_s15, 4  ;;  %s84_s18 = int_to_ptr.vmem [resolvable:$true] %s83_s18 }
  0x34   :  { %s4602_s19 = scalar_lea.vmem %s84_s18, 2048  ;;  %p4607_p7 = scmp.lt.s32.totalorder %s84_s18, %s84_s18 }
  0x35   :  { %p4603_p6 = scmp.ne.s32.totalorder %s84_s18, %s4602_s19  ;;  %p4608_p8 = scmp.lt.s32.totalorder %s4602_s19, %s4602_s19 }
  0x37   :  { %p4609_p9 = por %p4608_p8, %p4607_p7 }
  0x39   :  { %p4610_p10 = pnand %p4609_p9, %p4603_p6 }
  0x3b   :  { %4613 = shalt.err (!%p4610_p10)
}
  0x3c   :  { %s4674_s1 = smov 64   ;;  %s4675_s20 = smov 4  }
  0x3d   :  { %89 = dma.hbm_to_vmem [thread:$0]  %s6344_s7, 2048, %s84_s18, [#allocation13], %s4674_s1, %s4674_s1, %s4675_s20  }
  0x3e   :  { %4654 = dma.done.wait [#allocation7], 16  }
  0x3f   :  { %4655 = vsyncadd [#allocation7], 4294967280 }
  0x40   :  { %4656 = dma.done.wait [#allocation5], 256  }
  0x41   :  { %4657 = vsyncadd [#allocation5], 4294967040 }
  0x42   :  { %4658 = dma.done.wait [#allocation10], 24576  }
  0x43   :  { %4659 = vsyncadd [#allocation10], 4294942720 }
  0x44   :  { %4660 = dma.done.wait [#allocation13], 2144  }
  0x45   :  { %4661 = vsyncadd [#allocation13], 4294965152 }
  0x46   :  { %110 = sfence }
  0x47   :  { %v3926_v0 = vld [vmem:[#allocation9 + $0x154] ss:$24 sps:$4 sm:$0xff]   ;;  %v3930_v2 = vld [vmem:[#allocation9 + $0x150] ss:$24 sps:$4 sm:$0xff]   ;;  %v3932_v4 = vld [vmem:[#allocation9 + $0x124] ss:$24 sps:$4 sm:$0xff]  }
  0x48   :  { %v3928_v1 = vld [vmem:[#allocation9 + $0x15c] ss:$24 sps:$4 sm:$0xff]   ;;  %724 = vmatprep.subr.bf16.mxu0 %v3926_v0  ;;  %v3931_v3 = vld [vmem:[#allocation9 + $0x158] ss:$24 sps:$4 sm:$0xff]   ;;  %v3934_v5 = vld [vmem:[#allocation9 + $0x12c] ss:$24 sps:$4 sm:$0xff]  }
  0x49   :  { %765 = vmatprep.subr.bf16.mxu1 %v3928_v1  ;;  %725 = vmatpush1.bf16.msra.mxu0 %v3930_v2  ;;  %v3936_v6 = vld [vmem:[#allocation9 + $0x120] ss:$24 sps:$4 sm:$0xff]   ;;  %v3938_v8 = vld [vmem:[#allocation9 + $0xf4] ss:$24 sps:$4 sm:$0xff]   ;;  %v3942_v10 = vld [vmem:[#allocation9 + $0xf0] ss:$24 sps:$4 sm:$0xff]  }
  0x4a   :  { %766 = vmatpush1.bf16.msra.mxu1 %v3931_v3  ;;  %726 = vmatprep.subr.bf16.mxu0 %v3932_v4  ;;  %v3937_v7 = vld [vmem:[#allocation9 + $0x128] ss:$24 sps:$4 sm:$0xff]   ;;  %v3940_v9 = vld [vmem:[#allocation9 + $0xfc] ss:$24 sps:$4 sm:$0xff]   ;;  %v3943_v11 = vld [vmem:[#allocation9 + $0xf8] ss:$24 sps:$4 sm:$0xff]  }
  0x4b   :  { %767 = vmatprep.subr.bf16.mxu1 %v3934_v5  ;;  %v3944_v12 = vld [vmem:[#allocation9 + $0xc4] ss:$24 sps:$4 sm:$0xff]   ;;  %v3948_v14 = vld [vmem:[#allocation9 + $0xc0] ss:$24 sps:$4 sm:$0xff]   ;;  %v3950_v16 = vld [vmem:[#allocation9 + $0x94] ss:$24 sps:$4 sm:$0xff]  }
  0x4c   :  { %v3946_v13 = vld [vmem:[#allocation9 + $0xcc] ss:$24 sps:$4 sm:$0xff]   ;;  %v3949_v15 = vld [vmem:[#allocation9 + $0xc8] ss:$24 sps:$4 sm:$0xff]   ;;  %v3952_v17 = vld [vmem:[#allocation9 + $0x9c] ss:$24 sps:$4 sm:$0xff]  }
  0x4d   :  { %727 = vmatpush1.bf16.msra.mxu0 %v3936_v6  ;;  %v3954_v18 = vld [vmem:[#allocation9 + $0x90] ss:$24 sps:$4 sm:$0xff]   ;;  %v3956_v20 = vld [vmem:[#allocation9 + $0x64] ss:$24 sps:$4 sm:$0xff]   ;;  %v3960_v22 = vld [vmem:[#allocation9 + $0x60] ss:$24 sps:$4 sm:$0xff]  }
  0x4e   :  { %768 = vmatpush1.bf16.msra.mxu1 %v3937_v7  ;;  %728 = vmatprep.subr.bf16.mxu0 %v3938_v8  ;;  %v3955_v19 = vld [vmem:[#allocation9 + $0x98] ss:$24 sps:$4 sm:$0xff]   ;;  %v3958_v21 = vld [vmem:[#allocation9 + $0x6c] ss:$24 sps:$4 sm:$0xff]   ;;  %v3961_v23 = vld [vmem:[#allocation9 + $0x68] ss:$24 sps:$4 sm:$0xff]  }
  0x4f   :  { %769 = vmatprep.subr.bf16.mxu1 %v3940_v9  ;;  %v3962_v24 = vld [vmem:[#allocation9 + $0x34] ss:$24 sps:$4 sm:$0xff]   ;;  %v3966_v26 = vld [vmem:[#allocation9 + $0x30] ss:$24 sps:$4 sm:$0xff]   ;;  %v3968_v28 = vld [vmem:[#allocation9 + $0x4] ss:$24 sps:$4 sm:$0xff]  }
  0x50   :  { %v3964_v25 = vld [vmem:[#allocation9 + $0x3c] ss:$24 sps:$4 sm:$0xff]   ;;  %v3967_v27 = vld [vmem:[#allocation9 + $0x38] ss:$24 sps:$4 sm:$0xff]   ;;  %v3970_v29 = vld [vmem:[#allocation9 + $0xc] ss:$24 sps:$4 sm:$0xff]  }
  0x51   :  { %729 = vmatpush1.bf16.msra.mxu0 %v3942_v10  ;;  %v3972_v30 = vld [vmem:[#allocation9] ss:$24 sps:$4 sm:$0xff]   ;;  %v3974_v32 = vld [vmem:[#allocation9 + $0x2d4] ss:$24 sps:$4 sm:$0xff]   ;;  %v3978_v34 = vld [vmem:[#allocation9 + $0x2d0] ss:$24 sps:$4 sm:$0xff]  }
  0x52   :  { %770 = vmatpush1.bf16.msra.mxu1 %v3943_v11  ;;  %730 = vmatprep.subr.bf16.mxu0 %v3944_v12  ;;  %v3973_v31 = vld [vmem:[#allocation9 + $0x8] ss:$24 sps:$4 sm:$0xff]   ;;  %v3976_v33 = vld [vmem:[#allocation9 + $0x2dc] ss:$24 sps:$4 sm:$0xff]   ;;  %v3979_v35 = vld [vmem:[#allocation9 + $0x2d8] ss:$24 sps:$4 sm:$0xff]  }
  0x53   :  { %771 = vmatprep.subr.bf16.mxu1 %v3946_v13  ;;  %v3980_v36 = vld [vmem:[#allocation9 + $0x2a4] ss:$24 sps:$4 sm:$0xff]   ;;  %v3984_v38 = vld [vmem:[#allocation9 + $0x2a0] ss:$24 sps:$4 sm:$0xff]   ;;  %v3986_v40 = vld [vmem:[#allocation9 + $0x274] ss:$24 sps:$4 sm:$0xff]  }
  0x54   :  { %v3982_v37 = vld [vmem:[#allocation9 + $0x2ac] ss:$24 sps:$4 sm:$0xff]   ;;  %v3985_v39 = vld [vmem:[#allocation9 + $0x2a8] ss:$24 sps:$4 sm:$0xff]   ;;  %v3988_v41 = vld [vmem:[#allocation9 + $0x27c] ss:$24 sps:$4 sm:$0xff]  }
  0x55   :  { %731 = vmatpush1.bf16.msra.mxu0 %v3948_v14  ;;  %v3990_v42 = vld [vmem:[#allocation9 + $0x270] ss:$24 sps:$4 sm:$0xff]   ;;  %v3992_v44 = vld [vmem:[#allocation9 + $0x244] ss:$24 sps:$4 sm:$0xff]   ;;  %v3996_v48 = vld [vmem:[#allocation9 + $0x240] ss:$24 sps:$4 sm:$0xff]  }
  0x56   :  { %772 = vmatpush1.bf16.msra.mxu1 %v3949_v15  ;;  %732 = vmatprep.subr.bf16.mxu0 %v3950_v16  ;;  %v3991_v43 = vld [vmem:[#allocation9 + $0x278] ss:$24 sps:$4 sm:$0xff]   ;;  %v3994_v45 = vld [vmem:[#allocation9 + $0x24c] ss:$24 sps:$4 sm:$0xff]   ;;  %v3997_v49 = vld [vmem:[#allocation9 + $0x248] ss:$24 sps:$4 sm:$0xff]  }
  0x57   :  { %773 = vmatprep.subr.bf16.mxu1 %v3952_v17  ;;  %v113_v46 = vld [vmem:[#allocation8 + $0x8] sm:$0xff]  ;;  %v3998_v50 = vld [vmem:[#allocation9 + $0x214] ss:$24 sps:$4 sm:$0xff]   ;;  %v4002_v52 = vld [vmem:[#allocation9 + $0x210] ss:$24 sps:$4 sm:$0xff]   ;;  %s3794_s3 = sld [smem:[#allocation4 + $0x1]] }
  0x58   :  { %v115_v47 = vpack.c.bf16 %v113_v46, %v113_v46  ;;  %v4000_v51 = vld [vmem:[#allocation9 + $0x21c] ss:$24 sps:$4 sm:$0xff]   ;;  %v4003_v53 = vld [vmem:[#allocation9 + $0x218] ss:$24 sps:$4 sm:$0xff]   ;;  %v4006_v55 = vld [vmem:[#allocation9 + $0x1ec] ss:$24 sps:$4 sm:$0xff]  }
  0x59   :  { %733 = vmatpush1.bf16.msra.mxu0 %v3954_v18  ;;  %v4004_v54 = vld [vmem:[#allocation9 + $0x1e4] ss:$24 sps:$4 sm:$0xff]   ;;  %v4008_v56 = vld [vmem:[#allocation9 + $0x1e0] ss:$24 sps:$4 sm:$0xff]   ;;  %v4010_v58 = vld [vmem:[#allocation9 + $0x1b4] ss:$24 sps:$4 sm:$0xff]   ;;  %v6348_v18 = vlaneseq }
  0x5a   :  { %774 = vmatpush1.bf16.msra.mxu1 %v3955_v19  ;;  %734 = vmatprep.subr.bf16.mxu0 %v3956_v20  ;;  %v4009_v57 = vld [vmem:[#allocation9 + $0x1e8] ss:$24 sps:$4 sm:$0xff]   ;;  %v4012_v59 = vld [vmem:[#allocation9 + $0x1bc] ss:$24 sps:$4 sm:$0xff]   ;;  %v4015_v61 = vld [vmem:[#allocation9 + $0x1b8] ss:$24 sps:$4 sm:$0xff]  }
  0x5b   :  { %775 = vmatprep.subr.bf16.mxu1 %v3958_v21  ;;  %756 = vmatprep.mubr.bf16.mxu0 %v115_v47  ;;  %v4014_v60 = vld [vmem:[#allocation9 + $0x1b0] ss:$24 sps:$4 sm:$0xff]   ;;  %v4016_v62 = vld [vmem:[#allocation9 + $0x184] ss:$24 sps:$4 sm:$0xff]   ;;  %v4020_v0 = vld [vmem:[#allocation9 + $0x180] ss:$24 sps:$4 sm:$0xff]  }
  0x5c   :  { %797 = vmatprep.mubr.bf16.mxu1 %v115_v47  ;;  %v4018_v63 = vld [vmem:[#allocation9 + $0x18c] ss:$24 sps:$4 sm:$0xff]   ;;  %v4021_v1 = vld [vmem:[#allocation9 + $0x188] ss:$24 sps:$4 sm:$0xff]   ;;  %v112_v2 = vld [vmem:[#allocation8] sm:$0xff]  ;;  %s3803_s13 = sld [smem:[#allocation4 + $0x2]] }
  0x5d   :  { %735 = vmatpush1.bf16.msra.mxu0 %v3960_v22  ;;  %v4024_v3 = vld [vmem:[#allocation9 + $0x164] ss:$24 sps:$4 sm:$0xff]   ;;  %v4759_v4 = vld [vmem:[#allocation11 + $0x154] ss:$24 sps:$4 sm:$0xff]   ;;  %v4761_v5 = vpack.c.bf16 %v112_v2, %v112_v2  ;;  %v4022_v6 = vld [vmem:[#allocation9 + $0x160] ss:$24 sps:$4 sm:$0xff]  }
  0x5e   :  { %776 = vmatpush1.bf16.msra.mxu1 %v3961_v23  ;;  %736 = vmatprep.subr.bf16.mxu0 %v3962_v24  ;;  %v4763_v7 = vld [vmem:[#allocation11 + $0x150] ss:$24 sps:$4 sm:$0xff]   ;;  %v4030_v8 = vld [vmem:[#allocation9 + $0x134] ss:$24 sps:$4 sm:$0xff]   ;;  %v4766_v9 = vld [vmem:[#allocation11 + $0x124] ss:$24 sps:$4 sm:$0xff]  }
  0x5f   :  { %777 = vmatprep.subr.bf16.mxu1 %v3964_v25  ;;  %v4028_v10 = vld [vmem:[#allocation9 + $0x130] ss:$24 sps:$4 sm:$0xff]   ;;  %v4771_v11 = vld [vmem:[#allocation11 + $0x120] ss:$24 sps:$4 sm:$0xff]   ;;  %v4036_v12 = vld [vmem:[#allocation9 + $0x104] ss:$24 sps:$4 sm:$0xff]  }
  0x60   :  { %v4774_v13 = vld [vmem:[#allocation11 + $0xf4] ss:$24 sps:$4 sm:$0xff]   ;;  %v4034_v14 = vld [vmem:[#allocation9 + $0x100] ss:$24 sps:$4 sm:$0xff]   ;;  %v4777_v15 = vld [vmem:[#allocation11 + $0xf0] ss:$24 sps:$4 sm:$0xff]  }
  0x61   :  { %737 = vmatpush1.bf16.msra.mxu0 %v3966_v26  ;;  %v4042_v16 = vld [vmem:[#allocation9 + $0xd4] ss:$24 sps:$4 sm:$0xff]   ;;  %v4780_v17 = vld [vmem:[#allocation11 + $0xc4] ss:$24 sps:$4 sm:$0xff]   ;;  %v4040_v19 = vld [vmem:[#allocation9 + $0xd0] ss:$24 sps:$4 sm:$0xff]  }
  0x62   :  { %778 = vmatpush1.bf16.msra.mxu1 %v3967_v27  ;;  %738 = vmatprep.subr.bf16.mxu0 %v3968_v28  ;;  %v4783_v20 = vld [vmem:[#allocation11 + $0xc0] ss:$24 sps:$4 sm:$0xff]   ;;  %v4048_v21 = vld [vmem:[#allocation9 + $0xa4] ss:$24 sps:$4 sm:$0xff]   ;;  %v4786_v22 = vld [vmem:[#allocation11 + $0x94] ss:$24 sps:$4 sm:$0xff]  }
  0x63   :  { %779 = vmatprep.subr.bf16.mxu1 %v3970_v29  ;;  %v4789_v23 = vshrl.u32 %v6348_v18, 7  ;;  %v4046_v24 = vld [vmem:[#allocation9 + $0xa0] ss:$24 sps:$4 sm:$0xff]   ;;  %v4792_v25 = vld [vmem:[#allocation11 + $0x90] ss:$24 sps:$4 sm:$0xff]   ;;  %p1703_p13 = scmp.gt.s32.totalorder %s3794_s3, 0 }
  0x64   :  { %v4054_v26 = vld [vmem:[#allocation9 + $0x74] ss:$24 sps:$4 sm:$0xff]   ;;  %v4795_v27 = vld [vmem:[#allocation11 + $0x64] ss:$24 sps:$4 sm:$0xff]   ;;  %v4052_v29 = vld [vmem:[#allocation9 + $0x70] ss:$24 sps:$4 sm:$0xff]  }
  0x65   :  { %739 = vmatpush1.bf16.msra.mxu0 %v3972_v30  ;;  %6572 = vst [vmem:[#allocation24_spill] sm:$0xff] %v4789_v23  ;;  %v4798_v28 = vsub.s32 1, %v4789_v23  ;;  %v4801_v30 = vld [vmem:[#allocation11 + $0x60] ss:$24 sps:$4 sm:$0xff]   ;;  %v4078_v46 = vld [vmem:[#allocation9 + $0x2b4] ss:$24 sps:$4 sm:$0xff]  }
  0x66   :  { %780 = vmatpush1.bf16.msra.mxu1 %v3973_v31  ;;  %740 = vmatprep.subr.bf16.mxu0 %v3974_v32  ;;  %v4060_v31 = vld [vmem:[#allocation9 + $0x44] ss:$24 sps:$4 sm:$0xff]   ;;  %v4804_v32 = vld [vmem:[#allocation11 + $0x34] ss:$24 sps:$4 sm:$0xff]   ;;  %v4962_v18 = vld [vmem:[#allocation11 + $0x38] ss:$24 sps:$4 sm:$0xff]  }
  0x67   :  { %781 = vmatprep.subr.bf16.mxu1 %v3976_v33  ;;  %6573 = vst [vmem:[#allocation25_spill] sm:$0xff] %v4798_v28  ;;  %v4809_v33 = vld [vmem:[%s6339_s2] sm:$0x3]  ;;  %v4108_v2 = vld [vmem:[#allocation9 + $0x1c4] ss:$24 sps:$4 sm:$0xff]   ;;  %p3795_p0 = scmp.lt.s32.totalorder %s3794_s3, 1 }
  0x68   :  { %6574 = vst [vmem:[#allocation26_spill] sm:$0xff] %v4809_v33  ;;  %s6895_s3 = smov (!%p1703_p13, %s3794_s3), 0  ;;  %p1938_p1 = scmp.gt.s32.totalorder %s3803_s13, 0 }
  0x69   :  { %741 = vmatpush2.bf16.msra.mxu0 %v3978_v34  ;;  %v977_v34 = vrot.slane %v4809_v33, %v4798_v28  ;;  %v5018_v28 = vld [vmem:[#allocation11 + $0x254] ss:$24 sps:$4 sm:$0xff]   ;;  %s6897_s3 = smov (!%p3795_p0, %s6895_s3), 1  ;;  %p3804_p2 = scmp.lt.s32.totalorder %s3803_s13, 1 }
  0x6a   :  { %782 = vmatpush2.bf16.msra.mxu1 %v3979_v35  ;;  %742 = vmatprep.subr.bf16.mxu0 %v3980_v36  ;;  %v4058_v35 = vld [vmem:[#allocation9 + $0x40] ss:$24 sps:$4 sm:$0xff]   ;;  %v4814_v36 = vld [vmem:[#allocation11 + $0x30] ss:$24 sps:$4 sm:$0xff]   ;;  %6611 = vst [vmem:[#allocation63_spill] sm:$0xff] %v5018_v28  ;;  %s1707_s28 = sshra.s32 %s6897_s3, 3 }
  0x6b   :  { %783 = vmatprep.subr.bf16.mxu1 %v3982_v37  ;;  %v4066_v37 = vld [vmem:[#allocation9 + $0x14] ss:$24 sps:$4 sm:$0xff]   ;;  %s3800_s29 = smul.u32 48, %s1707_s28  ;;  %s1710_s30 = sand.u32 7, %s6897_s3 }
  0x6c   :  { %s6899_s13 = smov (!%p1938_p1, %s3803_s13), 0  ;;  %s3812_s19 = sld [smem:[#allocation4 + $0x3]] }
  0x6d   :  { %743 = vmatpush2.bf16.msra.mxu0 %v3984_v38  ;;  %v4817_v38 = vld [vmem:[#allocation11 + $0x4] ss:$24 sps:$4 sm:$0xff]   ;;  %s1713_s11 = sadd.s32 %s3800_s29, %s1710_s30  ;;  %s6901_s13 = smov (!%p3804_p2, %s6899_s13), 1 }
  0x6e   :  { %784 = vmatpush2.bf16.msra.mxu1 %v3985_v39  ;;  %744 = vmatprep.subr.bf16.mxu0 %v3986_v40  ;;  %v4819_v39 = vpack.c.bf16 %v977_v34, %v977_v34  ;;  %v4064_v40 = vld [vmem:[#allocation9 + $0x10] ss:$24 sps:$4 sm:$0xff]   ;;  %v4888_v34 = vld [vmem:[#allocation11 + $0x160] ss:$24 sps:$4 sm:$0xff]   ;;  %s1714_s12 = scalar_lea.vmem [#allocation2], %s1713_s11  ;;  %s1942_s6 = sshra.s32 %s6901_s13, 3 }
  0x6f   :  { %785 = vmatprep.subr.bf16.mxu1 %v3988_v41  ;;  %v4823_v41 = vld [vmem:[#allocation11] ss:$24 sps:$4 sm:$0xff]   ;;  %6582 = vst [vmem:[#allocation34_spill] sm:$0xff] %v4888_v34  ;;  %s3809_s0 = smul.u32 48, %s1942_s6  ;;  %s1945_s14 = sand.u32 7, %s6901_s13 }
  0x70   :  { %s3821_s7 = sld [smem:[#allocation4 + $0x4]] }
  0x71   :  { %745 = vmatpush2.bf16.msra.mxu0 %v3990_v42  ;;  %v4072_v42 = vld [vmem:[#allocation9 + $0x2e4] ss:$24 sps:$4 sm:$0xff]   ;;  %s1948_s15 = sadd.s32 %s3809_s0, %s1945_s14  ;;  %s3839_s29 = sld [smem:[#allocation4 + $0x6]] }
  0x72   :  { %786 = vmatpush2.bf16.msra.mxu1 %v3991_v43  ;;  %746 = vmatprep.subr.bf16.mxu0 %v3992_v44  ;;  %v4826_v43 = vld [vmem:[#allocation11 + $0x2d4] ss:$24 sps:$4 sm:$0xff]   ;;  %v4070_v44 = vld [vmem:[#allocation9 + $0x2e0] ss:$24 sps:$4 sm:$0xff]   ;;  %s1949_s18 = scalar_lea.vmem [#allocation2], %s1948_s15  ;;  %p2173_p3 = scmp.gt.s32.totalorder %s3812_s19, 0 }
  0x73   :  { %787 = vmatprep.subr.bf16.mxu1 %v3994_v45  ;;  %v4829_v45 = vld [vmem:[#allocation11 + $0x2d0] ss:$24 sps:$4 sm:$0xff]   ;;  %p3813_p4 = scmp.lt.s32.totalorder %s3812_s19, 1  ;;  %s3848_s0 = sld [smem:[#allocation4 + $0x7]] }
  0x74   :  { %s6903_s19 = smov (!%p2173_p3, %s3812_s19), 0 }
  0x75   :  { %747 = vmatpush2.bf16.msra.mxu0 %v3996_v48  ;;  %v4076_v48 = vld [vmem:[#allocation9 + $0x2b0] ss:$24 sps:$4 sm:$0xff]   ;;  %s6905_s19 = smov (!%p3813_p4, %s6903_s19), 1 }
  0x76   :  { %788 = vmatpush2.bf16.msra.mxu1 %v3997_v49  ;;  %748 = vmatprep.subr.bf16.mxu0 %v3998_v50  ;;  %v4835_v49 = vld [vmem:[#allocation11 + $0x2a0] ss:$24 sps:$4 sm:$0xff]   ;;  %v4084_v50 = vld [vmem:[#allocation9 + $0x284] ss:$24 sps:$4 sm:$0xff]   ;;  %s2177_s1 = sshra.s32 %s6905_s19, 3  ;;  %s2180_s21 = sand.u32 7, %s6905_s19 }
  0x77   :  { %789 = vmatprep.subr.bf16.mxu1 %v4000_v51  ;;  %v4838_v51 = vld [vmem:[#allocation11 + $0x274] ss:$24 sps:$4 sm:$0xff]   ;;  %s3818_s20 = smul.u32 48, %s2177_s1  ;;  %p2408_p5 = scmp.gt.s32.totalorder %s3821_s7, 0 }
  0x78   :  { %p3822_p6 = scmp.lt.s32.totalorder %s3821_s7, 1  ;;  %p2878_p9 = scmp.gt.s32.totalorder %s3839_s29, 0 }
  0x79   :  { %749 = vmatpush2.bf16.msra.mxu0 %v4002_v52  ;;  %v4082_v52 = vld [vmem:[#allocation9 + $0x280] ss:$24 sps:$4 sm:$0xff]   ;;  %s2183_s22 = sadd.s32 %s3818_s20, %s2180_s21  ;;  %s6907_s7 = smov (!%p2408_p5, %s3821_s7), 0 }
  0x7a   :  { %790 = vmatpush2.bf16.msra.mxu1 %v4003_v53  ;;  %750 = vmatprep.subr.bf16.mxu0 %v4004_v54  ;;  %v4841_v53 = vld [vmem:[#allocation11 + $0x270] ss:$24 sps:$4 sm:$0xff]   ;;  %v4090_v54 = vld [vmem:[#allocation9 + $0x254] ss:$24 sps:$4 sm:$0xff]   ;;  %s2184_s4 = scalar_lea.vmem [#allocation2], %s2183_s22  ;;  %s6909_s7 = smov (!%p3822_p6, %s6907_s7), 1 }
  0x7b   :  { %791 = vmatprep.subr.bf16.mxu1 %v4006_v55  ;;  %v4844_v55 = vld [vmem:[#allocation11 + $0x244] ss:$24 sps:$4 sm:$0xff]   ;;  %s2412_s2 = sshra.s32 %s6909_s7, 3  ;;  %p3840_p10 = scmp.lt.s32.totalorder %s3839_s29, 1 }
  0x7c   :  { %s3827_s16 = smul.u32 48, %s2412_s2  ;;  %s6915_s29 = smov (!%p2878_p9, %s3839_s29), 0 }
  0x7d   :  { %751 = vmatpush2.bf16.msra.mxu0 %v4008_v56  ;;  %v4088_v56 = vld [vmem:[#allocation9 + $0x250] ss:$24 sps:$4 sm:$0xff]   ;;  %s6917_s29 = smov (!%p3840_p10, %s6915_s29), 1  ;;  %s4678_s22 = smov [#allocation16]  }
  0x7e   :  { %792 = vmatpush2.bf16.msra.mxu1 %v4009_v57  ;;  %752 = vmatprep.subr.bf16.mxu0 %v4010_v58  ;;  %v4847_v57 = vld [vmem:[#allocation11 + $0x240] ss:$24 sps:$4 sm:$0xff]   ;;  %v4096_v58 = vld [vmem:[#allocation9 + $0x224] ss:$24 sps:$4 sm:$0xff]   ;;  %s2882_s30 = sshra.s32 %s6917_s29, 3 }
  0x7f   :  { %793 = vmatprep.subr.bf16.mxu1 %v4012_v59  ;;  %v4850_v59 = vld [vmem:[#allocation11 + $0x214] ss:$24 sps:$4 sm:$0xff]   ;;  %s3845_s11 = smul.u32 48, %s2882_s30 }
  0x81   :  { %753 = vmatpush2.bf16.msra.mxu0 %v4014_v60  ;;  %v4094_v60 = vld [vmem:[#allocation9 + $0x220] ss:$24 sps:$4 sm:$0xff]  }
  0x82   :  { %794 = vmatpush2.bf16.msra.mxu1 %v4015_v61  ;;  %754 = vmatprep.subr.bf16.mxu0 %v4016_v62  ;;  %v4853_v61 = vld [vmem:[#allocation11 + $0x210] ss:$24 sps:$4 sm:$0xff]   ;;  %v4102_v62 = vld [vmem:[#allocation9 + $0x1f4] ss:$24 sps:$4 sm:$0xff]  }
  0x83   :  { %795 = vmatprep.subr.bf16.mxu1 %v4018_v63  ;;  %v4856_v63 = vld [vmem:[#allocation11 + $0x1e4] ss:$24 sps:$4 sm:$0xff]  }
  0x85   :  { %755 = vmatpush2.bf16.msra.mxu0 %v4020_v0  ;;  %v4100_v0 = vld [vmem:[#allocation9 + $0x1f0] ss:$24 sps:$4 sm:$0xff]  }
  0x86   :  { %796 = vmatpush2.bf16.msra.mxu1 %v4021_v1  ;;  %806 = vmatprep.subr.bf16.mxu0 %v4024_v3  ;;  %v4859_v1 = vld [vmem:[#allocation11 + $0x1e0] ss:$24 sps:$4 sm:$0xff]   ;;  %v4862_v3 = vld [vmem:[#allocation11 + $0x1b4] ss:$24 sps:$4 sm:$0xff]  }
  0x87   :  { %1493 = vmatprep.subr.bf16.mxu1 %v4759_v4  ;;  %6575 = vst [vmem:[#allocation27_spill] sm:$0xff] %v4859_v1  ;;  %6576 = vst [vmem:[#allocation28_spill] sm:$0xff] %v4862_v3 }
  0x88   :  { %757 = vmatmul.mubr.bf16.vlgmr.msra.gmra.mxu0 %v4761_v5 }
  0x89   :  { %798 = vmatmul.mubr.bf16.vlgmr.msra.gmra.mxu1 %v4761_v5  ;;  %807 = vmatpush1.bf16.msra.mxu0 %v4022_v6  ;;  %v4865_v6 = vsub.s32 0, %v4789_v23  ;;  %v5054_v23 = vld [vmem:[#allocation11 + $0x1c4] ss:$24 sps:$4 sm:$0xff]  }
  0x8a   :  { %1494 = vmatpush1.bf16.msra.mxu1 %v4763_v7  ;;  %808 = vmatprep.subr.bf16.mxu0 %v4030_v8  ;;  %v4106_v8 = vld [vmem:[#allocation9 + $0x1c0] ss:$24 sps:$4 sm:$0xff]  }
  0x8b   :  { %1495 = vmatprep.subr.bf16.mxu1 %v4766_v9  ;;  %838 = vmatprep.mubr.bf16.mxu0 %v115_v47  ;;  %v4832_v47 = vld [vmem:[#allocation11 + $0x2a4] ss:$24 sps:$4 sm:$0xff]   ;;  %6577 = vst [vmem:[#allocation29_spill] sm:$0xff] %v4865_v6 }
  0x8c   :  { %1525 = vmatprep.mubr.bf16.mxu1 %v4819_v39 }
  0x8d   :  { %809 = vmatpush1.bf16.msra.mxu0 %v4028_v10  ;;  %v4868_v10 = vld [vmem:[#allocation11 + $0x1b0] ss:$24 sps:$4 sm:$0xff]  }
  0x8e   :  { %1496 = vmatpush1.bf16.msra.mxu1 %v4771_v11  ;;  %810 = vmatprep.subr.bf16.mxu0 %v4036_v12  ;;  %6578 = vst [vmem:[#allocation30_spill] sm:$0xff] %v4868_v10  ;;  %v4114_v12 = vld [vmem:[#allocation9 + $0x194] ss:$24 sps:$4 sm:$0xff]  }
  0x8f   :  { %1497 = vmatprep.subr.bf16.mxu1 %v4774_v13 }
  0x91   :  { %811 = vmatpush1.bf16.msra.mxu0 %v4034_v14  ;;  %v4871_v14 = vld [vmem:[#allocation11 + $0x184] ss:$24 sps:$4 sm:$0xff]  }
  0x92   :  { %1498 = vmatpush1.bf16.msra.mxu1 %v4777_v15  ;;  %812 = vmatprep.subr.bf16.mxu0 %v4042_v16  ;;  %6579 = vst [vmem:[#allocation31_spill] sm:$0xff] %v4871_v14  ;;  %v4112_v16 = vld [vmem:[#allocation9 + $0x190] ss:$24 sps:$4 sm:$0xff]  }
  0x93   :  { %1499 = vmatprep.subr.bf16.mxu1 %v4780_v17 }
  0x95   :  { %813 = vmatpush1.bf16.msra.mxu0 %v4040_v19  ;;  %v973_v19 = vrot.slane %v4809_v33, %v4865_v6  ;;  %v5012_v33 = vld [vmem:[#allocation11 + $0x280] ss:$24 sps:$4 sm:$0xff]  }
  0x96   :  { %1500 = vmatpush1.bf16.msra.mxu1 %v4783_v20  ;;  %814 = vmatprep.subr.bf16.mxu0 %v4048_v21  ;;  %v4876_v21 = vld [vmem:[#allocation11 + $0x180] ss:$24 sps:$4 sm:$0xff]   ;;  %6609 = vst [vmem:[#allocation61_spill] sm:$0xff] %v5012_v33 }
  0x97   :  { %1501 = vmatprep.subr.bf16.mxu1 %v4786_v22  ;;  %6580 = vst [vmem:[#allocation32_spill] sm:$0xff] %v4876_v21  ;;  %v5036_v6 = vld [vmem:[#allocation11 + $0x220] ss:$24 sps:$4 sm:$0xff]  }
  0x98   :  { %6617 = vst [vmem:[#allocation69_spill] sm:$0xff] %v5036_v6 }
  0x99   :  { %815 = vmatpush1.bf16.msra.mxu0 %v4046_v24  ;;  %v4879_v24 = vld [vmem:[#allocation11 + $0x15c] ss:$24 sps:$4 sm:$0xff]  }
  0x9a   :  { %1502 = vmatpush1.bf16.msra.mxu1 %v4792_v25  ;;  %816 = vmatprep.subr.bf16.mxu0 %v4054_v26  ;;  %v4881_v26 = vld [vmem:[#allocation11 + $0x164] ss:$24 sps:$4 sm:$0xff]  }
  0x9b   :  { %1503 = vmatprep.subr.bf16.mxu1 %v4795_v27  ;;  %6581 = vst [vmem:[#allocation33_spill] sm:$0xff] %v4881_v26 }
  0x9d   :  { %817 = vmatpush1.bf16.msra.mxu0 %v4052_v29  ;;  %v4883_v29 = vpack.c.bf16 %v973_v19, %v973_v19  ;;  %v4958_v19 = vld [vmem:[#allocation11 + $0x44] ss:$24 sps:$4 sm:$0xff]  }
  0x9e   :  { %1504 = vmatpush1.bf16.msra.mxu1 %v4801_v30  ;;  %818 = vmatprep.subr.bf16.mxu0 %v4060_v31  ;;  %v4886_v31 = vld [vmem:[#allocation11 + $0x158] ss:$24 sps:$4 sm:$0xff]   ;;  %6593 = vst [vmem:[#allocation45_spill] sm:$0xff] %v4958_v19 }
  0x9f   :  { %1505 = vmatprep.subr.bf16.mxu1 %v4804_v32 }
  0xa1   :  { %819 = vmatpush1.bf16.msra.mxu0 %v4058_v35  ;;  %v4890_v35 = vld [vmem:[#allocation11 + $0x12c] ss:$24 sps:$4 sm:$0xff]  }
  0xa2   :  { %1506 = vmatpush1.bf16.msra.mxu1 %v4814_v36  ;;  %820 = vmatprep.subr.bf16.mxu0 %v4066_v37  ;;  %v4894_v37 = vld [vmem:[#allocation11 + $0x134] ss:$24 sps:$4 sm:$0xff]  }
  0xa3   :  { %1507 = vmatprep.subr.bf16.mxu1 %v4817_v38  ;;  %6583 = vst [vmem:[#allocation35_spill] sm:$0xff] %v4894_v37 }
  0xa5   :  { %821 = vmatpush1.bf16.msra.mxu0 %v4064_v40  ;;  %v4896_v40 = vld [vmem:[#allocation11 + $0x128] ss:$24 sps:$4 sm:$0xff]  }
  0xa6   :  { %1508 = vmatpush1.bf16.msra.mxu1 %v4823_v41  ;;  %822 = vmatprep.subr.bf16.mxu0 %v4072_v42  ;;  %v4898_v42 = vld [vmem:[#allocation11 + $0x130] ss:$24 sps:$4 sm:$0xff]  }
  0xa7   :  { %1509 = vmatprep.subr.bf16.mxu1 %v4826_v43  ;;  %6584 = vst [vmem:[#allocation36_spill] sm:$0xff] %v4898_v42 }
  0xa9   :  { %823 = vmatpush2.bf16.msra.mxu0 %v4070_v44  ;;  %v4902_v44 = vld [vmem:[#allocation11 + $0xfc] ss:$24 sps:$4 sm:$0xff]  }
  0xaa   :  { %1510 = vmatpush2.bf16.msra.mxu1 %v4829_v45  ;;  %824 = vmatprep.subr.bf16.mxu0 %v4078_v46  ;;  %v4904_v46 = vld [vmem:[#allocation11 + $0x104] ss:$24 sps:$4 sm:$0xff]  }
  0xab   :  { %1511 = vmatprep.subr.bf16.mxu1 %v4832_v47  ;;  %6585 = vst [vmem:[#allocation37_spill] sm:$0xff] %v4904_v46 }
  0xad   :  { %825 = vmatpush2.bf16.msra.mxu0 %v4076_v48  ;;  %v4910_v48 = vld [vmem:[#allocation11 + $0xf8] ss:$24 sps:$4 sm:$0xff]  }
  0xae   :  { %1512 = vmatpush2.bf16.msra.mxu1 %v4835_v49  ;;  %826 = vmatprep.subr.bf16.mxu0 %v4084_v50  ;;  %v4912_v50 = vld [vmem:[#allocation11 + $0x100] ss:$24 sps:$4 sm:$0xff]  }
  0xaf   :  { %1513 = vmatprep.subr.bf16.mxu1 %v4838_v51  ;;  %6586 = vst [vmem:[#allocation38_spill] sm:$0xff] %v4912_v50 }
  0xb1   :  { %827 = vmatpush2.bf16.msra.mxu0 %v4082_v52  ;;  %v4922_v52 = vld [vmem:[#allocation11 + $0xd4] ss:$24 sps:$4 sm:$0xff]  }
  0xb2   :  { %1514 = vmatpush2.bf16.msra.mxu1 %v4841_v53  ;;  %828 = vmatprep.subr.bf16.mxu0 %v4090_v54  ;;  %6587 = vst [vmem:[#allocation39_spill] sm:$0xff] %v4922_v52  ;;  %v4924_v54 = vld [vmem:[#allocation11 + $0xc8] ss:$24 sps:$4 sm:$0xff]  }
  0xb3   :  { %1515 = vmatprep.subr.bf16.mxu1 %v4844_v55 }
  0xb5   :  { %829 = vmatpush2.bf16.msra.mxu0 %v4088_v56  ;;  %v4926_v56 = vld [vmem:[#allocation11 + $0xd0] ss:$24 sps:$4 sm:$0xff]  }
  0xb6   :  { %1516 = vmatpush2.bf16.msra.mxu1 %v4847_v57  ;;  %830 = vmatprep.subr.bf16.mxu0 %v4096_v58  ;;  %6588 = vst [vmem:[#allocation40_spill] sm:$0xff] %v4926_v56  ;;  %v4934_v58 = vld [vmem:[#allocation11 + $0xa4] ss:$24 sps:$4 sm:$0xff]  }
  0xb7   :  { %1517 = vmatprep.subr.bf16.mxu1 %v4850_v59  ;;  %6589 = vst [vmem:[#allocation41_spill] sm:$0xff] %v4934_v58 }
  0xb9   :  { %831 = vmatpush2.bf16.msra.mxu0 %v4094_v60  ;;  %v4938_v60 = vld [vmem:[#allocation11 + $0x98] ss:$24 sps:$4 sm:$0xff]  }
  0xba   :  { %1518 = vmatpush2.bf16.msra.mxu1 %v4853_v61  ;;  %832 = vmatprep.subr.bf16.mxu0 %v4102_v62  ;;  %v4940_v62 = vld [vmem:[#allocation11 + $0xa0] ss:$24 sps:$4 sm:$0xff]  }
  0xbb   :  { %1519 = vmatprep.subr.bf16.mxu1 %v4856_v63  ;;  %6590 = vst [vmem:[#allocation42_spill] sm:$0xff] %v4940_v62 }
  0xbd   :  { %833 = vmatpush2.bf16.msra.mxu0 %v4100_v0  ;;  %v4944_v0 = vld [vmem:[#allocation11 + $0x6c] ss:$24 sps:$4 sm:$0xff]  }
  0xbe   :  { %1520 = vmatpush2.bf16.msra.mxu1 %v4859_v1  ;;  %834 = vmatprep.subr.bf16.mxu0 %v4108_v2  ;;  %v4946_v2 = vld [vmem:[#allocation11 + $0x74] ss:$24 sps:$4 sm:$0xff]  }
  0xbf   :  { %1521 = vmatprep.subr.bf16.mxu1 %v4862_v3  ;;  %6591 = vst [vmem:[#allocation43_spill] sm:$0xff] %v4946_v2  ;;  %v5060_v3 = vld [vmem:[#allocation11 + $0x1c0] ss:$24 sps:$4 sm:$0xff]   ;;  %v5066_v1 = vld [vmem:[#allocation11 + $0x194] ss:$24 sps:$4 sm:$0xff]  }
  0xc1   :  { %835 = vmatpush2.bf16.msra.mxu0 %v4106_v8  ;;  %v4950_v8 = vld [vmem:[#allocation11 + $0x68] ss:$24 sps:$4 sm:$0xff]  }
  0xc2   :  { %1522 = vmatpush2.bf16.msra.mxu1 %v4868_v10  ;;  %836 = vmatprep.subr.bf16.mxu0 %v4114_v12  ;;  %v4952_v12 = vld [vmem:[#allocation11 + $0x70] ss:$24 sps:$4 sm:$0xff]  }
  0xc3   :  { %1523 = vmatprep.subr.bf16.mxu1 %v4871_v14  ;;  %6592 = vst [vmem:[#allocation44_spill] sm:$0xff] %v4952_v12  ;;  %v5042_v14 = vld [vmem:[#allocation11 + $0x1f4] ss:$24 sps:$4 sm:$0xff]   ;;  %v5048_v10 = vld [vmem:[#allocation11 + $0x1f0] ss:$24 sps:$4 sm:$0xff]  }
  0xc4   :  { %6619 = vst [vmem:[#allocation71_spill] sm:$0xff] %v5042_v14 }
  0xc5   :  { %837 = vmatpush2.bf16.msra.mxu0 %v4112_v16  ;;  %v4956_v16 = vld [vmem:[#allocation11 + $0x3c] ss:$24 sps:$4 sm:$0xff]  }
  0xc6   :  { %1524 = vmatpush2.bf16.msra.mxu1 %v4876_v21  ;;  %1534 = vmatprep.subr.bf16.mxu0 %v4879_v24  ;;  %v5030_v21 = vld [vmem:[#allocation11 + $0x224] ss:$24 sps:$4 sm:$0xff]  }
  0xc7   :  { %1575 = vmatprep.subr.bf16.mxu1 %v4881_v26  ;;  %v5024_v26 = vld [vmem:[#allocation11 + $0x250] ss:$24 sps:$4 sm:$0xff]   ;;  %6615 = vst [vmem:[#allocation67_spill] sm:$0xff] %v5030_v21 }
  0xc8   :  { %839 = vmatmul.mubr.bf16.vlgmr.msra.gmra.mxu0 %v4761_v5  ;;  %v4920_v5 = vld [vmem:[#allocation11 + $0xcc] ss:$24 sps:$4 sm:$0xff]   ;;  %6613 = vst [vmem:[#allocation65_spill] sm:$0xff] %v5024_v26 }
  0xc9   :  { %1526 = vmatmul.mubr.bf16.vlgmr.msra.gmra.mxu1 %v4883_v29  ;;  %1535 = vmatpush1.bf16.msra.mxu0 %v4886_v31 }
  0xca   :  { %1576 = vmatpush1.bf16.msra.mxu1 %v4888_v34  ;;  %1536 = vmatprep.subr.bf16.mxu0 %v4890_v35  ;;  %v5006_v34 = vld [vmem:[#allocation11 + $0x284] ss:$24 sps:$4 sm:$0xff]  }
  0xcb   :  { %1577 = vmatprep.subr.bf16.mxu1 %v4894_v37  ;;  %1566 = vmatprep.mubr.bf16.mxu0 %v4819_v39  ;;  %v5000_v37 = vld [vmem:[#allocation11 + $0x2b0] ss:$24 sps:$4 sm:$0xff]   ;;  %6607 = vst [vmem:[#allocation59_spill] sm:$0xff] %v5006_v34 }
  0xcc   :  { %1607 = vmatprep.mubr.bf16.mxu1 %v4819_v39  ;;  %v4932_v39 = vld [vmem:[#allocation11 + $0x9c] ss:$24 sps:$4 sm:$0xff]   ;;  %6605 = vst [vmem:[#allocation57_spill] sm:$0xff] %v5000_v37 }
  0xcd   :  { %1537 = vmatpush1.bf16.msra.mxu0 %v4896_v40 }
  0xce   :  { %1578 = vmatpush1.bf16.msra.mxu1 %v4898_v42  ;;  %1538 = vmatprep.subr.bf16.mxu0 %v4902_v44  ;;  %v4994_v42 = vld [vmem:[#allocation11 + $0x2b4] ss:$24 sps:$4 sm:$0xff]  }
  0xcf   :  { %1579 = vmatprep.subr.bf16.mxu1 %v4904_v46  ;;  %v4988_v46 = vld [vmem:[#allocation11 + $0x2e0] ss:$24 sps:$4 sm:$0xff]   ;;  %6603 = vst [vmem:[#allocation55_spill] sm:$0xff] %v4994_v42 }
  0xd0   :  { %6601 = vst [vmem:[#allocation53_spill] sm:$0xff] %v4988_v46 }
  0xd1   :  { %1539 = vmatpush1.bf16.msra.mxu0 %v4910_v48 }
  0xd2   :  { %1580 = vmatpush1.bf16.msra.mxu1 %v4912_v50  ;;  %1540 = vmatprep.subr.bf16.mxu0 %v4920_v5  ;;  %v4982_v50 = vld [vmem:[#allocation11 + $0x2e4] ss:$24 sps:$4 sm:$0xff]  }
  0xd3   :  { %1581 = vmatprep.subr.bf16.mxu1 %v4922_v52  ;;  %v4976_v52 = vld [vmem:[#allocation11 + $0x10] ss:$24 sps:$4 sm:$0xff]   ;;  %6599 = vst [vmem:[#allocation51_spill] sm:$0xff] %v4982_v50 }
  0xd4   :  { %6597 = vst [vmem:[#allocation49_spill] sm:$0xff] %v4976_v52 }
  0xd5   :  { %1541 = vmatpush1.bf16.msra.mxu0 %v4924_v54 }
  0xd6   :  { %1582 = vmatpush1.bf16.msra.mxu1 %v4926_v56  ;;  %1542 = vmatprep.subr.bf16.mxu0 %v4932_v39  ;;  %v4970_v56 = vld [vmem:[#allocation11 + $0x14] ss:$24 sps:$4 sm:$0xff]  }
  0xd7   :  { %1583 = vmatprep.subr.bf16.mxu1 %v4934_v58  ;;  %v4964_v58 = vld [vmem:[#allocation11 + $0x40] ss:$24 sps:$4 sm:$0xff]   ;;  %6595 = vst [vmem:[#allocation47_spill] sm:$0xff] %v4970_v56 }
  0xd8   :  { %6594 = vst [vmem:[#allocation46_spill] sm:$0xff] %v4964_v58 }
  0xd9   :  { %1543 = vmatpush1.bf16.msra.mxu0 %v4938_v60 }
  0xda   :  { %1584 = vmatpush1.bf16.msra.mxu1 %v4940_v62  ;;  %1544 = vmatprep.subr.bf16.mxu0 %v4944_v0  ;;  %v4968_v62 = vld [vmem:[#allocation11 + $0xc] ss:$24 sps:$4 sm:$0xff]  }
  0xdb   :  { %1585 = vmatprep.subr.bf16.mxu1 %v4946_v2  ;;  %v4974_v2 = vld [vmem:[#allocation11 + $0x8] ss:$24 sps:$4 sm:$0xff]  }
  0xdc   :  { %6596 = vst [vmem:[#allocation48_spill] sm:$0xff] %v4974_v2 }
  0xdd   :  { %1545 = vmatpush1.bf16.msra.mxu0 %v4950_v8 }
  0xde   :  { %1586 = vmatpush1.bf16.msra.mxu1 %v4952_v12  ;;  %1546 = vmatprep.subr.bf16.mxu0 %v4956_v16  ;;  %v4980_v12 = vld [vmem:[#allocation11 + $0x2dc] ss:$24 sps:$4 sm:$0xff]  }
  0xdf   :  { %1587 = vmatprep.subr.bf16.mxu1 %v4958_v19  ;;  %6598 = vst [vmem:[#allocation50_spill] sm:$0xff] %v4980_v12  ;;  %v4986_v19 = vld [vmem:[#allocation11 + $0x2d8] ss:$24 sps:$4 sm:$0xff]  }
  0xe0   :  { %6600 = vst [vmem:[#allocation52_spill] sm:$0xff] %v4986_v19 }
  0xe1   :  { %1547 = vmatpush1.bf16.msra.mxu0 %v4962_v18 }
  0xe2   :  { %1588 = vmatpush1.bf16.msra.mxu1 %v4964_v58  ;;  %1548 = vmatprep.subr.bf16.mxu0 %v4968_v62  ;;  %v4992_v58 = vld [vmem:[#allocation11 + $0x2ac] ss:$24 sps:$4 sm:$0xff]  }
  0xe3   :  { %1589 = vmatprep.subr.bf16.mxu1 %v4970_v56  ;;  %6602 = vst [vmem:[#allocation54_spill] sm:$0xff] %v4992_v58  ;;  %v4998_v56 = vld [vmem:[#allocation11 + $0x2a8] ss:$24 sps:$4 sm:$0xff]  }
  0xe4   :  { %6604 = vst [vmem:[#allocation56_spill] sm:$0xff] %v4998_v56 }
  0xe5   :  { %1549 = vmatpush1.bf16.msra.mxu0 %v4974_v2 }
  0xe6   :  { %1590 = vmatpush1.bf16.msra.mxu1 %v4976_v52  ;;  %1550 = vmatprep.subr.bf16.mxu0 %v4980_v12  ;;  %v5004_v52 = vld [vmem:[#allocation11 + $0x27c] ss:$24 sps:$4 sm:$0xff]  }
  0xe7   :  { %1591 = vmatprep.subr.bf16.mxu1 %v4982_v50  ;;  %6606 = vst [vmem:[#allocation58_spill] sm:$0xff] %v5004_v52  ;;  %v5010_v50 = vld [vmem:[#allocation11 + $0x278] ss:$24 sps:$4 sm:$0xff]  }
  0xe8   :  { %6608 = vst [vmem:[#allocation60_spill] sm:$0xff] %v5010_v50 }
  0xe9   :  { %1551 = vmatpush2.bf16.msra.mxu0 %v4986_v19 }
  0xea   :  { %1592 = vmatpush2.bf16.msra.mxu1 %v4988_v46  ;;  %1552 = vmatprep.subr.bf16.mxu0 %v4992_v58  ;;  %v5016_v46 = vld [vmem:[#allocation11 + $0x24c] ss:$24 sps:$4 sm:$0xff]  }
  0xeb   :  { %1593 = vmatprep.subr.bf16.mxu1 %v4994_v42  ;;  %6610 = vst [vmem:[#allocation62_spill] sm:$0xff] %v5016_v46  ;;  %v5022_v42 = vld [vmem:[#allocation11 + $0x248] ss:$24 sps:$4 sm:$0xff]  }
  0xec   :  { %6612 = vst [vmem:[#allocation64_spill] sm:$0xff] %v5022_v42 }
  0xed   :  { %1553 = vmatpush2.bf16.msra.mxu0 %v4998_v56 }
  0xee   :  { %1594 = vmatpush2.bf16.msra.mxu1 %v5000_v37  ;;  %1554 = vmatprep.subr.bf16.mxu0 %v5004_v52  ;;  %v5028_v37 = vld [vmem:[#allocation11 + $0x21c] ss:$24 sps:$4 sm:$0xff]  }
  0xef   :  { %1595 = vmatprep.subr.bf16.mxu1 %v5006_v34  ;;  %6614 = vst [vmem:[#allocation66_spill] sm:$0xff] %v5028_v37  ;;  %v5034_v34 = vld [vmem:[#allocation11 + $0x218] ss:$24 sps:$4 sm:$0xff]  }
  0xf0   :  { %6616 = vst [vmem:[#allocation68_spill] sm:$0xff] %v5034_v34 }
  0xf1   :  { %1555 = vmatpush2.bf16.msra.mxu0 %v5010_v50 }
  0xf2   :  { %1596 = vmatpush2.bf16.msra.mxu1 %v5012_v33  ;;  %1556 = vmatprep.subr.bf16.mxu0 %v5016_v46  ;;  %v5040_v33 = vld [vmem:[#allocation11 + $0x1ec] ss:$24 sps:$4 sm:$0xff]  }
  0xf3   :  { %1597 = vmatprep.subr.bf16.mxu1 %v5018_v28  ;;  %6618 = vst [vmem:[#allocation70_spill] sm:$0xff] %v5040_v33  ;;  %v5046_v28 = vld [vmem:[#allocation11 + $0x1e8] ss:$24 sps:$4 sm:$0xff]  }
  0xf4   :  { %6620 = vst [vmem:[#allocation72_spill] sm:$0xff] %v5046_v28 }
  0xf5   :  { %1557 = vmatpush2.bf16.msra.mxu0 %v5022_v42 }
  0xf6   :  { %1598 = vmatpush2.bf16.msra.mxu1 %v5024_v26  ;;  %1558 = vmatprep.subr.bf16.mxu0 %v5028_v37  ;;  %v5052_v26 = vld [vmem:[#allocation11 + $0x1bc] ss:$24 sps:$4 sm:$0xff]  }
  0xf7   :  { %1599 = vmatprep.subr.bf16.mxu1 %v5030_v21  ;;  %6621 = vst [vmem:[#allocation73_spill] sm:$0xff] %v5052_v26  ;;  %v5058_v21 = vld [vmem:[#allocation11 + $0x1b8] ss:$24 sps:$4 sm:$0xff]  }
  0xf8   :  { %6622 = vst [vmem:[#allocation74_spill] sm:$0xff] %v5058_v21 }
  0xf9   :  { %1559 = vmatpush2.bf16.msra.mxu0 %v5034_v34 }
  0xfa   :  { %1600 = vmatpush2.bf16.msra.mxu1 %v5036_v6  ;;  %1560 = vmatprep.subr.bf16.mxu0 %v5040_v33  ;;  %v5064_v6 = vld [vmem:[#allocation11 + $0x18c] ss:$24 sps:$4 sm:$0xff]  }
  0xfb   :  { %1601 = vmatprep.subr.bf16.mxu1 %v5042_v14  ;;  %6623 = vst [vmem:[#allocation75_spill] sm:$0xff] %v5064_v6  ;;  %v5070_v14 = vld [vmem:[#allocation11 + $0x188] ss:$24 sps:$4 sm:$0xff]  }
  0xfc   :  { %6624 = vst [vmem:[#allocation76_spill] sm:$0xff] %v5070_v14 }
  0xfd   :  { %1561 = vmatpush2.bf16.msra.mxu0 %v5046_v28  ;;  %v5072_v28 = vld [vmem:[#allocation11 + $0x190] ss:$24 sps:$4 sm:$0xff]  }
  0xfe   :  { %1602 = vmatpush2.bf16.msra.mxu1 %v5048_v10  ;;  %1562 = vmatprep.subr.bf16.mxu0 %v5052_v26 }
  0xff   :  { %1603 = vmatprep.subr.bf16.mxu1 %v5054_v23 }
 0x101   :  { %1563 = vmatpush2.bf16.msra.mxu0 %v5058_v21 }
 0x102   :  { %1604 = vmatpush2.bf16.msra.mxu1 %v5060_v3  ;;  %1564 = vmatprep.subr.bf16.mxu0 %v5064_v6 }
 0x103   :  { %1605 = vmatprep.subr.bf16.mxu1 %v5066_v1 }
 0x105   :  { %1565 = vmatpush2.bf16.msra.mxu0 %v5070_v14 }
 0x106   :  { %1606 = vmatpush2.bf16.msra.mxu1 %v5072_v28  ;;  %1731 = vmatprep.subr.bf16.mxu0 %v4759_v4 }
 0x107   :  { %1772 = vmatprep.subr.bf16.mxu1 %v4879_v24 }
 0x108   :  { %1567 = vmatmul.mubr.bf16.vlgmr.msra.gmra.mxu0 %v4883_v29 }
 0x109   :  { %1608 = vmatmul.mubr.bf16.vlgmr.msra.gmra.mxu1 %v4883_v29  ;;  %1732 = vmatpush1.bf16.msra.mxu0 %v4763_v7  ;;  %v6625_v7 = vld [vmem:[#allocation27_spill] sm:$0xff] }
 0x10a   :  { %1773 = vmatpush1.bf16.msra.mxu1 %v4886_v31  ;;  %1733 = vmatprep.subr.bf16.mxu0 %v4766_v9  ;;  %v6626_v9 = vld [vmem:[#allocation72_spill] sm:$0xff] }
 0x10b   :  { %1774 = vmatprep.subr.bf16.mxu1 %v4890_v35 }
 0x10d   :  { %1734 = vmatpush1.bf16.msra.mxu0 %v4771_v11  ;;  %v6627_v11 = vld [vmem:[#allocation28_spill] sm:$0xff] }
 0x10e   :  { %1775 = vmatpush1.bf16.msra.mxu1 %v4896_v40  ;;  %1735 = vmatprep.subr.bf16.mxu0 %v4774_v13  ;;  %v6628_v13 = vld [vmem:[#allocation24_spill] sm:$0xff] }
 0x10f   :  { %1776 = vmatprep.subr.bf16.mxu1 %v4902_v44 }
 0x111   :  { %1736 = vmatpush1.bf16.msra.mxu0 %v4777_v15  ;;  %v6430_v15 = vsub.s32 2, %v6628_v13 }
 0x112   :  { %1777 = vmatpush1.bf16.msra.mxu1 %v4910_v48  ;;  %1737 = vmatprep.subr.bf16.mxu0 %v4780_v17  ;;  %v6629_v17 = vld [vmem:[#allocation30_spill] sm:$0xff] }
 0x113   :  { %1778 = vmatprep.subr.bf16.mxu1 %v4920_v5 }
 0x115   :  { %1738 = vmatpush1.bf16.msra.mxu0 %v4783_v20  ;;  %v212_v20 = vld [vmem:[%s6342_s5] sm:$0x3f]  ;;  %s953_s5 = sld [smem:[#allocation4]] }
 0x116   :  { %1779 = vmatpush1.bf16.msra.mxu1 %v4924_v54  ;;  %1739 = vmatprep.subr.bf16.mxu0 %v4786_v22  ;;  %v6630_v22 = vld [vmem:[#allocation31_spill] sm:$0xff] }
 0x117   :  { %1780 = vmatprep.subr.bf16.mxu1 %v4932_v39 }
 0x119   :  { %1740 = vmatpush1.bf16.msra.mxu0 %v4792_v25  ;;  %v6441_v25 = vsub.s32 3, %v6628_v13 }
 0x11a   :  { %1781 = vmatpush1.bf16.msra.mxu1 %v4938_v60  ;;  %1741 = vmatprep.subr.bf16.mxu0 %v4795_v27  ;;  %v6631_v27 = vld [vmem:[#allocation29_spill] sm:$0xff] }
 0x11b   :  { %1782 = vmatprep.subr.bf16.mxu1 %v4944_v0  ;;  %p954_p11 = scmp.gt.s32.totalorder %s953_s5, 0  ;;  %p3690_p12 = scmp.lt.s32.totalorder %s953_s5, 1 }
 0x11d   :  { %1742 = vmatpush1.bf16.msra.mxu0 %v4801_v30  ;;  %v217_v30 = vrot.slane %v212_v20, %v6631_v27  ;;  %s955_s17 = scalar_select %p954_p11, %s953_s5, 0 }
 0x11e   :  { %1783 = vmatpush1.bf16.msra.mxu1 %v4950_v8  ;;  %1743 = vmatprep.subr.bf16.mxu0 %v4804_v32  ;;  %v225_v32 = vrot.slane %v212_v20, %v6430_v15  ;;  %s2415_s5 = sand.u32 7, %s6909_s7  ;;  %p3113_p11 = scmp.gt.s32.totalorder %s3848_s0, 0 }
 0x11f   :  { %1784 = vmatprep.subr.bf16.mxu1 %v4956_v16  ;;  %s6893_s17 = smov (!%p3690_p12, %s955_s17), 1  ;;  %p3849_p12 = scmp.lt.s32.totalorder %s3848_s0, 1 }
 0x120   :  { %s958_s23 = sshra.s32 %s6893_s17, 3  ;;  %s961_s25 = sand.u32 7, %s6893_s17 }
 0x121   :  { %1744 = vmatpush1.bf16.msra.mxu0 %v4814_v36  ;;  %v6632_v36 = vld [vmem:[#allocation32_spill] sm:$0xff]  ;;  %s3695_s24 = smul.u32 48, %s958_s23  ;;  %s2418_s17 = sadd.s32 %s3827_s16, %s2415_s5 }
 0x122   :  { %1785 = vmatpush1.bf16.msra.mxu1 %v4962_v18  ;;  %1745 = vmatprep.subr.bf16.mxu0 %v4817_v38  ;;  %v6633_v38 = vld [vmem:[#allocation33_spill] sm:$0xff]  ;;  %s2419_s23 = scalar_lea.vmem [#allocation2], %s2418_s17  ;;  %s6919_s0 = smov (!%p3113_p11, %s3848_s0), 0 }
 0x123   :  { %1786 = vmatprep.subr.bf16.mxu1 %v4968_v62  ;;  %s964_s26 = sadd.s32 %s3695_s24, %s961_s25  ;;  %s3830_s24 = sld [smem:[#allocation4 + $0x5]] }
 0x124   :  { %s965_s27 = scalar_lea.vmem [#allocation2], %s964_s26  ;;  %s6921_s0 = smov (!%p3849_p12, %s6919_s0), 1 }
 0x125   :  { %1746 = vmatpush1.bf16.msra.mxu0 %v4823_v41  ;;  %v6634_v41 = vld [vmem:[#allocation25_spill] sm:$0xff]  ;;  %s3117_s14 = sshra.s32 %s6921_s0, 3 }
 0x126   :  { %1787 = vmatpush1.bf16.msra.mxu1 %v4974_v2  ;;  %1747 = vmatprep.subr.bf16.mxu0 %v4826_v43  ;;  %v221_v29 = vrot.slane %v212_v20, %v6634_v41  ;;  %s3854_s15 = smul.u32 48, %s3117_s14 }
 0x127   :  { %1788 = vmatprep.subr.bf16.mxu1 %v4980_v12 }
 0x129   :  { %1748 = vmatpush2.bf16.msra.mxu0 %v4829_v45  ;;  %p2643_p7 = scmp.gt.s32.totalorder %s3830_s24, 0  ;;  %p3831_p8 = scmp.lt.s32.totalorder %s3830_s24, 1 }
 0x12a   :  { %1789 = vmatpush2.bf16.msra.mxu1 %v4986_v19  ;;  %1749 = vmatprep.subr.bf16.mxu0 %v4832_v47 }
 0x12b   :  { %1790 = vmatprep.subr.bf16.mxu1 %v4992_v58  ;;  %s6911_s24 = smov (!%p2643_p7, %s3830_s24), 0 }
 0x12c   :  { %s6913_s24 = smov (!%p3831_p8, %s6911_s24), 1 }
 0x12d   :  { %1750 = vmatpush2.bf16.msra.mxu0 %v4835_v49  ;;  %s2647_s25 = sshra.s32 %s6913_s24, 3 }
 0x12e   :  { %1791 = vmatpush2.bf16.msra.mxu1 %v4998_v56  ;;  %1751 = vmatprep.subr.bf16.mxu0 %v4838_v51  ;;  %s3836_s26 = smul.u32 48, %s2647_s25 }
 0x12f   :  { %1792 = vmatprep.subr.bf16.mxu1 %v5004_v52  ;;  %v4676_v52 = vmov 0.0  }
 0x130   :  { %853 = vst [vmem:[#allocation3] sm:$0xff] %v4676_v52  ;;  %854 = vst [vmem:[#allocation3 + $0x8] sm:$0xff] %v4676_v52  ;;  %v951_v52 = vld [vmem:[#allocation12] sm:$0x3f] }
 0x131   :  { %1752 = vmatpush2.bf16.msra.mxu0 %v4841_v53 }
 0x132   :  { %1793 = vmatpush2.bf16.msra.mxu1 %v5010_v50  ;;  %1753 = vmatprep.subr.bf16.mxu0 %v4844_v55 }
 0x133   :  { %1794 = vmatprep.subr.bf16.mxu1 %v5016_v46 }
 0x135   :  { %1754 = vmatpush2.bf16.msra.mxu0 %v4847_v57 }
 0x136   :  { %1795 = vmatpush2.bf16.msra.mxu1 %v5022_v42  ;;  %1755 = vmatprep.subr.bf16.mxu0 %v4850_v59 }
 0x137   :  { %1796 = vmatprep.subr.bf16.mxu1 %v5028_v37 }
 0x139   :  { %1756 = vmatpush2.bf16.msra.mxu0 %v4853_v61 }
 0x13a   :  { %1797 = vmatpush2.bf16.msra.mxu1 %v5034_v34  ;;  %1757 = vmatprep.subr.bf16.mxu0 %v4856_v63 }
 0x13b   :  { %1798 = vmatprep.subr.bf16.mxu1 %v5040_v33 }
 0x13d   :  { %1758 = vmatpush2.bf16.msra.mxu0 %v6625_v7 }
 0x13e   :  { %1799 = vmatpush2.bf16.msra.mxu1 %v6626_v9  ;;  %1759 = vmatprep.subr.bf16.mxu0 %v6627_v11 }
 0x13f   :  { %1800 = vmatprep.subr.bf16.mxu1 %v5052_v26 }
 0x141   :  { %1760 = vmatpush2.bf16.msra.mxu0 %v6629_v17 }
 0x142   :  { %1801 = vmatpush2.bf16.msra.mxu1 %v5058_v21  ;;  %1761 = vmatprep.subr.bf16.mxu0 %v6630_v22 }
 0x143   :  { %1802 = vmatprep.subr.bf16.mxu1 %v5064_v6  ;;  %v229_v6 = vrot.slane %v212_v20, %v6441_v25  ;;  %v232_v25 = vsub.s32 4, %v6628_v13 }
 0x145   :  { %1762 = vmatpush2.bf16.msra.mxu0 %v6632_v36 }
 0x146   :  { %1803 = vmatpush2.bf16.msra.mxu1 %v5070_v14  ;;  %1813 = vmatprep.subr.bf16.mxu0 %v6633_v38 }
 0x147   :  { %1966 = vmatprep.subr.bf16.mxu1 %v4759_v4 }
 0x148   :  { %v758_v21 = vpop.f32.mrf.mxu0 }
 0x149   :  { %v799_v26 = vpop.f32.mrf.mxu1  ;;  %v759_v9 = vadd.f32 %v758_v21, %v217_v30  ;;  %v236_v21 = vsub.s32 5, %v6628_v13 }
 0x14a   :  { %v800_v33 = vadd.f32 %v799_v26, %v225_v32  ;;  %v760_v34 = vpop.f32.mrf.mxu0  ;;  %v233_v26 = vrot.slane %v212_v20, %v232_v25 }
 0x14b   :  { %v801_v37 = vpop.f32.mrf.mxu1  ;;  %847 = vst [vmem:[#allocation2] sm:$0xff] %v759_v9  ;;  %v761_v15 = vadd.f32 %v760_v34, %v221_v29  ;;  %v237_v30 = vrot.slane %v212_v20, %v236_v21  ;;  %v5160_v29 = vrot.slane %v951_v52, %v6631_v27 }
 0x14c   :  { %849 = vst [vmem:[#allocation2 + $0x10] sm:$0xff] %v800_v33  ;;  %v802_v42 = vadd.f32 %v801_v37, %v229_v6  ;;  %v762_v14 = vpop.f32.mrf.mxu0 }
 0x14d   :  { %v803_v46 = vpop.f32.mrf.mxu1  ;;  %848 = vst [vmem:[#allocation2 + $0x8] sm:$0xff] %v761_v15  ;;  %v4677_v15 = vmov 1966171168   ;;  %6635 = vst [vmem:[#allocation27_spill] sm:$0xff] %v5160_v29 }
 0x14e   :  { %850 = vst [vmem:[#allocation2 + $0x18] sm:$0xff] %v802_v42  ;;  %v763_v4 = vpop.f32.mrf.mxu0  ;;  %v1620_v20 = vunpack.c.l.s4 %v4677_v15 }
 0x14f   :  { %v804_v50 = vpop.f32.mrf.mxu1  ;;  %v5163_v4 = vrot.slane %v951_v52, %v6634_v41 }
 0x151   :  { %6636 = vst [vmem:[#allocation28_spill] sm:$0xff] %v5163_v4 }
 0x188   :  { %v840_v32 = vpop.f32.mrf.mxu0 }
 0x189   :  { %v1527_v9 = vpop.f32.mrf.mxu1  ;;  %v841_v34 = vadd.f32 %v840_v32, %v233_v26  ;;  %v1621_v26 = vunpack.c.0.s8 %v1620_v20 }
 0x18a   :  { %v842_v33 = vpop.f32.mrf.mxu0 }
 0x18b   :  { %v1529_v6 = vpop.f32.mrf.mxu1  ;;  %851 = vst [vmem:[#allocation2 + $0x20] sm:$0xff] %v841_v34  ;;  %v843_v14 = vadd.f32 %v842_v33, %v237_v30  ;;  %v1528_v30 = vadd.f32 %v1527_v9, %v5160_v29  ;;  %v5168_v34 = vsub.s32 %v1621_v26, %v6628_v13  ;;  %v6637_v9 = vsub.s32 2, %v6628_v13 }
 0x18c   :  { %v844_v37 = vpop.f32.mrf.mxu0  ;;  %v1530_v32 = vadd.f32 %v1529_v6, %v5163_v4  ;;  %v6638_v6 = vsub.s32 3, %v6628_v13 }
 0x18d   :  { %v1531_v42 = vpop.f32.mrf.mxu1  ;;  %852 = vst [vmem:[#allocation2 + $0x28] sm:$0xff] %v843_v14  ;;  %v5174_v29 = vrot.slane %v951_v52, %v6637_v9 }
 0x18e   :  { %v845_v46 = vpop.f32.mrf.mxu0  ;;  %v1618_v33 = vcombine.low %v1528_v30, %v1530_v32  ;;  %v5178_v26 = vrot.slane %v951_v52, %v6638_v6 }
 0x18f   :  { %v1532_v50 = vpop.f32.mrf.mxu1 }
 0x190   :  { %v1625_v14 = vrot.slane %v1618_v33, %v5168_v34 }
 0x192   :  { %v1632_v50 = vrot.slane %v1625_v14, %v5168_v34 }
 0x194   :  { %v966_v37 = vld [vmem:[%s965_s27] ss:$8 sm:$0xf] }
 0x195   :  { %v967_v42 = vld [vmem:[%s965_s27] ss:$8 sm:$0x30]  ;;  %s2650_s27 = sand.u32 7, %s6913_s24 }
 0x196   :  { %v968_v46 = vor.u32 %v967_v42, %v966_v37  ;;  %s2653_s3 = sadd.s32 %s3836_s26, %s2650_s27 }
 0x197   :  { %s2654_s28 = scalar_lea.vmem [#allocation2], %s2653_s3 }
 0x198   :  { %v1634_v15 = vadd.f32 %v1632_v50, %v968_v46  ;;  %v1642_v2 = vrot.slane %v968_v46, 2 }
 0x19a   :  { %v3792_v20 = vmul.f32 -1.442695, %v1634_v15  ;;  %v5182_v15 = vrot.slane %v951_v52, %v232_v25 }
 0x19c   :  { %4230 = vpow2.f32 %v3792_v20  ;;  %v5184_v20 = vrot.slane %v951_v52, %v236_v21 }
 0x1a9   :  { %v4231_v14 = vpop.eup %4230 }
 0x1aa   :  { %v1638_v6 = vadd.f32 1.0, %v4231_v14 }
 0x1ac   :  { %4232 = vrcp.f32 %v1638_v6 }
 0x1c8   :  { %v1568_v30 = vpop.f32.mrf.mxu0 }
 0x1c9   :  { %v1609_v32 = vpop.f32.mrf.mxu1  ;;  %v1569_v56 = vadd.f32 %v1568_v30, %v5174_v29 }
 0x1ca   :  { %v1570_v33 = vpop.f32.mrf.mxu0  ;;  %v1610_v12 = vadd.f32 %v1609_v32, %v5182_v15 }
 0x1cb   :  { %v1611_v4 = vpop.f32.mrf.mxu1  ;;  %v1571_v37 = vadd.f32 %v1570_v33, %v5178_v26 }
 0x1cc   :  { %v1572_v42 = vpop.f32.mrf.mxu0  ;;  %v1612_v33 = vadd.f32 %v1611_v4, %v5184_v20 }
 0x1cd   :  { %v1613_v50 = vpop.f32.mrf.mxu1  ;;  %v1646_v9 = vcombine.low %v1569_v56, %v1571_v37  ;;  %v1688_v37 = vrot.slane %v968_v46, 4 }
 0x1ce   :  { %v1573_v58 = vpop.f32.mrf.mxu0  ;;  %v1671_v25 = vcombine.low %v1610_v12, %v1612_v33  ;;  %v6640_v12 = vlaneseq }
 0x1cf   :  { %v1614_v13 = vpop.f32.mrf.mxu1  ;;  %v1653_v19 = vrot.slane %v1646_v9, %v5168_v34  ;;  %v4233_v58 = vpop.eup %4232 }
 0x1d0   :  { %v1678_v21 = vrot.slane %v1671_v25, %v5168_v34  ;;  %vm5194_vm0 = vcmp.lt.s32.totalorder %v6640_v12, 256  ;;  %v6650_v12 = vld [vmem:[#allocation41_spill] sm:$0xff] }
 0x1d1   :  { %v1660_v30 = vrot.slane %v1653_v19, %v5168_v34 }
 0x1d2   :  { %v1685_v56 = vrot.slane %v1678_v21, %v5168_v34 }
 0x1d3   :  { %v1662_v42 = vadd.f32 %v1660_v30, %v1642_v2  ;;  %v6639_v2 = vld [vmem:[#allocation26_spill] sm:$0xff] }
 0x1d4   :  { %v1687_v52 = vmul.f32 %v4233_v58, %v1685_v56  ;;  %v6643_v56 = vld [vmem:[#allocation34_spill] sm:$0xff]  ;;  %v6644_v58 = vld [vmem:[#allocation35_spill] sm:$0xff] }
 0x1d5   :  { %v3793_v50 = vmul.f32 -1.442695, %v1662_v42 }
 0x1d6   :  { %v1690_v32 = vadd.f32 %v1688_v37, %v1687_v52  ;;  %v5213_v52 = vld [vmem:[#allocation11 + $0x150] ss:$24 sps:$4 sm:$0xff]   ;;  %v5216_v37 = vld [vmem:[#allocation11 + $0x124] ss:$24 sps:$4 sm:$0xff]  }
 0x1d7   :  { %4234 = vpow2.f32 %v3793_v50 }
 0x1e4   :  { %v4235_v14 = vpop.eup %4234 }
 0x1e5   :  { %v1666_v9 = vadd.f32 1.0, %v4235_v14  ;;  %v6645_v14 = vld [vmem:[#allocation36_spill] sm:$0xff] }
 0x1e7   :  { %4236 = vrcp.f32 %v1666_v9  ;;  %v6646_v9 = vld [vmem:[#allocation37_spill] sm:$0xff] }
 0x1e8   :  { %4238 = vtanh.f32 %v1690_v32  ;;  %v5221_v32 = vld [vmem:[#allocation11 + $0x120] ss:$24 sps:$4 sm:$0xff]  }
 0x1f4   :  { %v4237_v19 = vpop.eup %4236 }
 0x1f5   :  { %v1692_v13 = vsub.f32 1.0, %v4237_v19  ;;  %v4239_v4 = vpop.eup %4238  ;;  %v1694_v30 = vmul.f32 %v4237_v19, %v6639_v2  ;;  %v5224_v19 = vld [vmem:[#allocation11 + $0xf4] ss:$24 sps:$4 sm:$0xff]   ;;  %v5232_v2 = vld [vmem:[#allocation11 + $0xc4] ss:$24 sps:$4 sm:$0xff]  }
 0x1f7   :  { %v1693_v6 = vmul.f32 %v4239_v4, %v1692_v13  ;;  %v6647_v13 = vld [vmem:[#allocation38_spill] sm:$0xff]  ;;  %v6648_v4 = vld [vmem:[#allocation39_spill] sm:$0xff] }
 0x1f9   :  { %v5198_v42 = vadd.f32 %v1694_v30, %v1693_v6  ;;  %v5229_v6 = vld [vmem:[#allocation11 + $0xf0] ss:$24 sps:$4 sm:$0xff]  }
 0x1fa   :  { %v6649_v30 = vld [vmem:[#allocation40_spill] sm:$0xff] }
 0x1fb   :  { %1700 = vst.msk [vmem:[#allocation3] ss:$8 sm:$0x3] %vm5194_vm0, %v5198_v42  ;;  %v1726_v46 = vrot.slane %v5198_v42, %v6634_v41  ;;  %v1722_v50 = vrot.slane %v5198_v42, %v6631_v27 }
 0x1fd   :  { %v1730_v25 = vpack.c.bf16 %v1726_v46, %v1726_v46  ;;  %v5207_v21 = vpack.c.bf16 %v1722_v50, %v1722_v50  ;;  %v5237_v46 = vld [vmem:[#allocation11 + $0xc0] ss:$24 sps:$4 sm:$0xff]   ;;  %v5240_v50 = vld [vmem:[#allocation11 + $0x94] ss:$24 sps:$4 sm:$0xff]  }
 0x1fe   :  { %6651 = vst [vmem:[#allocation24_spill] sm:$0xff] %v5237_v46  ;;  %6652 = vst [vmem:[#allocation30_spill] sm:$0xff] %v5240_v50 }
 0x1ff   :  { %1763 = vmatprep.mubr.bf16.mxu0 %v1730_v25  ;;  %1804 = vmatprep.mubr.bf16.mxu1 %v1730_v25 }
 0x200   :  { %1764 = vmatmul.mubr.bf16.vlgmr.msra.gmra.mxu0 %v5207_v21  ;;  %1805 = vmatmul.mubr.bf16.vlgmr.msra.gmra.mxu1 %v5207_v21 }
 0x201   :  { %1814 = vmatpush1.bf16.msra.mxu0 %v6643_v56  ;;  %1845 = vmatprep.mubr.bf16.mxu0 %v1730_v25  ;;  %v6653_v25 = vld [vmem:[#allocation42_spill] sm:$0xff]  ;;  %v6654_v56 = vld [vmem:[#allocation43_spill] sm:$0xff] }
 0x202   :  { %1815 = vmatprep.subr.bf16.mxu0 %v6644_v58  ;;  %1967 = vmatpush1.bf16.msra.mxu1 %v5213_v52  ;;  %v5245_v58 = vld [vmem:[#allocation11 + $0x90] ss:$24 sps:$4 sm:$0xff]  }
 0x203   :  { %1968 = vmatprep.subr.bf16.mxu1 %v5216_v37  ;;  %6655 = vst [vmem:[#allocation31_spill] sm:$0xff] %v5245_v58 }
 0x205   :  { %1816 = vmatpush1.bf16.msra.mxu0 %v6645_v14  ;;  %v5248_v14 = vld [vmem:[#allocation11 + $0x64] ss:$24 sps:$4 sm:$0xff]  }
 0x206   :  { %1817 = vmatprep.subr.bf16.mxu0 %v6646_v9  ;;  %1969 = vmatpush1.bf16.msra.mxu1 %v5221_v32  ;;  %6656 = vst [vmem:[#allocation29_spill] sm:$0xff] %v5248_v14  ;;  %v6657_v9 = vld [vmem:[#allocation44_spill] sm:$0xff] }
 0x207   :  { %1970 = vmatprep.subr.bf16.mxu1 %v5224_v19 }
 0x209   :  { %1818 = vmatpush1.bf16.msra.mxu0 %v6647_v13 }
 0x20a   :  { %1819 = vmatprep.subr.bf16.mxu0 %v6648_v4  ;;  %1971 = vmatpush1.bf16.msra.mxu1 %v5229_v6 }
 0x20b   :  { %1972 = vmatprep.subr.bf16.mxu1 %v5232_v2 }
 0x20d   :  { %1820 = vmatpush1.bf16.msra.mxu0 %v6649_v30 }
 0x20e   :  { %1821 = vmatprep.subr.bf16.mxu0 %v6650_v12  ;;  %1973 = vmatpush1.bf16.msra.mxu1 %v5237_v46  ;;  %v6658_v12 = vld [vmem:[#allocation45_spill] sm:$0xff] }
 0x20f   :  { %1974 = vmatprep.subr.bf16.mxu1 %v5240_v50  ;;  %v5253_v46 = vld [vmem:[#allocation11 + $0x60] ss:$24 sps:$4 sm:$0xff]   ;;  %v5256_v50 = vld [vmem:[#allocation11 + $0x34] ss:$24 sps:$4 sm:$0xff]  }
 0x210   :  { %6659 = vst [vmem:[#allocation32_spill] sm:$0xff] %v5253_v46 }
 0x211   :  { %1822 = vmatpush1.bf16.msra.mxu0 %v6653_v25  ;;  %v6661_v25 = vld [vmem:[#allocation47_spill] sm:$0xff] }
 0x212   :  { %1823 = vmatprep.subr.bf16.mxu0 %v6654_v56  ;;  %1975 = vmatpush1.bf16.msra.mxu1 %v5245_v58  ;;  %v6660_v56 = vld [vmem:[#allocation46_spill] sm:$0xff]  ;;  %v5261_v58 = vld [vmem:[#allocation11 + $0x30] ss:$24 sps:$4 sm:$0xff]  }
 0x213   :  { %1976 = vmatprep.subr.bf16.mxu1 %v5248_v14  ;;  %6662 = vst [vmem:[#allocation33_spill] sm:$0xff] %v5261_v58  ;;  %v5264_v14 = vld [vmem:[#allocation11 + $0x4] ss:$24 sps:$4 sm:$0xff]  }
 0x214   :  { %6663 = vst [vmem:[#allocation25_spill] sm:$0xff] %v5264_v14 }
 0x215   :  { %1824 = vmatpush1.bf16.msra.mxu0 %v6657_v9  ;;  %v6665_v9 = vld [vmem:[#allocation51_spill] sm:$0xff] }
 0x216   :  { %1825 = vmatprep.subr.bf16.mxu0 %v6658_v12  ;;  %1977 = vmatpush1.bf16.msra.mxu1 %v5253_v46  ;;  %v6664_v12 = vld [vmem:[#allocation49_spill] sm:$0xff] }
 0x217   :  { %1978 = vmatprep.subr.bf16.mxu1 %v5256_v50  ;;  %v5269_v46 = vld [vmem:[#allocation11] ss:$24 sps:$4 sm:$0xff]  }
 0x218   :  { %6666 = vst [vmem:[#allocation26_spill] sm:$0xff] %v5269_v46 }
 0x219   :  { %1826 = vmatpush1.bf16.msra.mxu0 %v6660_v56  ;;  %v6667_v56 = vld [vmem:[#allocation53_spill] sm:$0xff] }
 0x21a   :  { %1827 = vmatprep.subr.bf16.mxu0 %v6661_v25  ;;  %1979 = vmatpush1.bf16.msra.mxu1 %v5261_v58  ;;  %v6668_v25 = vld [vmem:[#allocation55_spill] sm:$0xff]  ;;  %v6669_v58 = vld [vmem:[#allocation57_spill] sm:$0xff] }
 0x21b   :  { %1980 = vmatprep.subr.bf16.mxu1 %v5264_v14  ;;  %v6670_v14 = vld [vmem:[#allocation59_spill] sm:$0xff] }
 0x21d   :  { %1828 = vmatpush1.bf16.msra.mxu0 %v6664_v12 }
 0x21e   :  { %1829 = vmatprep.subr.bf16.mxu0 %v6665_v9  ;;  %1981 = vmatpush1.bf16.msra.mxu1 %v5269_v46  ;;  %v6671_v9 = vld [vmem:[#allocation61_spill] sm:$0xff]  ;;  %v6672_v46 = vld [vmem:[#allocation63_spill] sm:$0xff] }
 0x21f   :  { %1982 = vmatprep.subr.bf16.mxu1 %v4826_v43  ;;  %v6673_v43 = vld [vmem:[#allocation65_spill] sm:$0xff] }
 0x221   :  { %1830 = vmatpush2.bf16.msra.mxu0 %v6667_v56 }
 0x222   :  { %1831 = vmatprep.subr.bf16.mxu0 %v6668_v25  ;;  %1983 = vmatpush2.bf16.msra.mxu1 %v4829_v45  ;;  %v6674_v45 = vld [vmem:[#allocation67_spill] sm:$0xff] }
 0x223   :  { %1984 = vmatprep.subr.bf16.mxu1 %v4832_v47  ;;  %v6675_v47 = vld [vmem:[#allocation69_spill] sm:$0xff] }
 0x225   :  { %1832 = vmatpush2.bf16.msra.mxu0 %v6669_v58 }
 0x226   :  { %1833 = vmatprep.subr.bf16.mxu0 %v6670_v14  ;;  %1985 = vmatpush2.bf16.msra.mxu1 %v4835_v49  ;;  %v6676_v49 = vld [vmem:[#allocation71_spill] sm:$0xff] }
 0x227   :  { %1986 = vmatprep.subr.bf16.mxu1 %v4838_v51  ;;  %v6677_v51 = vld [vmem:[#allocation48_spill] sm:$0xff] }
 0x229   :  { %1834 = vmatpush2.bf16.msra.mxu0 %v6671_v9 }
 0x22a   :  { %1835 = vmatprep.subr.bf16.mxu0 %v6672_v46  ;;  %1987 = vmatpush2.bf16.msra.mxu1 %v4841_v53  ;;  %v6678_v53 = vld [vmem:[#allocation50_spill] sm:$0xff] }
 0x22b   :  { %1988 = vmatprep.subr.bf16.mxu1 %v4844_v55  ;;  %v6679_v55 = vld [vmem:[#allocation52_spill] sm:$0xff] }
 0x22d   :  { %1836 = vmatpush2.bf16.msra.mxu0 %v6673_v43 }
 0x22e   :  { %1837 = vmatprep.subr.bf16.mxu0 %v6674_v45  ;;  %1989 = vmatpush2.bf16.msra.mxu1 %v4847_v57  ;;  %v6680_v57 = vld [vmem:[#allocation54_spill] sm:$0xff] }
 0x22f   :  { %1990 = vmatprep.subr.bf16.mxu1 %v4850_v59  ;;  %v6681_v59 = vld [vmem:[#allocation56_spill] sm:$0xff] }
 0x231   :  { %1838 = vmatpush2.bf16.msra.mxu0 %v6675_v47 }
 0x232   :  { %1839 = vmatprep.subr.bf16.mxu0 %v6676_v49  ;;  %1991 = vmatpush2.bf16.msra.mxu1 %v4853_v61  ;;  %v6682_v61 = vld [vmem:[#allocation58_spill] sm:$0xff] }
 0x233   :  { %1992 = vmatprep.subr.bf16.mxu1 %v4856_v63  ;;  %v6683_v63 = vld [vmem:[#allocation60_spill] sm:$0xff] }
 0x235   :  { %1840 = vmatpush2.bf16.msra.mxu0 %v5048_v10 }
 0x236   :  { %1841 = vmatprep.subr.bf16.mxu0 %v5054_v23  ;;  %1993 = vmatpush2.bf16.msra.mxu1 %v6625_v7 }
 0x237   :  { %1994 = vmatprep.subr.bf16.mxu1 %v6627_v11 }
 0x239   :  { %1842 = vmatpush2.bf16.msra.mxu0 %v5060_v3 }
 0x23a   :  { %1843 = vmatprep.subr.bf16.mxu0 %v5066_v1  ;;  %1995 = vmatpush2.bf16.msra.mxu1 %v6629_v17 }
 0x23b   :  { %1996 = vmatprep.subr.bf16.mxu1 %v6630_v22 }
 0x23d   :  { %1844 = vmatpush2.bf16.msra.mxu0 %v5072_v28 }
 0x23e   :  { %2007 = vmatprep.subr.bf16.mxu0 %v4879_v24  ;;  %1997 = vmatpush2.bf16.msra.mxu1 %v6632_v36  ;;  %v6684_v24 = vld [vmem:[#allocation62_spill] sm:$0xff]  ;;  %v6695_v36 = vld [vmem:[#allocation28_spill] sm:$0xff] }
 0x23f   :  { %2048 = vmatprep.subr.bf16.mxu1 %v6633_v38 }
 0x240   :  { %1846 = vmatmul.mubr.bf16.vlgmr.msra.gmra.mxu0 %v5207_v21  ;;  %v6696_v21 = vld [vmem:[#allocation27_spill] sm:$0xff] }
 0x241   :  { %2008 = vmatpush1.bf16.msra.mxu0 %v4886_v31  ;;  %v6685_v31 = vld [vmem:[#allocation64_spill] sm:$0xff] }
 0x242   :  { %2009 = vmatprep.subr.bf16.mxu0 %v4890_v35  ;;  %v6687_v35 = vld [vmem:[#allocation68_spill] sm:$0xff] }
 0x245   :  { %2010 = vmatpush1.bf16.msra.mxu0 %v4896_v40  ;;  %v6688_v40 = vld [vmem:[#allocation70_spill] sm:$0xff] }
 0x246   :  { %2011 = vmatprep.subr.bf16.mxu0 %v4902_v44  ;;  %v6689_v44 = vld [vmem:[#allocation72_spill] sm:$0xff] }
 0x249   :  { %2012 = vmatpush1.bf16.msra.mxu0 %v4910_v48  ;;  %v6690_v48 = vld [vmem:[#allocation73_spill] sm:$0xff] }
 0x24a   :  { %2013 = vmatprep.subr.bf16.mxu0 %v4920_v5  ;;  %v6691_v5 = vld [vmem:[#allocation74_spill] sm:$0xff] }
 0x24d   :  { %2014 = vmatpush1.bf16.msra.mxu0 %v4924_v54  ;;  %v6692_v54 = vld [vmem:[#allocation75_spill] sm:$0xff] }
 0x24e   :  { %2015 = vmatprep.subr.bf16.mxu0 %v4932_v39  ;;  %v6693_v39 = vld [vmem:[#allocation76_spill] sm:$0xff] }
 0x251   :  { %2016 = vmatpush1.bf16.msra.mxu0 %v4938_v60  ;;  %v5337_v60 = vld [vmem:[#allocation11 + $0x154] ss:$24 sps:$4 sm:$0xff]  }
 0x252   :  { %2017 = vmatprep.subr.bf16.mxu0 %v4944_v0  ;;  %6694 = vst [vmem:[#allocation34_spill] sm:$0xff] %v5337_v60 }
 0x255   :  { %2018 = vmatpush1.bf16.msra.mxu0 %v4950_v8 }
 0x256   :  { %2019 = vmatprep.subr.bf16.mxu0 %v4956_v16 }
 0x259   :  { %2020 = vmatpush1.bf16.msra.mxu0 %v4962_v18  ;;  %v6686_v18 = vld [vmem:[#allocation66_spill] sm:$0xff] }
 0x25a   :  { %2021 = vmatprep.subr.bf16.mxu0 %v4968_v62 }
 0x25d   :  { %2022 = vmatpush1.bf16.msra.mxu0 %v6677_v51 }
 0x25e   :  { %2023 = vmatprep.subr.bf16.mxu0 %v6678_v53 }
 0x261   :  { %2024 = vmatpush2.bf16.msra.mxu0 %v6679_v55 }
 0x262   :  { %2025 = vmatprep.subr.bf16.mxu0 %v6680_v57 }
 0x265   :  { %2026 = vmatpush2.bf16.msra.mxu0 %v6681_v59 }
 0x266   :  { %2027 = vmatprep.subr.bf16.mxu0 %v6682_v61 }
 0x269   :  { %2028 = vmatpush2.bf16.msra.mxu0 %v6683_v63 }
 0x26a   :  { %2029 = vmatprep.subr.bf16.mxu0 %v6684_v24 }
 0x26d   :  { %2030 = vmatpush2.bf16.msra.mxu0 %v6685_v31 }
 0x26e   :  { %2031 = vmatprep.subr.bf16.mxu0 %v6686_v18 }
 0x271   :  { %2032 = vmatpush2.bf16.msra.mxu0 %v6687_v35 }
 0x272   :  { %2033 = vmatprep.subr.bf16.mxu0 %v6688_v40 }
 0x275   :  { %2034 = vmatpush2.bf16.msra.mxu0 %v6689_v44 }
 0x276   :  { %2035 = vmatprep.subr.bf16.mxu0 %v6690_v48 }
 0x279   :  { %2036 = vmatpush2.bf16.msra.mxu0 %v6691_v5 }
 0x27a   :  { %2037 = vmatprep.subr.bf16.mxu0 %v6692_v54  ;;  %v1715_v54 = vld [vmem:[%s1714_s12] ss:$8 sm:$0xf] }
 0x27d   :  { %2038 = vmatpush2.bf16.msra.mxu0 %v6693_v39 }
 0x27e   :  { %2201 = vmatprep.subr.bf16.mxu0 %v5337_v60 }
 0x2c0   :  { %v1765_v62 = vpop.f32.mrf.mxu0  ;;  %v1806_v0 = vpop.f32.mrf.mxu1 }
 0x2c1   :  { %v1766_v51 = vadd.f32 %v1765_v62, %v6696_v21  ;;  %v1807_v5 = vadd.f32 %v1806_v0, %v5174_v29 }
 0x2c2   :  { %v1767_v8 = vpop.f32.mrf.mxu0  ;;  %v1808_v16 = vpop.f32.mrf.mxu1 }
 0x2c3   :  { %v1768_v38 = vadd.f32 %v1767_v8, %v6695_v36 }
 0x2c4   :  { %v1769_v7 = vpop.f32.mrf.mxu0  ;;  %v1810_v11 = vpop.f32.mrf.mxu1 }
 0x2c5   :  { %v1856_v60 = vcombine.low %v1766_v51, %v1768_v38  ;;  %v1716_v7 = vld [vmem:[%s1714_s12] ss:$8 sm:$0x30]  ;;  %s2885_s12 = sand.u32 7, %s6917_s29 }
 0x2c6   :  { %v1770_v17 = vpop.f32.mrf.mxu0  ;;  %v1811_v22 = vpop.f32.mrf.mxu1  ;;  %s2888_s13 = sadd.s32 %s3845_s11, %s2885_s12 }
 0x2c7   :  { %v1863_v39 = vrot.slane %v1856_v60, %v5168_v34  ;;  %v1717_v17 = vor.u32 %v1716_v7, %v1715_v54  ;;  %v1809_v22 = vadd.f32 %v1808_v16, %v5178_v26  ;;  %s2889_s6 = scalar_lea.vmem [#allocation2], %s2888_s13 }
 0x2c9   :  { %v1870_v11 = vrot.slane %v1863_v39, %v5168_v34  ;;  %v1884_v8 = vcombine.low %v1807_v5, %v1809_v22  ;;  %v1880_v51 = vrot.slane %v1717_v17, 2 }
 0x2cb   :  { %v1872_v48 = vadd.f32 %v1870_v11, %v1717_v17  ;;  %v1891_v62 = vrot.slane %v1884_v8, %v5168_v34 }
 0x2cd   :  { %v3801_v36 = vmul.f32 -1.442695, %v1872_v48  ;;  %v1898_v38 = vrot.slane %v1891_v62, %v5168_v34 }
 0x2cf   :  { %4240 = vpow2.f32 %v3801_v36  ;;  %v1900_v60 = vadd.f32 %v1898_v38, %v1880_v51 }
 0x2d1   :  { %v3802_v21 = vmul.f32 -1.442695, %v1900_v60 }
 0x2d3   :  { %4242 = vpow2.f32 %v3802_v21 }
 0x2dc   :  { %v4241_v44 = vpop.eup %4240 }
 0x2dd   :  { %v1876_v40 = vadd.f32 1.0, %v4241_v44  ;;  %v1926_v44 = vrot.slane %v1717_v17, 4 }
 0x2df   :  { %4244 = vrcp.f32 %v1876_v40 }
 0x2e0   :  { %v4243_v5 = vpop.eup %4242 }
 0x2e1   :  { %v1904_v36 = vadd.f32 1.0, %v4243_v5 }
 0x2e3   :  { %4246 = vrcp.f32 %v1904_v36  ;;  %v5377_v36 = vld [vmem:[#allocation11 + $0x104] ss:$24 sps:$4 sm:$0xff]  }
 0x2ec   :  { %v4245_v62 = vpop.eup %4244 }
 0x2f0   :  { %v4247_v38 = vpop.eup %4246 }
 0x2f1   :  { %v1930_v51 = vsub.f32 1.0, %v4247_v38 }
 0x300   :  { %v1847_v54 = vpop.f32.mrf.mxu0 }
 0x301   :  { %v1848_v16 = vadd.f32 %v1847_v54, %v5182_v15 }
 0x302   :  { %v1849_v39 = vpop.f32.mrf.mxu0 }
 0x303   :  { %v1850_v0 = vadd.f32 %v1849_v39, %v5184_v20  ;;  %v1932_v39 = vmul.f32 %v4247_v38, %v5198_v42  ;;  %v5366_v42 = vld [vmem:[#allocation11 + $0x160] ss:$24 sps:$4 sm:$0xff]  }
 0x304   :  { %v1851_v48 = vpop.f32.mrf.mxu0  ;;  %v6705_v38 = vld [vmem:[#allocation45_spill] sm:$0xff] }
 0x305   :  { %v1909_v7 = vcombine.low %v1848_v16, %v1850_v0 }
 0x306   :  { %v1852_v11 = vpop.f32.mrf.mxu0 }
 0x307   :  { %v1916_v22 = vrot.slane %v1909_v7, %v5168_v34  ;;  %v5369_v7 = vld [vmem:[#allocation11 + $0x134] ss:$24 sps:$4 sm:$0xff]   ;;  %v5374_v11 = vld [vmem:[#allocation11 + $0x130] ss:$24 sps:$4 sm:$0xff]  }
 0x309   :  { %v1923_v8 = vrot.slane %v1916_v22, %v5168_v34  ;;  %v6697_v22 = vld [vmem:[#allocation41_spill] sm:$0xff] }
 0x30b   :  { %v1925_v21 = vmul.f32 %v4245_v62, %v1923_v8  ;;  %v6698_v8 = vld [vmem:[#allocation24_spill] sm:$0xff]  ;;  %v6699_v62 = vld [vmem:[#allocation30_spill] sm:$0xff] }
 0x30d   :  { %v1928_v40 = vadd.f32 %v1926_v44, %v1925_v21  ;;  %v6700_v21 = vld [vmem:[#allocation42_spill] sm:$0xff]  ;;  %v6701_v44 = vld [vmem:[#allocation43_spill] sm:$0xff] }
 0x30f   :  { %4248 = vtanh.f32 %v1928_v40  ;;  %v6702_v40 = vld [vmem:[#allocation31_spill] sm:$0xff] }
 0x31c   :  { %v4249_v60 = vpop.eup %4248 }
 0x31d   :  { %v1931_v54 = vmul.f32 %v4249_v60, %v1930_v51  ;;  %v6706_v51 = vld [vmem:[#allocation32_spill] sm:$0xff]  ;;  %v6708_v60 = vld [vmem:[#allocation47_spill] sm:$0xff] }
 0x31f   :  { %v5353_v48 = vadd.f32 %v1932_v39, %v1931_v54  ;;  %v6709_v54 = vld [vmem:[#allocation33_spill] sm:$0xff] }
 0x320   :  { %v6710_v39 = vld [vmem:[#allocation25_spill] sm:$0xff] }
 0x321   :  { %1935 = vst.msk [vmem:[#allocation3 + $0x1] ss:$8 sm:$0x3] %vm5194_vm0, %v5353_v48  ;;  %v1961_v16 = vrot.slane %v5353_v48, %v6634_v41  ;;  %v1957_v17 = vrot.slane %v5353_v48, %v6631_v27 }
 0x323   :  { %v1965_v0 = vpack.c.bf16 %v1961_v16, %v1961_v16  ;;  %v5362_v5 = vpack.c.bf16 %v1957_v17, %v1957_v17  ;;  %v6711_v16 = vld [vmem:[#allocation51_spill] sm:$0xff]  ;;  %v6712_v17 = vld [vmem:[#allocation26_spill] sm:$0xff] }
 0x325   :  { %1998 = vmatprep.mubr.bf16.mxu1 %v1965_v0  ;;  %2039 = vmatprep.mubr.bf16.mxu0 %v1965_v0 }
 0x326   :  { %1999 = vmatmul.mubr.bf16.vlgmr.msra.gmra.mxu1 %v5362_v5  ;;  %2040 = vmatmul.mubr.bf16.vlgmr.msra.gmra.mxu0 %v5362_v5 }
 0x327   :  { %2049 = vmatpush1.bf16.msra.mxu1 %v5366_v42  ;;  %2080 = vmatprep.mubr.bf16.mxu1 %v1965_v0  ;;  %v5405_v0 = vld [vmem:[#allocation11 + $0x2d4] ss:$24 sps:$4 sm:$0xff]  }
 0x328   :  { %2050 = vmatprep.subr.bf16.mxu1 %v5369_v7  ;;  %2202 = vmatpush1.bf16.msra.mxu0 %v5213_v52 }
 0x329   :  { %2203 = vmatprep.subr.bf16.mxu0 %v5216_v37 }
 0x32b   :  { %2051 = vmatpush1.bf16.msra.mxu1 %v5374_v11 }
 0x32c   :  { %2052 = vmatprep.subr.bf16.mxu1 %v5377_v36  ;;  %2204 = vmatpush1.bf16.msra.mxu0 %v5221_v32 }
 0x32d   :  { %2205 = vmatprep.subr.bf16.mxu0 %v5224_v19 }
 0x32f   :  { %2053 = vmatpush1.bf16.msra.mxu1 %v6647_v13  ;;  %v6703_v13 = vld [vmem:[#allocation29_spill] sm:$0xff] }
 0x330   :  { %2054 = vmatprep.subr.bf16.mxu1 %v6648_v4  ;;  %2206 = vmatpush1.bf16.msra.mxu0 %v5229_v6  ;;  %v6704_v4 = vld [vmem:[#allocation44_spill] sm:$0xff] }
 0x331   :  { %2207 = vmatprep.subr.bf16.mxu0 %v5232_v2 }
 0x333   :  { %2055 = vmatpush1.bf16.msra.mxu1 %v6649_v30  ;;  %v6707_v30 = vld [vmem:[#allocation46_spill] sm:$0xff] }
 0x334   :  { %2056 = vmatprep.subr.bf16.mxu1 %v6697_v22  ;;  %2208 = vmatpush1.bf16.msra.mxu0 %v6698_v8  ;;  %v5410_v22 = vld [vmem:[#allocation11 + $0x2d0] ss:$24 sps:$4 sm:$0xff]  }
 0x335   :  { %2209 = vmatprep.subr.bf16.mxu0 %v6699_v62 }
 0x337   :  { %2057 = vmatpush1.bf16.msra.mxu1 %v6700_v21  ;;  %v5413_v21 = vld [vmem:[#allocation11 + $0x2a4] ss:$24 sps:$4 sm:$0xff]  }
 0x338   :  { %2058 = vmatprep.subr.bf16.mxu1 %v6701_v44  ;;  %2210 = vmatpush1.bf16.msra.mxu0 %v6702_v40  ;;  %v5421_v44 = vld [vmem:[#allocation11 + $0x274] ss:$24 sps:$4 sm:$0xff]  }
 0x339   :  { %2211 = vmatprep.subr.bf16.mxu0 %v6703_v13 }
 0x33b   :  { %2059 = vmatpush1.bf16.msra.mxu1 %v6704_v4  ;;  %v5478_v4 = vld [vmem:[#allocation11 + $0x12c] ss:$24 sps:$4 sm:$0xff]  }
 0x33c   :  { %2060 = vmatprep.subr.bf16.mxu1 %v6705_v38  ;;  %2212 = vmatpush1.bf16.msra.mxu0 %v6706_v51  ;;  %6722 = vst [vmem:[#allocation57_spill] sm:$0xff] %v5478_v4  ;;  %v5484_v38 = vld [vmem:[#allocation11 + $0xfc] ss:$24 sps:$4 sm:$0xff]  }
 0x33d   :  { %2213 = vmatprep.subr.bf16.mxu0 %v5256_v50  ;;  %6724 = vst [vmem:[#allocation61_spill] sm:$0xff] %v5484_v38 }
 0x33f   :  { %2061 = vmatpush1.bf16.msra.mxu1 %v6707_v30  ;;  %v5487_v30 = vld [vmem:[#allocation11 + $0xf8] ss:$24 sps:$4 sm:$0xff]  }
 0x340   :  { %2062 = vmatprep.subr.bf16.mxu1 %v6708_v60  ;;  %2214 = vmatpush1.bf16.msra.mxu0 %v6709_v54  ;;  %6725 = vst [vmem:[#allocation63_spill] sm:$0xff] %v5487_v30  ;;  %v5493_v60 = vld [vmem:[#allocation11 + $0xc8] ss:$24 sps:$4 sm:$0xff]  }
 0x341   :  { %2215 = vmatprep.subr.bf16.mxu0 %v6710_v39  ;;  %6727 = vst [vmem:[#allocation67_spill] sm:$0xff] %v5493_v60 }
 0x343   :  { %2063 = vmatpush1.bf16.msra.mxu1 %v6664_v12  ;;  %v5418_v12 = vld [vmem:[#allocation11 + $0x2a0] ss:$24 sps:$4 sm:$0xff]  }
 0x344   :  { %2064 = vmatprep.subr.bf16.mxu1 %v6711_v16  ;;  %2216 = vmatpush1.bf16.msra.mxu0 %v6712_v17  ;;  %v5496_v16 = vld [vmem:[#allocation11 + $0x9c] ss:$24 sps:$4 sm:$0xff]  }
 0x345   :  { %2217 = vmatprep.subr.bf16.mxu0 %v5405_v0  ;;  %6728 = vst [vmem:[#allocation69_spill] sm:$0xff] %v5496_v16 }
 0x347   :  { %2065 = vmatpush2.bf16.msra.mxu1 %v6667_v56  ;;  %v5429_v56 = vld [vmem:[#allocation11 + $0x244] ss:$24 sps:$4 sm:$0xff]  }
 0x348   :  { %2066 = vmatprep.subr.bf16.mxu1 %v6668_v25  ;;  %2218 = vmatpush2.bf16.msra.mxu0 %v5410_v22  ;;  %v5426_v25 = vld [vmem:[#allocation11 + $0x270] ss:$24 sps:$4 sm:$0xff]  }
 0x349   :  { %2219 = vmatprep.subr.bf16.mxu0 %v5413_v21 }
 0x34b   :  { %2067 = vmatpush2.bf16.msra.mxu1 %v6669_v58  ;;  %v5434_v58 = vld [vmem:[#allocation11 + $0x240] ss:$24 sps:$4 sm:$0xff]  }
 0x34c   :  { %2068 = vmatprep.subr.bf16.mxu1 %v6670_v14  ;;  %2220 = vmatpush2.bf16.msra.mxu0 %v5418_v12  ;;  %v5437_v14 = vld [vmem:[#allocation11 + $0x214] ss:$24 sps:$4 sm:$0xff]  }
 0x34d   :  { %2221 = vmatprep.subr.bf16.mxu0 %v5421_v44 }
 0x34f   :  { %2069 = vmatpush2.bf16.msra.mxu1 %v6671_v9  ;;  %v5445_v9 = vld [vmem:[#allocation11 + $0x1e4] ss:$24 sps:$4 sm:$0xff]  }
 0x350   :  { %2070 = vmatprep.subr.bf16.mxu1 %v6672_v46  ;;  %2222 = vmatpush2.bf16.msra.mxu0 %v5426_v25  ;;  %v5442_v46 = vld [vmem:[#allocation11 + $0x210] ss:$24 sps:$4 sm:$0xff]   ;;  %6713 = vst [vmem:[#allocation35_spill] sm:$0xff] %v5445_v9 }
 0x351   :  { %2223 = vmatprep.subr.bf16.mxu0 %v5429_v56 }
 0x353   :  { %2071 = vmatpush2.bf16.msra.mxu1 %v6673_v43  ;;  %v5450_v43 = vld [vmem:[#allocation11 + $0x1e0] ss:$24 sps:$4 sm:$0xff]  }
 0x354   :  { %2072 = vmatprep.subr.bf16.mxu1 %v6674_v45  ;;  %2224 = vmatpush2.bf16.msra.mxu0 %v5434_v58  ;;  %6714 = vst [vmem:[#allocation36_spill] sm:$0xff] %v5450_v43  ;;  %v5453_v45 = vld [vmem:[#allocation11 + $0x1b4] ss:$24 sps:$4 sm:$0xff]  }
 0x355   :  { %2225 = vmatprep.subr.bf16.mxu0 %v5437_v14  ;;  %6715 = vst [vmem:[#allocation37_spill] sm:$0xff] %v5453_v45 }
 0x357   :  { %2073 = vmatpush2.bf16.msra.mxu1 %v6675_v47  ;;  %v5458_v47 = vld [vmem:[#allocation11 + $0x1b0] ss:$24 sps:$4 sm:$0xff]  }
 0x358   :  { %2074 = vmatprep.subr.bf16.mxu1 %v6676_v49  ;;  %2226 = vmatpush2.bf16.msra.mxu0 %v5442_v46  ;;  %6716 = vst [vmem:[#allocation38_spill] sm:$0xff] %v5458_v47  ;;  %v5461_v49 = vld [vmem:[#allocation11 + $0x184] ss:$24 sps:$4 sm:$0xff]  }
 0x359   :  { %2227 = vmatprep.subr.bf16.mxu0 %v5445_v9  ;;  %6717 = vst [vmem:[#allocation39_spill] sm:$0xff] %v5461_v49 }
 0x35b   :  { %2075 = vmatpush2.bf16.msra.mxu1 %v5048_v10  ;;  %v5468_v10 = vld [vmem:[#allocation11 + $0x180] ss:$24 sps:$4 sm:$0xff]  }
 0x35c   :  { %2076 = vmatprep.subr.bf16.mxu1 %v5054_v23  ;;  %2228 = vmatpush2.bf16.msra.mxu0 %v5450_v43  ;;  %v5465_v23 = vld [vmem:[#allocation11 + $0x15c] ss:$24 sps:$4 sm:$0xff]   ;;  %6719 = vst [vmem:[#allocation49_spill] sm:$0xff] %v5468_v10 }
 0x35d   :  { %2229 = vmatprep.subr.bf16.mxu0 %v5453_v45  ;;  %6718 = vst [vmem:[#allocation40_spill] sm:$0xff] %v5465_v23 }
 0x35f   :  { %2077 = vmatpush2.bf16.msra.mxu1 %v5060_v3  ;;  %v5471_v3 = vld [vmem:[#allocation11 + $0x164] ss:$24 sps:$4 sm:$0xff]  }
 0x360   :  { %2078 = vmatprep.subr.bf16.mxu1 %v5066_v1  ;;  %2230 = vmatpush2.bf16.msra.mxu0 %v5458_v47  ;;  %6720 = vst [vmem:[#allocation53_spill] sm:$0xff] %v5471_v3  ;;  %v5475_v1 = vld [vmem:[#allocation11 + $0x158] ss:$24 sps:$4 sm:$0xff]  }
 0x361   :  { %2231 = vmatprep.subr.bf16.mxu0 %v5461_v49  ;;  %6721 = vst [vmem:[#allocation55_spill] sm:$0xff] %v5475_v1 }
 0x363   :  { %2079 = vmatpush2.bf16.msra.mxu1 %v5072_v28  ;;  %v5481_v28 = vld [vmem:[#allocation11 + $0x128] ss:$24 sps:$4 sm:$0xff]  }
 0x364   :  { %2242 = vmatprep.subr.bf16.mxu1 %v5465_v23  ;;  %2232 = vmatpush2.bf16.msra.mxu0 %v5468_v10  ;;  %6723 = vst [vmem:[#allocation59_spill] sm:$0xff] %v5481_v28 }
 0x365   :  { %2283 = vmatprep.subr.bf16.mxu0 %v5471_v3 }
 0x366   :  { %2081 = vmatmul.mubr.bf16.vlgmr.msra.gmra.mxu1 %v5362_v5  ;;  %v5490_v5 = vld [vmem:[#allocation11 + $0xcc] ss:$24 sps:$4 sm:$0xff]  }
 0x367   :  { %2243 = vmatpush1.bf16.msra.mxu1 %v5475_v1  ;;  %6726 = vst [vmem:[#allocation65_spill] sm:$0xff] %v5490_v5 }
 0x368   :  { %2244 = vmatprep.subr.bf16.mxu1 %v5478_v4 }
 0x36b   :  { %2245 = vmatpush1.bf16.msra.mxu1 %v5481_v28  ;;  %v5499_v28 = vld [vmem:[#allocation11 + $0x98] ss:$24 sps:$4 sm:$0xff]  }
 0x36c   :  { %2246 = vmatprep.subr.bf16.mxu1 %v5484_v38  ;;  %6729 = vst [vmem:[#allocation71_spill] sm:$0xff] %v5499_v28  ;;  %v5502_v38 = vld [vmem:[#allocation11 + $0x6c] ss:$24 sps:$4 sm:$0xff]  }
 0x36d   :  { %6730 = vst [vmem:[#allocation48_spill] sm:$0xff] %v5502_v38 }
 0x36f   :  { %2247 = vmatpush1.bf16.msra.mxu1 %v5487_v30  ;;  %v5505_v30 = vld [vmem:[#allocation11 + $0x68] ss:$24 sps:$4 sm:$0xff]  }
 0x370   :  { %2248 = vmatprep.subr.bf16.mxu1 %v5490_v5  ;;  %6731 = vst [vmem:[#allocation50_spill] sm:$0xff] %v5505_v30  ;;  %v5508_v5 = vld [vmem:[#allocation11 + $0x3c] ss:$24 sps:$4 sm:$0xff]  }
 0x371   :  { %6732 = vst [vmem:[#allocation52_spill] sm:$0xff] %v5508_v5 }
 0x373   :  { %2249 = vmatpush1.bf16.msra.mxu1 %v5493_v60  ;;  %v5511_v60 = vld [vmem:[#allocation11 + $0x38] ss:$24 sps:$4 sm:$0xff]  }
 0x374   :  { %2250 = vmatprep.subr.bf16.mxu1 %v5496_v16  ;;  %6733 = vst [vmem:[#allocation54_spill] sm:$0xff] %v5511_v60  ;;  %v5514_v16 = vld [vmem:[#allocation11 + $0xc] ss:$24 sps:$4 sm:$0xff]  }
 0x375   :  { %6734 = vst [vmem:[#allocation56_spill] sm:$0xff] %v5514_v16 }
 0x377   :  { %2251 = vmatpush1.bf16.msra.mxu1 %v5499_v28  ;;  %v5517_v28 = vld [vmem:[#allocation11 + $0x8] ss:$24 sps:$4 sm:$0xff]  }
 0x378   :  { %2252 = vmatprep.subr.bf16.mxu1 %v5502_v38  ;;  %6735 = vst [vmem:[#allocation58_spill] sm:$0xff] %v5517_v28 }
 0x37b   :  { %2253 = vmatpush1.bf16.msra.mxu1 %v5505_v30  ;;  %v1950_v30 = vld [vmem:[%s1949_s18] ss:$8 sm:$0xf] }
 0x37c   :  { %2254 = vmatprep.subr.bf16.mxu1 %v5508_v5 }
 0x37f   :  { %2255 = vmatpush1.bf16.msra.mxu1 %v5511_v60 }
 0x380   :  { %2256 = vmatprep.subr.bf16.mxu1 %v5514_v16 }
 0x383   :  { %2257 = vmatpush1.bf16.msra.mxu1 %v5517_v28  ;;  %v6736_v28 = vld [vmem:[#allocation70_spill] sm:$0xff] }
 0x384   :  { %2258 = vmatprep.subr.bf16.mxu1 %v6678_v53  ;;  %v6737_v53 = vld [vmem:[#allocation72_spill] sm:$0xff] }
 0x387   :  { %2259 = vmatpush2.bf16.msra.mxu1 %v6679_v55  ;;  %v6738_v55 = vld [vmem:[#allocation73_spill] sm:$0xff] }
 0x388   :  { %2260 = vmatprep.subr.bf16.mxu1 %v6680_v57  ;;  %v6739_v57 = vld [vmem:[#allocation74_spill] sm:$0xff] }
 0x38b   :  { %2261 = vmatpush2.bf16.msra.mxu1 %v6681_v59  ;;  %v6740_v59 = vld [vmem:[#allocation75_spill] sm:$0xff] }
 0x38c   :  { %2262 = vmatprep.subr.bf16.mxu1 %v6682_v61  ;;  %v6741_v61 = vld [vmem:[#allocation76_spill] sm:$0xff] }
 0x38f   :  { %2263 = vmatpush2.bf16.msra.mxu1 %v6683_v63  ;;  %v6742_v63 = vld [vmem:[#allocation34_spill] sm:$0xff] }
 0x390   :  { %2264 = vmatprep.subr.bf16.mxu1 %v6684_v24 }
 0x393   :  { %2265 = vmatpush2.bf16.msra.mxu1 %v6685_v31 }
 0x394   :  { %2266 = vmatprep.subr.bf16.mxu1 %v6686_v18 }
 0x397   :  { %2267 = vmatpush2.bf16.msra.mxu1 %v6687_v35 }
 0x398   :  { %2268 = vmatprep.subr.bf16.mxu1 %v6736_v28 }
 0x39b   :  { %2269 = vmatpush2.bf16.msra.mxu1 %v6737_v53 }
 0x39c   :  { %2270 = vmatprep.subr.bf16.mxu1 %v6738_v55  ;;  %v6743_v55 = vld [vmem:[#allocation28_spill] sm:$0xff] }
 0x39f   :  { %2271 = vmatpush2.bf16.msra.mxu1 %v6739_v57 }
 0x3a0   :  { %2272 = vmatprep.subr.bf16.mxu1 %v6740_v59  ;;  %v6744_v59 = vld [vmem:[#allocation27_spill] sm:$0xff] }
 0x3a3   :  { %2273 = vmatpush2.bf16.msra.mxu1 %v6741_v61 }
 0x3a4   :  { %2436 = vmatprep.subr.bf16.mxu1 %v6742_v63 }
 0x3e6   :  { %v2000_v24 = vpop.f32.mrf.mxu1  ;;  %v2041_v31 = vpop.f32.mrf.mxu0 }
 0x3e7   :  { %v2001_v61 = vadd.f32 %v2000_v24, %v6744_v59  ;;  %v2042_v38 = vadd.f32 %v2041_v31, %v5174_v29 }
 0x3e8   :  { %v2002_v18 = vpop.f32.mrf.mxu1  ;;  %v2043_v16 = vpop.f32.mrf.mxu0 }
 0x3e9   :  { %v2003_v57 = vadd.f32 %v2002_v18, %v6743_v55 }
 0x3ea   :  { %v2004_v35 = vpop.f32.mrf.mxu1  ;;  %v2045_v28 = vpop.f32.mrf.mxu0 }
 0x3eb   :  { %v2091_v63 = vcombine.low %v2001_v61, %v2003_v57  ;;  %v1951_v35 = vld [vmem:[%s1949_s18] ss:$8 sm:$0x30]  ;;  %s3120_s18 = sand.u32 7, %s6921_s0 }
 0x3ec   :  { %v2005_v53 = vpop.f32.mrf.mxu1  ;;  %v2046_v60 = vpop.f32.mrf.mxu0  ;;  %s3123_s19 = sadd.s32 %s3854_s15, %s3120_s18 }
 0x3ed   :  { %v2098_v5 = vrot.slane %v2091_v63, %v5168_v34  ;;  %v1952_v53 = vor.u32 %v1951_v35, %v1950_v30  ;;  %v2044_v60 = vadd.f32 %v2043_v16, %v5178_v26  ;;  %s3124_s1 = scalar_lea.vmem [#allocation2], %s3123_s19 }
 0x3ef   :  { %v2105_v28 = vrot.slane %v2098_v5, %v5168_v34  ;;  %v2119_v18 = vcombine.low %v2042_v38, %v2044_v60  ;;  %v2115_v61 = vrot.slane %v1952_v53, 2 }
 0x3f1   :  { %v2107_v4 = vadd.f32 %v2105_v28, %v1952_v53  ;;  %v2126_v24 = vrot.slane %v2119_v18, %v5168_v34 }
 0x3f3   :  { %v3810_v55 = vmul.f32 -1.442695, %v2107_v4  ;;  %v2133_v57 = vrot.slane %v2126_v24, %v5168_v34 }
 0x3f5   :  { %4250 = vpow2.f32 %v3810_v55  ;;  %v2135_v63 = vadd.f32 %v2133_v57, %v2115_v61 }
 0x3f7   :  { %v3811_v59 = vmul.f32 -1.442695, %v2135_v63 }
 0x3f9   :  { %4252 = vpow2.f32 %v3811_v59 }
 0x402   :  { %v4251_v1 = vpop.eup %4250 }
 0x403   :  { %v2111_v3 = vadd.f32 1.0, %v4251_v1  ;;  %v2161_v1 = vrot.slane %v1952_v53, 4 }
 0x405   :  { %4254 = vrcp.f32 %v2111_v3 }
 0x406   :  { %v4253_v38 = vpop.eup %4252 }
 0x407   :  { %v2139_v55 = vadd.f32 1.0, %v4253_v38 }
 0x409   :  { %4256 = vrcp.f32 %v2139_v55  ;;  %v5643_v55 = vld [vmem:[#allocation11 + $0x250] ss:$24 sps:$4 sm:$0xff]  }
 0x412   :  { %v4255_v24 = vpop.eup %4254 }
 0x416   :  { %v4257_v57 = vpop.eup %4256 }
 0x417   :  { %v2165_v61 = vsub.f32 1.0, %v4257_v57 }
 0x426   :  { %v2082_v30 = vpop.f32.mrf.mxu1 }
 0x427   :  { %v2083_v16 = vadd.f32 %v2082_v30, %v5182_v15 }
 0x428   :  { %v2084_v5 = vpop.f32.mrf.mxu1 }
 0x429   :  { %v2085_v31 = vadd.f32 %v2084_v5, %v5184_v20  ;;  %v2167_v5 = vmul.f32 %v4257_v57, %v5353_v48  ;;  %v5571_v48 = vld [vmem:[#allocation11 + $0x100] ss:$24 sps:$4 sm:$0xff]   ;;  %v5670_v57 = vld [vmem:[#allocation11 + $0x194] ss:$24 sps:$4 sm:$0xff]  }
 0x42a   :  { %v2086_v4 = vpop.f32.mrf.mxu1  ;;  %6749 = vst [vmem:[#allocation68_spill] sm:$0xff] %v5670_v57 }
 0x42b   :  { %v2144_v35 = vcombine.low %v2083_v16, %v2085_v31 }
 0x42c   :  { %v2087_v28 = vpop.f32.mrf.mxu1 }
 0x42d   :  { %v2151_v60 = vrot.slane %v2144_v35, %v5168_v34  ;;  %v5574_v35 = vld [vmem:[#allocation11 + $0xd4] ss:$24 sps:$4 sm:$0xff]  }
 0x42e   :  { %v5638_v28 = vld [vmem:[#allocation11 + $0x254] ss:$24 sps:$4 sm:$0xff]  }
 0x42f   :  { %v2158_v18 = vrot.slane %v2151_v60, %v5168_v34  ;;  %v5646_v60 = vld [vmem:[#allocation11 + $0x224] ss:$24 sps:$4 sm:$0xff]  }
 0x431   :  { %v2160_v59 = vmul.f32 %v4255_v24, %v2158_v18  ;;  %v5651_v18 = vld [vmem:[#allocation11 + $0x220] ss:$24 sps:$4 sm:$0xff]   ;;  %v5654_v24 = vld [vmem:[#allocation11 + $0x1f4] ss:$24 sps:$4 sm:$0xff]  }
 0x432   :  { %6745 = vst [vmem:[#allocation60_spill] sm:$0xff] %v5654_v24 }
 0x433   :  { %v2163_v3 = vadd.f32 %v2161_v1, %v2160_v59  ;;  %v5659_v59 = vld [vmem:[#allocation11 + $0x1f0] ss:$24 sps:$4 sm:$0xff]   ;;  %v5662_v1 = vld [vmem:[#allocation11 + $0x1c4] ss:$24 sps:$4 sm:$0xff]  }
 0x434   :  { %6746 = vst [vmem:[#allocation62_spill] sm:$0xff] %v5659_v59  ;;  %6747 = vst [vmem:[#allocation64_spill] sm:$0xff] %v5662_v1 }
 0x435   :  { %4258 = vtanh.f32 %v2163_v3  ;;  %v5667_v3 = vld [vmem:[#allocation11 + $0x1c0] ss:$24 sps:$4 sm:$0xff]  }
 0x436   :  { %6748 = vst [vmem:[#allocation66_spill] sm:$0xff] %v5667_v3 }
 0x442   :  { %v4259_v63 = vpop.eup %4258 }
 0x443   :  { %v2166_v30 = vmul.f32 %v4259_v63, %v2165_v61  ;;  %v5675_v61 = vld [vmem:[#allocation11 + $0x190] ss:$24 sps:$4 sm:$0xff]   ;;  %v6751_v63 = vld [vmem:[#allocation53_spill] sm:$0xff] }
 0x444   :  { %6750 = vst [vmem:[#allocation41_spill] sm:$0xff] %v5675_v61 }
 0x445   :  { %v5550_v4 = vadd.f32 %v2167_v5, %v2166_v30  ;;  %v6752_v30 = vld [vmem:[#allocation55_spill] sm:$0xff]  ;;  %v6753_v5 = vld [vmem:[#allocation57_spill] sm:$0xff] }
 0x447   :  { %2170 = vst.msk [vmem:[#allocation3 + $0x2] ss:$8 sm:$0x3] %vm5194_vm0, %v5550_v4  ;;  %v2196_v16 = vrot.slane %v5550_v4, %v6634_v41  ;;  %v2192_v53 = vrot.slane %v5550_v4, %v6631_v27 }
 0x449   :  { %v2200_v31 = vpack.c.bf16 %v2196_v16, %v2196_v16  ;;  %v5559_v38 = vpack.c.bf16 %v2192_v53, %v2192_v53  ;;  %v6754_v16 = vld [vmem:[#allocation59_spill] sm:$0xff]  ;;  %v6755_v53 = vld [vmem:[#allocation61_spill] sm:$0xff] }
 0x44b   :  { %2233 = vmatprep.mubr.bf16.mxu0 %v2200_v31  ;;  %2274 = vmatprep.mubr.bf16.mxu1 %v2200_v31 }
 0x44c   :  { %2234 = vmatmul.mubr.bf16.vlgmr.msra.gmra.mxu0 %v5559_v38  ;;  %2275 = vmatmul.mubr.bf16.vlgmr.msra.gmra.mxu1 %v5559_v38 }
 0x44d   :  { %2284 = vmatpush1.bf16.msra.mxu0 %v5366_v42  ;;  %2315 = vmatprep.mubr.bf16.mxu0 %v2200_v31  ;;  %v6756_v31 = vld [vmem:[#allocation63_spill] sm:$0xff] }
 0x44e   :  { %2285 = vmatprep.subr.bf16.mxu0 %v5369_v7  ;;  %2437 = vmatpush1.bf16.msra.mxu1 %v5213_v52  ;;  %v5579_v52 = vld [vmem:[#allocation11 + $0xd0] ss:$24 sps:$4 sm:$0xff]  }
 0x44f   :  { %2438 = vmatprep.subr.bf16.mxu1 %v5216_v37  ;;  %v5582_v37 = vld [vmem:[#allocation11 + $0xa4] ss:$24 sps:$4 sm:$0xff]  }
 0x451   :  { %2286 = vmatpush1.bf16.msra.mxu0 %v5374_v11 }
 0x452   :  { %2287 = vmatprep.subr.bf16.mxu0 %v5377_v36  ;;  %2439 = vmatpush1.bf16.msra.mxu1 %v5221_v32  ;;  %v5587_v32 = vld [vmem:[#allocation11 + $0xa0] ss:$24 sps:$4 sm:$0xff]  }
 0x453   :  { %2440 = vmatprep.subr.bf16.mxu1 %v5224_v19  ;;  %v5590_v19 = vld [vmem:[#allocation11 + $0x74] ss:$24 sps:$4 sm:$0xff]  }
 0x455   :  { %2288 = vmatpush1.bf16.msra.mxu0 %v5571_v48 }
 0x456   :  { %2289 = vmatprep.subr.bf16.mxu0 %v5574_v35  ;;  %2441 = vmatpush1.bf16.msra.mxu1 %v5229_v6  ;;  %v5595_v6 = vld [vmem:[#allocation11 + $0x70] ss:$24 sps:$4 sm:$0xff]  }
 0x457   :  { %2442 = vmatprep.subr.bf16.mxu1 %v5232_v2  ;;  %v5598_v2 = vld [vmem:[#allocation11 + $0x44] ss:$24 sps:$4 sm:$0xff]  }
 0x459   :  { %2290 = vmatpush1.bf16.msra.mxu0 %v5579_v52 }
 0x45a   :  { %2291 = vmatprep.subr.bf16.mxu0 %v5582_v37  ;;  %2443 = vmatpush1.bf16.msra.mxu1 %v6698_v8  ;;  %v5603_v8 = vld [vmem:[#allocation11 + $0x40] ss:$24 sps:$4 sm:$0xff]  }
 0x45b   :  { %2444 = vmatprep.subr.bf16.mxu1 %v6699_v62  ;;  %v5606_v62 = vld [vmem:[#allocation11 + $0x14] ss:$24 sps:$4 sm:$0xff]  }
 0x45d   :  { %2292 = vmatpush1.bf16.msra.mxu0 %v5587_v32 }
 0x45e   :  { %2293 = vmatprep.subr.bf16.mxu0 %v5590_v19  ;;  %2445 = vmatpush1.bf16.msra.mxu1 %v6702_v40  ;;  %v5611_v40 = vld [vmem:[#allocation11 + $0x10] ss:$24 sps:$4 sm:$0xff]  }
 0x45f   :  { %2446 = vmatprep.subr.bf16.mxu1 %v6703_v13  ;;  %v5614_v13 = vld [vmem:[#allocation11 + $0x2e4] ss:$24 sps:$4 sm:$0xff]  }
 0x461   :  { %2294 = vmatpush1.bf16.msra.mxu0 %v5595_v6 }
 0x462   :  { %2295 = vmatprep.subr.bf16.mxu0 %v5598_v2  ;;  %2447 = vmatpush1.bf16.msra.mxu1 %v6706_v51  ;;  %v5622_v51 = vld [vmem:[#allocation11 + $0x2b4] ss:$24 sps:$4 sm:$0xff]  }
 0x463   :  { %2448 = vmatprep.subr.bf16.mxu1 %v5256_v50  ;;  %v5619_v50 = vld [vmem:[#allocation11 + $0x2e0] ss:$24 sps:$4 sm:$0xff]  }
 0x465   :  { %2296 = vmatpush1.bf16.msra.mxu0 %v5603_v8 }
 0x466   :  { %2297 = vmatprep.subr.bf16.mxu0 %v5606_v62  ;;  %2449 = vmatpush1.bf16.msra.mxu1 %v6709_v54  ;;  %v5627_v54 = vld [vmem:[#allocation11 + $0x2b0] ss:$24 sps:$4 sm:$0xff]  }
 0x467   :  { %2450 = vmatprep.subr.bf16.mxu1 %v6710_v39  ;;  %v5630_v39 = vld [vmem:[#allocation11 + $0x284] ss:$24 sps:$4 sm:$0xff]  }
 0x469   :  { %2298 = vmatpush1.bf16.msra.mxu0 %v5611_v40 }
 0x46a   :  { %2299 = vmatprep.subr.bf16.mxu0 %v5614_v13  ;;  %2451 = vmatpush1.bf16.msra.mxu1 %v6712_v17  ;;  %v5635_v17 = vld [vmem:[#allocation11 + $0x280] ss:$24 sps:$4 sm:$0xff]  }
 0x46b   :  { %2452 = vmatprep.subr.bf16.mxu1 %v5405_v0 }
 0x46d   :  { %2300 = vmatpush2.bf16.msra.mxu0 %v5619_v50 }
 0x46e   :  { %2301 = vmatprep.subr.bf16.mxu0 %v5622_v51  ;;  %2453 = vmatpush2.bf16.msra.mxu1 %v5410_v22 }
 0x46f   :  { %2454 = vmatprep.subr.bf16.mxu1 %v5413_v21 }
 0x471   :  { %2302 = vmatpush2.bf16.msra.mxu0 %v5627_v54 }
 0x472   :  { %2303 = vmatprep.subr.bf16.mxu0 %v5630_v39  ;;  %2455 = vmatpush2.bf16.msra.mxu1 %v5418_v12 }
 0x473   :  { %2456 = vmatprep.subr.bf16.mxu1 %v5421_v44 }
 0x475   :  { %2304 = vmatpush2.bf16.msra.mxu0 %v5635_v17 }
 0x476   :  { %2305 = vmatprep.subr.bf16.mxu0 %v5638_v28  ;;  %2457 = vmatpush2.bf16.msra.mxu1 %v5426_v25 }
 0x477   :  { %2458 = vmatprep.subr.bf16.mxu1 %v5429_v56 }
 0x479   :  { %2306 = vmatpush2.bf16.msra.mxu0 %v5643_v55 }
 0x47a   :  { %2307 = vmatprep.subr.bf16.mxu0 %v5646_v60  ;;  %2459 = vmatpush2.bf16.msra.mxu1 %v5434_v58 }
 0x47b   :  { %2460 = vmatprep.subr.bf16.mxu1 %v5437_v14 }
 0x47d   :  { %2308 = vmatpush2.bf16.msra.mxu0 %v5651_v18 }
 0x47e   :  { %2309 = vmatprep.subr.bf16.mxu0 %v5654_v24  ;;  %2461 = vmatpush2.bf16.msra.mxu1 %v5442_v46 }
 0x47f   :  { %2462 = vmatprep.subr.bf16.mxu1 %v5445_v9 }
 0x481   :  { %2310 = vmatpush2.bf16.msra.mxu0 %v5659_v59 }
 0x482   :  { %2311 = vmatprep.subr.bf16.mxu0 %v5662_v1  ;;  %2463 = vmatpush2.bf16.msra.mxu1 %v5450_v43 }
 0x483   :  { %2464 = vmatprep.subr.bf16.mxu1 %v5453_v45  ;;  %v2185_v45 = vld [vmem:[%s2184_s4] ss:$8 sm:$0xf] }
 0x485   :  { %2312 = vmatpush2.bf16.msra.mxu0 %v5667_v3 }
 0x486   :  { %2313 = vmatprep.subr.bf16.mxu0 %v5670_v57  ;;  %2465 = vmatpush2.bf16.msra.mxu1 %v5458_v47 }
 0x487   :  { %2466 = vmatprep.subr.bf16.mxu1 %v5461_v49  ;;  %v6757_v49 = vld [vmem:[#allocation65_spill] sm:$0xff] }
 0x489   :  { %2314 = vmatpush2.bf16.msra.mxu0 %v5675_v61  ;;  %v6758_v61 = vld [vmem:[#allocation67_spill] sm:$0xff] }
 0x48a   :  { %2477 = vmatprep.subr.bf16.mxu0 %v5465_v23  ;;  %2467 = vmatpush2.bf16.msra.mxu1 %v5468_v10  ;;  %v6759_v23 = vld [vmem:[#allocation69_spill] sm:$0xff]  ;;  %v6760_v10 = vld [vmem:[#allocation71_spill] sm:$0xff] }
 0x48b   :  { %2518 = vmatprep.subr.bf16.mxu1 %v6751_v63  ;;  %v6761_v63 = vld [vmem:[#allocation48_spill] sm:$0xff] }
 0x48c   :  { %2316 = vmatmul.mubr.bf16.vlgmr.msra.gmra.mxu0 %v5559_v38  ;;  %v6762_v38 = vld [vmem:[#allocation50_spill] sm:$0xff] }
 0x48d   :  { %2478 = vmatpush1.bf16.msra.mxu0 %v6752_v30  ;;  %v6763_v30 = vld [vmem:[#allocation52_spill] sm:$0xff] }
 0x48e   :  { %2479 = vmatprep.subr.bf16.mxu0 %v6753_v5  ;;  %v6764_v5 = vld [vmem:[#allocation54_spill] sm:$0xff] }
 0x491   :  { %2480 = vmatpush1.bf16.msra.mxu0 %v6754_v16  ;;  %v6765_v16 = vld [vmem:[#allocation56_spill] sm:$0xff] }
 0x492   :  { %2481 = vmatprep.subr.bf16.mxu0 %v6755_v53  ;;  %v6766_v53 = vld [vmem:[#allocation58_spill] sm:$0xff] }
 0x495   :  { %2482 = vmatpush1.bf16.msra.mxu0 %v6756_v31  ;;  %v5697_v31 = vld [vmem:[#allocation11 + $0x2dc] ss:$24 sps:$4 sm:$0xff]  }
 0x496   :  { %2483 = vmatprep.subr.bf16.mxu0 %v6757_v49  ;;  %6767 = vst [vmem:[#allocation24_spill] sm:$0xff] %v5697_v31 }
 0x499   :  { %2484 = vmatpush1.bf16.msra.mxu0 %v6758_v61  ;;  %v5700_v61 = vld [vmem:[#allocation11 + $0x2d8] ss:$24 sps:$4 sm:$0xff]  }
 0x49a   :  { %2485 = vmatprep.subr.bf16.mxu0 %v6759_v23  ;;  %6768 = vst [vmem:[#allocation30_spill] sm:$0xff] %v5700_v61 }
 0x49d   :  { %2486 = vmatpush1.bf16.msra.mxu0 %v6760_v10  ;;  %v5703_v10 = vld [vmem:[#allocation11 + $0x2ac] ss:$24 sps:$4 sm:$0xff]  }
 0x49e   :  { %2487 = vmatprep.subr.bf16.mxu0 %v6761_v63  ;;  %6769 = vst [vmem:[#allocation42_spill] sm:$0xff] %v5703_v10 }
 0x4a1   :  { %2488 = vmatpush1.bf16.msra.mxu0 %v6762_v38  ;;  %v5706_v38 = vld [vmem:[#allocation11 + $0x2a8] ss:$24 sps:$4 sm:$0xff]  }
 0x4a2   :  { %2489 = vmatprep.subr.bf16.mxu0 %v6763_v30  ;;  %6770 = vst [vmem:[#allocation43_spill] sm:$0xff] %v5706_v38 }
 0x4a5   :  { %2490 = vmatpush1.bf16.msra.mxu0 %v6764_v5  ;;  %v5709_v5 = vld [vmem:[#allocation11 + $0x27c] ss:$24 sps:$4 sm:$0xff]  }
 0x4a6   :  { %2491 = vmatprep.subr.bf16.mxu0 %v6765_v16  ;;  %6771 = vst [vmem:[#allocation31_spill] sm:$0xff] %v5709_v5 }
 0x4a9   :  { %2492 = vmatpush1.bf16.msra.mxu0 %v6766_v53  ;;  %v5712_v53 = vld [vmem:[#allocation11 + $0x278] ss:$24 sps:$4 sm:$0xff]  }
 0x4aa   :  { %2493 = vmatprep.subr.bf16.mxu0 %v5697_v31  ;;  %6772 = vst [vmem:[#allocation29_spill] sm:$0xff] %v5712_v53  ;;  %v5715_v31 = vld [vmem:[#allocation11 + $0x24c] ss:$24 sps:$4 sm:$0xff]  }
 0x4ab   :  { %6773 = vst [vmem:[#allocation44_spill] sm:$0xff] %v5715_v31 }
 0x4ad   :  { %2494 = vmatpush2.bf16.msra.mxu0 %v5700_v61  ;;  %v5718_v61 = vld [vmem:[#allocation11 + $0x248] ss:$24 sps:$4 sm:$0xff]  }
 0x4ae   :  { %2495 = vmatprep.subr.bf16.mxu0 %v5703_v10  ;;  %6774 = vst [vmem:[#allocation45_spill] sm:$0xff] %v5718_v61  ;;  %v5721_v10 = vld [vmem:[#allocation11 + $0x21c] ss:$24 sps:$4 sm:$0xff]  }
 0x4af   :  { %6775 = vst [vmem:[#allocation32_spill] sm:$0xff] %v5721_v10 }
 0x4b1   :  { %2496 = vmatpush2.bf16.msra.mxu0 %v5706_v38  ;;  %v5724_v38 = vld [vmem:[#allocation11 + $0x218] ss:$24 sps:$4 sm:$0xff]  }
 0x4b2   :  { %2497 = vmatprep.subr.bf16.mxu0 %v5709_v5  ;;  %6776 = vst [vmem:[#allocation46_spill] sm:$0xff] %v5724_v38  ;;  %v5727_v5 = vld [vmem:[#allocation11 + $0x1ec] ss:$24 sps:$4 sm:$0xff]  }
 0x4b3   :  { %6777 = vst [vmem:[#allocation47_spill] sm:$0xff] %v5727_v5 }
 0x4b5   :  { %2498 = vmatpush2.bf16.msra.mxu0 %v5712_v53  ;;  %v5730_v53 = vld [vmem:[#allocation11 + $0x1e8] ss:$24 sps:$4 sm:$0xff]  }
 0x4b6   :  { %2499 = vmatprep.subr.bf16.mxu0 %v5715_v31  ;;  %6778 = vst [vmem:[#allocation33_spill] sm:$0xff] %v5730_v53  ;;  %v5733_v31 = vld [vmem:[#allocation11 + $0x1bc] ss:$24 sps:$4 sm:$0xff]  }
 0x4b7   :  { %6779 = vst [vmem:[#allocation25_spill] sm:$0xff] %v5733_v31 }
 0x4b9   :  { %2500 = vmatpush2.bf16.msra.mxu0 %v5718_v61  ;;  %v5736_v61 = vld [vmem:[#allocation11 + $0x1b8] ss:$24 sps:$4 sm:$0xff]  }
 0x4ba   :  { %2501 = vmatprep.subr.bf16.mxu0 %v5721_v10  ;;  %6780 = vst [vmem:[#allocation51_spill] sm:$0xff] %v5736_v61  ;;  %v5739_v10 = vld [vmem:[#allocation11 + $0x18c] ss:$24 sps:$4 sm:$0xff]  }
 0x4bb   :  { %6781 = vst [vmem:[#allocation26_spill] sm:$0xff] %v5739_v10 }
 0x4bd   :  { %2502 = vmatpush2.bf16.msra.mxu0 %v5724_v38  ;;  %v5742_v38 = vld [vmem:[#allocation11 + $0x188] ss:$24 sps:$4 sm:$0xff]  }
 0x4be   :  { %2503 = vmatprep.subr.bf16.mxu0 %v5727_v5  ;;  %6782 = vst [vmem:[#allocation70_spill] sm:$0xff] %v5742_v38  ;;  %v6783_v5 = vld [vmem:[#allocation34_spill] sm:$0xff] }
 0x4c1   :  { %2504 = vmatpush2.bf16.msra.mxu0 %v5730_v53 }
 0x4c2   :  { %2505 = vmatprep.subr.bf16.mxu0 %v5733_v31 }
 0x4c5   :  { %2506 = vmatpush2.bf16.msra.mxu0 %v5736_v61 }
 0x4c6   :  { %2507 = vmatprep.subr.bf16.mxu0 %v5739_v10  ;;  %v6784_v10 = vld [vmem:[#allocation28_spill] sm:$0xff] }
 0x4c9   :  { %2508 = vmatpush2.bf16.msra.mxu0 %v5742_v38  ;;  %v6785_v38 = vld [vmem:[#allocation27_spill] sm:$0xff] }
 0x4ca   :  { %2671 = vmatprep.subr.bf16.mxu0 %v6783_v5 }
 0x50c   :  { %v2235_v53 = vpop.f32.mrf.mxu0  ;;  %v2276_v16 = vpop.f32.mrf.mxu1 }
 0x50d   :  { %v2236_v57 = vadd.f32 %v2235_v53, %v6785_v38  ;;  %v2277_v43 = vadd.f32 %v2276_v16, %v5174_v29 }
 0x50e   :  { %v2237_v30 = vpop.f32.mrf.mxu0  ;;  %v2278_v63 = vpop.f32.mrf.mxu1 }
 0x50f   :  { %v2238_v47 = vadd.f32 %v2237_v30, %v6784_v10 }
 0x510   :  { %v2239_v31 = vpop.f32.mrf.mxu0  ;;  %v2280_v23 = vpop.f32.mrf.mxu1 }
 0x511   :  { %v2326_v5 = vcombine.low %v2236_v57, %v2238_v47  ;;  %v2186_v31 = vld [vmem:[%s2184_s4] ss:$8 sm:$0x30]  ;;  %s3554_s4 = sshll.u32 %s4678_s22, 4  ;;  %s3555_s4 = int_to_ptr.vmem [resolvable:$true] %s3554_s4 }
 0x512   :  { %v2240_v61 = vpop.f32.mrf.mxu0  ;;  %v2281_v49 = vpop.f32.mrf.mxu1  ;;  %s4614_s7 = scalar_lea.vmem %s3555_s4, 32  ;;  %p4619_p0 = scmp.lt.s32.totalorder %s3555_s4, %s3555_s4 }
 0x513   :  { %v2333_v3 = vrot.slane %v2326_v5, %v5168_v34  ;;  %v2187_v61 = vor.u32 %v2186_v31, %v2185_v45  ;;  %v2279_v49 = vadd.f32 %v2278_v63, %v5178_v26  ;;  %p4615_p13 = scmp.ne.s32.totalorder %s3555_s4, %s4614_s7  ;;  %p4620_p1 = scmp.lt.s32.totalorder %s4614_s7, %s4614_s7 }
 0x515   :  { %v2340_v23 = vrot.slane %v2333_v3, %v5168_v34  ;;  %v2354_v30 = vcombine.low %v2277_v43, %v2279_v49  ;;  %v2350_v57 = vrot.slane %v2187_v61, 2  ;;  %p4621_p2 = por %p4620_p1, %p4619_p0 }
 0x517   :  { %v2342_v1 = vadd.f32 %v2340_v23, %v2187_v61  ;;  %v2361_v53 = vrot.slane %v2354_v30, %v5168_v34  ;;  %p4622_p3 = pnand %p4621_p2, %p4615_p13 }
 0x519   :  { %v3819_v10 = vmul.f32 -1.442695, %v2342_v1  ;;  %v2368_v47 = vrot.slane %v2361_v53, %v5168_v34 }
 0x51b   :  { %4260 = vpow2.f32 %v3819_v10  ;;  %v2370_v5 = vadd.f32 %v2368_v47, %v2350_v57 }
 0x51d   :  { %v3820_v38 = vmul.f32 -1.442695, %v2370_v5 }
 0x51f   :  { %4262 = vpow2.f32 %v3820_v38 }
 0x528   :  { %v4261_v59 = vpop.eup %4260 }
 0x529   :  { %v2346_v9 = vadd.f32 1.0, %v4261_v59  ;;  %v2396_v59 = vrot.slane %v2187_v61, 4 }
 0x52b   :  { %4264 = vrcp.f32 %v2346_v9 }
 0x52c   :  { %v4263_v43 = vpop.eup %4262 }
 0x52d   :  { %v2374_v10 = vadd.f32 1.0, %v4263_v43 }
 0x52f   :  { %4266 = vrcp.f32 %v2374_v10  ;;  %v5793_v10 = vld [vmem:[#allocation11 + $0xc4] ss:$24 sps:$4 sm:$0xff]  }
 0x538   :  { %v4265_v53 = vpop.eup %4264 }
 0x53c   :  { %v4267_v47 = vpop.eup %4266 }
 0x53d   :  { %v2400_v57 = vsub.f32 1.0, %v4267_v47 }
 0x54c   :  { %v2317_v45 = vpop.f32.mrf.mxu0 }
 0x54d   :  { %v2318_v63 = vadd.f32 %v2317_v45, %v5182_v15 }
 0x54e   :  { %v2319_v3 = vpop.f32.mrf.mxu0 }
 0x54f   :  { %v2320_v16 = vadd.f32 %v2319_v3, %v5184_v20  ;;  %v2402_v3 = vmul.f32 %v4267_v47, %v5550_v4  ;;  %v5774_v4 = vld [vmem:[#allocation11 + $0x150] ss:$24 sps:$4 sm:$0xff]   ;;  %v5830_v47 = vld [vmem:[#allocation11] ss:$24 sps:$4 sm:$0xff]  }
 0x550   :  { %v2321_v1 = vpop.f32.mrf.mxu0 }
 0x551   :  { %v2379_v31 = vcombine.low %v2318_v63, %v2320_v16 }
 0x552   :  { %v2322_v23 = vpop.f32.mrf.mxu0 }
 0x553   :  { %v2386_v49 = vrot.slane %v2379_v31, %v5168_v34  ;;  %v5777_v31 = vld [vmem:[#allocation11 + $0x124] ss:$24 sps:$4 sm:$0xff]   ;;  %v5782_v23 = vld [vmem:[#allocation11 + $0x120] ss:$24 sps:$4 sm:$0xff]  }
 0x555   :  { %v2393_v30 = vrot.slane %v2386_v49, %v5168_v34  ;;  %v5806_v49 = vld [vmem:[#allocation11 + $0x90] ss:$24 sps:$4 sm:$0xff]  }
 0x557   :  { %v2395_v38 = vmul.f32 %v4265_v53, %v2393_v30  ;;  %v5809_v30 = vld [vmem:[#allocation11 + $0x64] ss:$24 sps:$4 sm:$0xff]   ;;  %v5814_v53 = vld [vmem:[#allocation11 + $0x60] ss:$24 sps:$4 sm:$0xff]  }
 0x559   :  { %v2398_v9 = vadd.f32 %v2396_v59, %v2395_v38  ;;  %v5817_v38 = vld [vmem:[#allocation11 + $0x34] ss:$24 sps:$4 sm:$0xff]   ;;  %v5822_v59 = vld [vmem:[#allocation11 + $0x30] ss:$24 sps:$4 sm:$0xff]  }
 0x55b   :  { %4268 = vtanh.f32 %v2398_v9  ;;  %v5825_v9 = vld [vmem:[#allocation11 + $0x4] ss:$24 sps:$4 sm:$0xff]  }
 0x568   :  { %v4269_v5 = vpop.eup %4268 }
 0x569   :  { %v2401_v45 = vmul.f32 %v4269_v5, %v2400_v57  ;;  %v6795_v57 = vld [vmem:[#allocation41_spill] sm:$0xff] }
 0x56a   :  { %v6797_v5 = vld [vmem:[#allocation49_spill] sm:$0xff] }
 0x56b   :  { %v5759_v1 = vadd.f32 %v2402_v3, %v2401_v45  ;;  %v6798_v45 = vld [vmem:[#allocation53_spill] sm:$0xff]  ;;  %v6799_v3 = vld [vmem:[#allocation55_spill] sm:$0xff] }
 0x56d   :  { %2405 = vst.msk [vmem:[#allocation3 + $0x3] ss:$8 sm:$0x3] %vm5194_vm0, %v5759_v1  ;;  %v2431_v63 = vrot.slane %v5759_v1, %v6634_v41  ;;  %v2427_v61 = vrot.slane %v5759_v1, %v6631_v27 }
 0x56f   :  { %v2435_v16 = vpack.c.bf16 %v2431_v63, %v2431_v63  ;;  %v5768_v43 = vpack.c.bf16 %v2427_v61, %v2427_v61  ;;  %v6800_v63 = vld [vmem:[#allocation57_spill] sm:$0xff]  ;;  %v6801_v61 = vld [vmem:[#allocation59_spill] sm:$0xff] }
 0x571   :  { %2468 = vmatprep.mubr.bf16.mxu1 %v2435_v16  ;;  %2509 = vmatprep.mubr.bf16.mxu0 %v2435_v16 }
 0x572   :  { %2469 = vmatmul.mubr.bf16.vlgmr.msra.gmra.mxu1 %v5768_v43  ;;  %2510 = vmatmul.mubr.bf16.vlgmr.msra.gmra.mxu0 %v5768_v43 }
 0x573   :  { %2519 = vmatpush1.bf16.msra.mxu1 %v5366_v42  ;;  %2550 = vmatprep.mubr.bf16.mxu1 %v2435_v16  ;;  %v5785_v42 = vld [vmem:[#allocation11 + $0xf4] ss:$24 sps:$4 sm:$0xff]   ;;  %v6802_v16 = vld [vmem:[#allocation61_spill] sm:$0xff] }
 0x574   :  { %2520 = vmatprep.subr.bf16.mxu1 %v5369_v7  ;;  %2672 = vmatpush1.bf16.msra.mxu0 %v5774_v4  ;;  %v5790_v7 = vld [vmem:[#allocation11 + $0xf0] ss:$24 sps:$4 sm:$0xff]  }
 0x575   :  { %2673 = vmatprep.subr.bf16.mxu0 %v5777_v31 }
 0x577   :  { %2521 = vmatpush1.bf16.msra.mxu1 %v5374_v11  ;;  %v5798_v11 = vld [vmem:[#allocation11 + $0xc0] ss:$24 sps:$4 sm:$0xff]  }
 0x578   :  { %2522 = vmatprep.subr.bf16.mxu1 %v5377_v36  ;;  %2674 = vmatpush1.bf16.msra.mxu0 %v5782_v23  ;;  %v5801_v36 = vld [vmem:[#allocation11 + $0x94] ss:$24 sps:$4 sm:$0xff]  }
 0x579   :  { %2675 = vmatprep.subr.bf16.mxu0 %v5785_v42 }
 0x57b   :  { %2523 = vmatpush1.bf16.msra.mxu1 %v5571_v48 }
 0x57c   :  { %2524 = vmatprep.subr.bf16.mxu1 %v5574_v35  ;;  %2676 = vmatpush1.bf16.msra.mxu0 %v5790_v7 }
 0x57d   :  { %2677 = vmatprep.subr.bf16.mxu0 %v5793_v10 }
 0x57f   :  { %2525 = vmatpush1.bf16.msra.mxu1 %v5579_v52 }
 0x580   :  { %2526 = vmatprep.subr.bf16.mxu1 %v5582_v37  ;;  %2678 = vmatpush1.bf16.msra.mxu0 %v5798_v11 }
 0x581   :  { %2679 = vmatprep.subr.bf16.mxu0 %v5801_v36 }
 0x583   :  { %2527 = vmatpush1.bf16.msra.mxu1 %v5587_v32 }
 0x584   :  { %2528 = vmatprep.subr.bf16.mxu1 %v5590_v19  ;;  %2680 = vmatpush1.bf16.msra.mxu0 %v5806_v49 }
 0x585   :  { %2681 = vmatprep.subr.bf16.mxu0 %v5809_v30 }
 0x587   :  { %2529 = vmatpush1.bf16.msra.mxu1 %v5595_v6 }
 0x588   :  { %2530 = vmatprep.subr.bf16.mxu1 %v5598_v2  ;;  %2682 = vmatpush1.bf16.msra.mxu0 %v5814_v53 }
 0x589   :  { %2683 = vmatprep.subr.bf16.mxu0 %v5817_v38 }
 0x58b   :  { %2531 = vmatpush1.bf16.msra.mxu1 %v5603_v8 }
 0x58c   :  { %2532 = vmatprep.subr.bf16.mxu1 %v5606_v62  ;;  %2684 = vmatpush1.bf16.msra.mxu0 %v5822_v59 }
 0x58d   :  { %2685 = vmatprep.subr.bf16.mxu0 %v5825_v9 }
 0x58f   :  { %2533 = vmatpush1.bf16.msra.mxu1 %v5611_v40 }
 0x590   :  { %2534 = vmatprep.subr.bf16.mxu1 %v5614_v13  ;;  %2686 = vmatpush1.bf16.msra.mxu0 %v5830_v47 }
 0x591   :  { %2687 = vmatprep.subr.bf16.mxu0 %v5405_v0  ;;  %v6786_v0 = vld [vmem:[#allocation35_spill] sm:$0xff] }
 0x593   :  { %2535 = vmatpush2.bf16.msra.mxu1 %v5619_v50 }
 0x594   :  { %2536 = vmatprep.subr.bf16.mxu1 %v5622_v51  ;;  %2688 = vmatpush2.bf16.msra.mxu0 %v5410_v22  ;;  %v6787_v22 = vld [vmem:[#allocation62_spill] sm:$0xff] }
 0x595   :  { %2689 = vmatprep.subr.bf16.mxu0 %v5413_v21  ;;  %v6788_v21 = vld [vmem:[#allocation64_spill] sm:$0xff] }
 0x597   :  { %2537 = vmatpush2.bf16.msra.mxu1 %v5627_v54 }
 0x598   :  { %2538 = vmatprep.subr.bf16.mxu1 %v5630_v39  ;;  %2690 = vmatpush2.bf16.msra.mxu0 %v5418_v12  ;;  %v6789_v12 = vld [vmem:[#allocation36_spill] sm:$0xff] }
 0x599   :  { %2691 = vmatprep.subr.bf16.mxu0 %v5421_v44  ;;  %v6790_v44 = vld [vmem:[#allocation37_spill] sm:$0xff] }
 0x59b   :  { %2539 = vmatpush2.bf16.msra.mxu1 %v5635_v17 }
 0x59c   :  { %2540 = vmatprep.subr.bf16.mxu1 %v5638_v28  ;;  %2692 = vmatpush2.bf16.msra.mxu0 %v5426_v25  ;;  %v6791_v25 = vld [vmem:[#allocation66_spill] sm:$0xff] }
 0x59d   :  { %2693 = vmatprep.subr.bf16.mxu0 %v5429_v56  ;;  %v6792_v56 = vld [vmem:[#allocation68_spill] sm:$0xff] }
 0x59f   :  { %2541 = vmatpush2.bf16.msra.mxu1 %v5643_v55 }
 0x5a0   :  { %2542 = vmatprep.subr.bf16.mxu1 %v5646_v60  ;;  %2694 = vmatpush2.bf16.msra.mxu0 %v5434_v58  ;;  %v6793_v58 = vld [vmem:[#allocation38_spill] sm:$0xff] }
 0x5a1   :  { %2695 = vmatprep.subr.bf16.mxu0 %v5437_v14  ;;  %v6794_v14 = vld [vmem:[#allocation39_spill] sm:$0xff] }
 0x5a3   :  { %2543 = vmatpush2.bf16.msra.mxu1 %v5651_v18 }
 0x5a4   :  { %2544 = vmatprep.subr.bf16.mxu1 %v5654_v24  ;;  %2696 = vmatpush2.bf16.msra.mxu0 %v5442_v46  ;;  %v6796_v46 = vld [vmem:[#allocation40_spill] sm:$0xff] }
 0x5a5   :  { %2697 = vmatprep.subr.bf16.mxu0 %v6786_v0  ;;  %v6803_v0 = vld [vmem:[#allocation63_spill] sm:$0xff] }
 0x5a7   :  { %2545 = vmatpush2.bf16.msra.mxu1 %v6787_v22 }
 0x5a8   :  { %2546 = vmatprep.subr.bf16.mxu1 %v6788_v21  ;;  %2698 = vmatpush2.bf16.msra.mxu0 %v6789_v12  ;;  %v6804_v12 = vld [vmem:[#allocation65_spill] sm:$0xff] }
 0x5a9   :  { %2699 = vmatprep.subr.bf16.mxu0 %v6790_v44  ;;  %v6805_v44 = vld [vmem:[#allocation67_spill] sm:$0xff] }
 0x5ab   :  { %2547 = vmatpush2.bf16.msra.mxu1 %v6791_v25 }
 0x5ac   :  { %2548 = vmatprep.subr.bf16.mxu1 %v6792_v56  ;;  %2700 = vmatpush2.bf16.msra.mxu0 %v6793_v58  ;;  %v6806_v58 = vld [vmem:[#allocation69_spill] sm:$0xff] }
 0x5ad   :  { %2701 = vmatprep.subr.bf16.mxu0 %v6794_v14  ;;  %v6807_v14 = vld [vmem:[#allocation71_spill] sm:$0xff] }
 0x5ae   :  { %v2420_v56 = vld [vmem:[%s2419_s23] ss:$8 sm:$0xf] }
 0x5af   :  { %2549 = vmatpush2.bf16.msra.mxu1 %v6795_v57 }
 0x5b0   :  { %2712 = vmatprep.subr.bf16.mxu1 %v6796_v46  ;;  %2702 = vmatpush2.bf16.msra.mxu0 %v6797_v5  ;;  %v6808_v46 = vld [vmem:[#allocation48_spill] sm:$0xff] }
 0x5b1   :  { %2753 = vmatprep.subr.bf16.mxu0 %v6798_v45  ;;  %v6810_v5 = vld [vmem:[#allocation52_spill] sm:$0xff]  ;;  %v6811_v45 = vld [vmem:[#allocation54_spill] sm:$0xff] }
 0x5b2   :  { %2551 = vmatmul.mubr.bf16.vlgmr.msra.gmra.mxu1 %v5768_v43  ;;  %v6809_v43 = vld [vmem:[#allocation50_spill] sm:$0xff] }
 0x5b3   :  { %2713 = vmatpush1.bf16.msra.mxu1 %v6799_v3  ;;  %v6812_v3 = vld [vmem:[#allocation56_spill] sm:$0xff] }
 0x5b4   :  { %2714 = vmatprep.subr.bf16.mxu1 %v6800_v63  ;;  %v6813_v63 = vld [vmem:[#allocation58_spill] sm:$0xff] }
 0x5b7   :  { %2715 = vmatpush1.bf16.msra.mxu1 %v6801_v61  ;;  %v6814_v61 = vld [vmem:[#allocation24_spill] sm:$0xff] }
 0x5b8   :  { %2716 = vmatprep.subr.bf16.mxu1 %v6802_v16  ;;  %v6815_v16 = vld [vmem:[#allocation30_spill] sm:$0xff] }
 0x5bb   :  { %2717 = vmatpush1.bf16.msra.mxu1 %v6803_v0  ;;  %v6816_v0 = vld [vmem:[#allocation42_spill] sm:$0xff] }
 0x5bc   :  { %2718 = vmatprep.subr.bf16.mxu1 %v6804_v12  ;;  %v6817_v12 = vld [vmem:[#allocation43_spill] sm:$0xff] }
 0x5bf   :  { %2719 = vmatpush1.bf16.msra.mxu1 %v6805_v44  ;;  %v6818_v44 = vld [vmem:[#allocation31_spill] sm:$0xff] }
 0x5c0   :  { %2720 = vmatprep.subr.bf16.mxu1 %v6806_v58  ;;  %v6819_v58 = vld [vmem:[#allocation29_spill] sm:$0xff] }
 0x5c3   :  { %2721 = vmatpush1.bf16.msra.mxu1 %v6807_v14  ;;  %v6820_v14 = vld [vmem:[#allocation44_spill] sm:$0xff] }
 0x5c4   :  { %2722 = vmatprep.subr.bf16.mxu1 %v6808_v46  ;;  %v6821_v46 = vld [vmem:[#allocation45_spill] sm:$0xff] }
 0x5c7   :  { %2723 = vmatpush1.bf16.msra.mxu1 %v6809_v43  ;;  %v6822_v43 = vld [vmem:[#allocation32_spill] sm:$0xff] }
 0x5c8   :  { %2724 = vmatprep.subr.bf16.mxu1 %v6810_v5  ;;  %v6823_v5 = vld [vmem:[#allocation46_spill] sm:$0xff] }
 0x5cb   :  { %2725 = vmatpush1.bf16.msra.mxu1 %v6811_v45  ;;  %v6824_v45 = vld [vmem:[#allocation47_spill] sm:$0xff] }
 0x5cc   :  { %2726 = vmatprep.subr.bf16.mxu1 %v6812_v3  ;;  %v6825_v3 = vld [vmem:[#allocation33_spill] sm:$0xff] }
 0x5cf   :  { %2727 = vmatpush1.bf16.msra.mxu1 %v6813_v63  ;;  %v6826_v63 = vld [vmem:[#allocation25_spill] sm:$0xff] }
 0x5d0   :  { %2728 = vmatprep.subr.bf16.mxu1 %v6814_v61 }
 0x5d3   :  { %2729 = vmatpush2.bf16.msra.mxu1 %v6815_v16 }
 0x5d4   :  { %2730 = vmatprep.subr.bf16.mxu1 %v6816_v0  ;;  %v6827_v0 = vld [vmem:[#allocation51_spill] sm:$0xff] }
 0x5d7   :  { %2731 = vmatpush2.bf16.msra.mxu1 %v6817_v12  ;;  %v6828_v12 = vld [vmem:[#allocation26_spill] sm:$0xff] }
 0x5d8   :  { %2732 = vmatprep.subr.bf16.mxu1 %v6818_v44  ;;  %v6829_v44 = vld [vmem:[#allocation70_spill] sm:$0xff] }
 0x5db   :  { %2733 = vmatpush2.bf16.msra.mxu1 %v6819_v58  ;;  %v5898_v58 = vld [vmem:[#allocation11 + $0x154] ss:$24 sps:$4 sm:$0xff]  }
 0x5dc   :  { %2734 = vmatprep.subr.bf16.mxu1 %v6820_v14  ;;  %6830 = vst [vmem:[#allocation72_spill] sm:$0xff] %v5898_v58 }
 0x5df   :  { %2735 = vmatpush2.bf16.msra.mxu1 %v6821_v46 }
 0x5e0   :  { %2736 = vmatprep.subr.bf16.mxu1 %v6822_v43 }
 0x5e3   :  { %2737 = vmatpush2.bf16.msra.mxu1 %v6823_v5 }
 0x5e4   :  { %2738 = vmatprep.subr.bf16.mxu1 %v6824_v45 }
 0x5e7   :  { %2739 = vmatpush2.bf16.msra.mxu1 %v6825_v3 }
 0x5e8   :  { %2740 = vmatprep.subr.bf16.mxu1 %v6826_v63 }
 0x5eb   :  { %2741 = vmatpush2.bf16.msra.mxu1 %v6827_v0  ;;  %v6832_v0 = vld [vmem:[#allocation27_spill] sm:$0xff] }
 0x5ec   :  { %2742 = vmatprep.subr.bf16.mxu1 %v6828_v12  ;;  %v6831_v12 = vld [vmem:[#allocation28_spill] sm:$0xff] }
 0x5ef   :  { %2743 = vmatpush2.bf16.msra.mxu1 %v6829_v44 }
 0x5f0   :  { %2906 = vmatprep.subr.bf16.mxu1 %v5898_v58 }
 0x632   :  { %v2470_v43 = vpop.f32.mrf.mxu1  ;;  %v2511_v46 = vpop.f32.mrf.mxu0 }
 0x633   :  { %v2471_v61 = vadd.f32 %v2470_v43, %v6832_v0  ;;  %v2512_v25 = vadd.f32 %v2511_v46, %v5174_v29 }
 0x634   :  { %v2472_v5 = vpop.f32.mrf.mxu1  ;;  %v2513_v14 = vpop.f32.mrf.mxu0 }
 0x635   :  { %v2473_v44 = vadd.f32 %v2472_v5, %v6831_v12 }
 0x636   :  { %v2474_v45 = vpop.f32.mrf.mxu1  ;;  %v2515_v3 = vpop.f32.mrf.mxu0 }
 0x637   :  { %v2561_v58 = vcombine.low %v2471_v61, %v2473_v44  ;;  %v2421_v45 = vld [vmem:[%s2419_s23] ss:$8 sm:$0x30] }
 0x638   :  { %v2475_v63 = vpop.f32.mrf.mxu1  ;;  %v2516_v16 = vpop.f32.mrf.mxu0 }
 0x639   :  { %v2568_v57 = vrot.slane %v2561_v58, %v5168_v34  ;;  %v2422_v63 = vor.u32 %v2421_v45, %v2420_v56  ;;  %v2514_v16 = vadd.f32 %v2513_v14, %v5178_v26 }
 0x63b   :  { %v2575_v3 = vrot.slane %v2568_v57, %v5168_v34  ;;  %v2589_v5 = vcombine.low %v2512_v25, %v2514_v16  ;;  %v2585_v44 = vrot.slane %v2422_v63, 2 }
 0x63d   :  { %v2577_v21 = vadd.f32 %v2575_v3, %v2422_v63  ;;  %v2596_v43 = vrot.slane %v2589_v5, %v5168_v34 }
 0x63f   :  { %v3828_v12 = vmul.f32 -1.442695, %v2577_v21  ;;  %v2603_v61 = vrot.slane %v2596_v43, %v5168_v34 }
 0x641   :  { %4270 = vpow2.f32 %v3828_v12  ;;  %v2605_v58 = vadd.f32 %v2603_v61, %v2585_v44 }
 0x643   :  { %v3829_v0 = vmul.f32 -1.442695, %v2605_v58 }
 0x645   :  { %4272 = vpow2.f32 %v3829_v0 }
 0x64e   :  { %v4271_v22 = vpop.eup %4270 }
 0x64f   :  { %v2581_v24 = vadd.f32 1.0, %v4271_v22  ;;  %v2631_v22 = vrot.slane %v2422_v63, 4 }
 0x651   :  { %4274 = vrcp.f32 %v2581_v24 }
 0x652   :  { %v4273_v25 = vpop.eup %4272 }
 0x653   :  { %v2609_v12 = vadd.f32 1.0, %v4273_v25 }
 0x655   :  { %4276 = vrcp.f32 %v2609_v12  ;;  %v5938_v12 = vld [vmem:[#allocation11 + $0x104] ss:$24 sps:$4 sm:$0xff]  }
 0x65e   :  { %v4275_v43 = vpop.eup %4274 }
 0x662   :  { %v4277_v61 = vpop.eup %4276 }
 0x663   :  { %v2635_v44 = vsub.f32 1.0, %v4277_v61 }
 0x672   :  { %v2552_v56 = vpop.f32.mrf.mxu1 }
 0x673   :  { %v2553_v14 = vadd.f32 %v2552_v56, %v5182_v15 }
 0x674   :  { %v2554_v57 = vpop.f32.mrf.mxu1 }
 0x675   :  { %v2555_v46 = vadd.f32 %v2554_v57, %v5184_v20  ;;  %v2637_v57 = vmul.f32 %v4277_v61, %v5759_v1  ;;  %v5927_v1 = vld [vmem:[#allocation11 + $0x160] ss:$24 sps:$4 sm:$0xff]   ;;  %v6045_v61 = vld [vmem:[#allocation11 + $0xfc] ss:$24 sps:$4 sm:$0xff]  }
 0x676   :  { %v2556_v21 = vpop.f32.mrf.mxu1  ;;  %6843 = vst [vmem:[#allocation34_spill] sm:$0xff] %v6045_v61 }
 0x677   :  { %v2614_v45 = vcombine.low %v2553_v14, %v2555_v46 }
 0x678   :  { %v2557_v3 = vpop.f32.mrf.mxu1 }
 0x679   :  { %v2621_v16 = vrot.slane %v2614_v45, %v5168_v34  ;;  %v5930_v45 = vld [vmem:[#allocation11 + $0x134] ss:$24 sps:$4 sm:$0xff]   ;;  %v5935_v3 = vld [vmem:[#allocation11 + $0x130] ss:$24 sps:$4 sm:$0xff]  }
 0x67b   :  { %v2628_v5 = vrot.slane %v2621_v16, %v5168_v34  ;;  %v6026_v16 = vld [vmem:[#allocation11 + $0x15c] ss:$24 sps:$4 sm:$0xff]  }
 0x67d   :  { %v2630_v0 = vmul.f32 %v4275_v43, %v2628_v5  ;;  %v6029_v5 = vld [vmem:[#allocation11 + $0x180] ss:$24 sps:$4 sm:$0xff]   ;;  %v6032_v43 = vld [vmem:[#allocation11 + $0x164] ss:$24 sps:$4 sm:$0xff]  }
 0x67e   :  { %6839 = vst [vmem:[#allocation73_spill] sm:$0xff] %v6032_v43 }
 0x67f   :  { %v2633_v24 = vadd.f32 %v2631_v22, %v2630_v0  ;;  %v6036_v0 = vld [vmem:[#allocation11 + $0x158] ss:$24 sps:$4 sm:$0xff]   ;;  %v6039_v22 = vld [vmem:[#allocation11 + $0x12c] ss:$24 sps:$4 sm:$0xff]  }
 0x680   :  { %6840 = vst [vmem:[#allocation74_spill] sm:$0xff] %v6036_v0  ;;  %6841 = vst [vmem:[#allocation75_spill] sm:$0xff] %v6039_v22 }
 0x681   :  { %4278 = vtanh.f32 %v2633_v24  ;;  %v6042_v24 = vld [vmem:[#allocation11 + $0x128] ss:$24 sps:$4 sm:$0xff]  }
 0x682   :  { %6842 = vst [vmem:[#allocation76_spill] sm:$0xff] %v6042_v24 }
 0x68e   :  { %v4279_v58 = vpop.eup %4278 }
 0x68f   :  { %v2636_v56 = vmul.f32 %v4279_v58, %v2635_v44  ;;  %v6048_v44 = vld [vmem:[#allocation11 + $0xf8] ss:$24 sps:$4 sm:$0xff]   ;;  %v6051_v58 = vld [vmem:[#allocation11 + $0xcc] ss:$24 sps:$4 sm:$0xff]  }
 0x690   :  { %6844 = vst [vmem:[#allocation35_spill] sm:$0xff] %v6048_v44  ;;  %6845 = vst [vmem:[#allocation36_spill] sm:$0xff] %v6051_v58 }
 0x691   :  { %v5914_v21 = vadd.f32 %v2637_v57, %v2636_v56  ;;  %v6054_v56 = vld [vmem:[#allocation11 + $0xc8] ss:$24 sps:$4 sm:$0xff]   ;;  %v6057_v57 = vld [vmem:[#allocation11 + $0x9c] ss:$24 sps:$4 sm:$0xff]  }
 0x692   :  { %6846 = vst [vmem:[#allocation37_spill] sm:$0xff] %v6054_v56  ;;  %6847 = vst [vmem:[#allocation38_spill] sm:$0xff] %v6057_v57 }
 0x693   :  { %2640 = vst.msk [vmem:[#allocation3 + $0x4] ss:$8 sm:$0x3] %vm5194_vm0, %v5914_v21  ;;  %v2666_v14 = vrot.slane %v5914_v21, %v6634_v41  ;;  %v2662_v63 = vrot.slane %v5914_v21, %v6631_v27 }
 0x695   :  { %v2670_v46 = vpack.c.bf16 %v2666_v14, %v2666_v14  ;;  %v5923_v25 = vpack.c.bf16 %v2662_v63, %v2662_v63  ;;  %v6060_v14 = vld [vmem:[#allocation11 + $0x98] ss:$24 sps:$4 sm:$0xff]   ;;  %v6063_v63 = vld [vmem:[#allocation11 + $0x6c] ss:$24 sps:$4 sm:$0xff]  }
 0x696   :  { %6848 = vst [vmem:[#allocation39_spill] sm:$0xff] %v6060_v14  ;;  %6849 = vst [vmem:[#allocation40_spill] sm:$0xff] %v6063_v63 }
 0x697   :  { %2703 = vmatprep.mubr.bf16.mxu0 %v2670_v46  ;;  %2744 = vmatprep.mubr.bf16.mxu1 %v2670_v46 }
 0x698   :  { %2704 = vmatmul.mubr.bf16.vlgmr.msra.gmra.mxu0 %v5923_v25  ;;  %2745 = vmatmul.mubr.bf16.vlgmr.msra.gmra.mxu1 %v5923_v25 }
 0x699   :  { %2754 = vmatpush1.bf16.msra.mxu0 %v5927_v1  ;;  %2785 = vmatprep.mubr.bf16.mxu0 %v2670_v46  ;;  %v6066_v46 = vld [vmem:[#allocation11 + $0x68] ss:$24 sps:$4 sm:$0xff]  }
 0x69a   :  { %2755 = vmatprep.subr.bf16.mxu0 %v5930_v45  ;;  %2907 = vmatpush1.bf16.msra.mxu1 %v5774_v4  ;;  %6850 = vst [vmem:[#allocation49_spill] sm:$0xff] %v6066_v46 }
 0x69b   :  { %2908 = vmatprep.subr.bf16.mxu1 %v5777_v31 }
 0x69d   :  { %2756 = vmatpush1.bf16.msra.mxu0 %v5935_v3 }
 0x69e   :  { %2757 = vmatprep.subr.bf16.mxu0 %v5938_v12  ;;  %2909 = vmatpush1.bf16.msra.mxu1 %v5782_v23 }
 0x69f   :  { %2910 = vmatprep.subr.bf16.mxu1 %v5785_v42 }
 0x6a1   :  { %2758 = vmatpush1.bf16.msra.mxu0 %v5571_v48  ;;  %v5966_v48 = vld [vmem:[#allocation11 + $0x2d4] ss:$24 sps:$4 sm:$0xff]  }
 0x6a2   :  { %2759 = vmatprep.subr.bf16.mxu0 %v5574_v35  ;;  %2911 = vmatpush1.bf16.msra.mxu1 %v5790_v7  ;;  %v5971_v35 = vld [vmem:[#allocation11 + $0x2d0] ss:$24 sps:$4 sm:$0xff]  }
 0x6a3   :  { %2912 = vmatprep.subr.bf16.mxu1 %v5793_v10 }
 0x6a5   :  { %2760 = vmatpush1.bf16.msra.mxu0 %v5579_v52  ;;  %v5974_v52 = vld [vmem:[#allocation11 + $0x2a4] ss:$24 sps:$4 sm:$0xff]  }
 0x6a6   :  { %2761 = vmatprep.subr.bf16.mxu0 %v5582_v37  ;;  %2913 = vmatpush1.bf16.msra.mxu1 %v5798_v11  ;;  %v5979_v37 = vld [vmem:[#allocation11 + $0x2a0] ss:$24 sps:$4 sm:$0xff]  }
 0x6a7   :  { %2914 = vmatprep.subr.bf16.mxu1 %v5801_v36 }
 0x6a9   :  { %2762 = vmatpush1.bf16.msra.mxu0 %v5587_v32  ;;  %v5982_v32 = vld [vmem:[#allocation11 + $0x274] ss:$24 sps:$4 sm:$0xff]  }
 0x6aa   :  { %2763 = vmatprep.subr.bf16.mxu0 %v5590_v19  ;;  %2915 = vmatpush1.bf16.msra.mxu1 %v5806_v49  ;;  %v5987_v19 = vld [vmem:[#allocation11 + $0x270] ss:$24 sps:$4 sm:$0xff]  }
 0x6ab   :  { %2916 = vmatprep.subr.bf16.mxu1 %v5809_v30 }
 0x6ad   :  { %2764 = vmatpush1.bf16.msra.mxu0 %v5595_v6  ;;  %v5990_v6 = vld [vmem:[#allocation11 + $0x244] ss:$24 sps:$4 sm:$0xff]  }
 0x6ae   :  { %2765 = vmatprep.subr.bf16.mxu0 %v5598_v2  ;;  %2917 = vmatpush1.bf16.msra.mxu1 %v5814_v53  ;;  %v5995_v2 = vld [vmem:[#allocation11 + $0x240] ss:$24 sps:$4 sm:$0xff]  }
 0x6af   :  { %2918 = vmatprep.subr.bf16.mxu1 %v5817_v38 }
 0x6b1   :  { %2766 = vmatpush1.bf16.msra.mxu0 %v5603_v8  ;;  %v5998_v8 = vld [vmem:[#allocation11 + $0x214] ss:$24 sps:$4 sm:$0xff]  }
 0x6b2   :  { %2767 = vmatprep.subr.bf16.mxu0 %v5606_v62  ;;  %2919 = vmatpush1.bf16.msra.mxu1 %v5822_v59  ;;  %v6833_v62 = vld [vmem:[#allocation60_spill] sm:$0xff] }
 0x6b3   :  { %2920 = vmatprep.subr.bf16.mxu1 %v5825_v9 }
 0x6b5   :  { %2768 = vmatpush1.bf16.msra.mxu0 %v5611_v40  ;;  %v6003_v40 = vld [vmem:[#allocation11 + $0x210] ss:$24 sps:$4 sm:$0xff]  }
 0x6b6   :  { %2769 = vmatprep.subr.bf16.mxu0 %v5614_v13  ;;  %2921 = vmatpush1.bf16.msra.mxu1 %v5830_v47  ;;  %v6006_v13 = vld [vmem:[#allocation11 + $0x1e4] ss:$24 sps:$4 sm:$0xff]  }
 0x6b7   :  { %2922 = vmatprep.subr.bf16.mxu1 %v5966_v48 }
 0x6b9   :  { %2770 = vmatpush2.bf16.msra.mxu0 %v5619_v50  ;;  %v6834_v50 = vld [vmem:[#allocation62_spill] sm:$0xff] }
 0x6ba   :  { %2771 = vmatprep.subr.bf16.mxu0 %v5622_v51  ;;  %2923 = vmatpush2.bf16.msra.mxu1 %v5971_v35  ;;  %v6835_v51 = vld [vmem:[#allocation64_spill] sm:$0xff] }
 0x6bb   :  { %2924 = vmatprep.subr.bf16.mxu1 %v5974_v52 }
 0x6bd   :  { %2772 = vmatpush2.bf16.msra.mxu0 %v5627_v54  ;;  %v6011_v54 = vld [vmem:[#allocation11 + $0x1e0] ss:$24 sps:$4 sm:$0xff]  }
 0x6be   :  { %2773 = vmatprep.subr.bf16.mxu0 %v5630_v39  ;;  %2925 = vmatpush2.bf16.msra.mxu1 %v5979_v37  ;;  %v6014_v39 = vld [vmem:[#allocation11 + $0x1b4] ss:$24 sps:$4 sm:$0xff]  }
 0x6bf   :  { %2926 = vmatprep.subr.bf16.mxu1 %v5982_v32 }
 0x6c1   :  { %2774 = vmatpush2.bf16.msra.mxu0 %v5635_v17  ;;  %v6836_v17 = vld [vmem:[#allocation66_spill] sm:$0xff] }
 0x6c2   :  { %2775 = vmatprep.subr.bf16.mxu0 %v5638_v28  ;;  %2927 = vmatpush2.bf16.msra.mxu1 %v5987_v19  ;;  %v6837_v28 = vld [vmem:[#allocation68_spill] sm:$0xff] }
 0x6c3   :  { %2928 = vmatprep.subr.bf16.mxu1 %v5990_v6 }
 0x6c5   :  { %2776 = vmatpush2.bf16.msra.mxu0 %v5643_v55  ;;  %v6019_v55 = vld [vmem:[#allocation11 + $0x1b0] ss:$24 sps:$4 sm:$0xff]  }
 0x6c6   :  { %2777 = vmatprep.subr.bf16.mxu0 %v5646_v60  ;;  %2929 = vmatpush2.bf16.msra.mxu1 %v5995_v2  ;;  %v6022_v60 = vld [vmem:[#allocation11 + $0x184] ss:$24 sps:$4 sm:$0xff]  }
 0x6c7   :  { %2930 = vmatprep.subr.bf16.mxu1 %v5998_v8 }
 0x6c9   :  { %2778 = vmatpush2.bf16.msra.mxu0 %v5651_v18  ;;  %v6838_v18 = vld [vmem:[#allocation41_spill] sm:$0xff] }
 0x6ca   :  { %2779 = vmatprep.subr.bf16.mxu0 %v6833_v62  ;;  %2931 = vmatpush2.bf16.msra.mxu1 %v6003_v40  ;;  %v6072_v62 = vld [vmem:[#allocation11 + $0x38] ss:$24 sps:$4 sm:$0xff]  }
 0x6cb   :  { %2932 = vmatprep.subr.bf16.mxu1 %v6006_v13  ;;  %6852 = vst [vmem:[#allocation55_spill] sm:$0xff] %v6072_v62 }
 0x6cd   :  { %2780 = vmatpush2.bf16.msra.mxu0 %v6834_v50  ;;  %v6075_v50 = vld [vmem:[#allocation11 + $0xc] ss:$24 sps:$4 sm:$0xff]  }
 0x6ce   :  { %2781 = vmatprep.subr.bf16.mxu0 %v6835_v51  ;;  %2933 = vmatpush2.bf16.msra.mxu1 %v6011_v54  ;;  %6853 = vst [vmem:[#allocation57_spill] sm:$0xff] %v6075_v50  ;;  %v6078_v51 = vld [vmem:[#allocation11 + $0x8] ss:$24 sps:$4 sm:$0xff]  }
 0x6cf   :  { %2934 = vmatprep.subr.bf16.mxu1 %v6014_v39  ;;  %6854 = vst [vmem:[#allocation59_spill] sm:$0xff] %v6078_v51 }
 0x6d1   :  { %2782 = vmatpush2.bf16.msra.mxu0 %v6836_v17  ;;  %v6855_v17 = vld [vmem:[#allocation24_spill] sm:$0xff] }
 0x6d2   :  { %2783 = vmatprep.subr.bf16.mxu0 %v6837_v28  ;;  %2935 = vmatpush2.bf16.msra.mxu1 %v6019_v55  ;;  %v6856_v28 = vld [vmem:[#allocation30_spill] sm:$0xff] }
 0x6d3   :  { %2936 = vmatprep.subr.bf16.mxu1 %v6022_v60 }
 0x6d5   :  { %2784 = vmatpush2.bf16.msra.mxu0 %v6838_v18  ;;  %v6857_v18 = vld [vmem:[#allocation42_spill] sm:$0xff] }
 0x6d6   :  { %2947 = vmatprep.subr.bf16.mxu0 %v6026_v16  ;;  %2937 = vmatpush2.bf16.msra.mxu1 %v6029_v5 }
 0x6d7   :  { %2988 = vmatprep.subr.bf16.mxu1 %v6032_v43 }
 0x6d8   :  { %2786 = vmatmul.mubr.bf16.vlgmr.msra.gmra.mxu0 %v5923_v25  ;;  %v6069_v25 = vld [vmem:[#allocation11 + $0x3c] ss:$24 sps:$4 sm:$0xff]  }
 0x6d9   :  { %2948 = vmatpush1.bf16.msra.mxu0 %v6036_v0  ;;  %6851 = vst [vmem:[#allocation53_spill] sm:$0xff] %v6069_v25 }
 0x6da   :  { %2949 = vmatprep.subr.bf16.mxu0 %v6039_v22 }
 0x6dd   :  { %2950 = vmatpush1.bf16.msra.mxu0 %v6042_v24 }
 0x6de   :  { %2951 = vmatprep.subr.bf16.mxu0 %v6045_v61  ;;  %v2655_v61 = vld [vmem:[%s2654_s28] ss:$8 sm:$0xf] }
 0x6e1   :  { %2952 = vmatpush1.bf16.msra.mxu0 %v6048_v44 }
 0x6e2   :  { %2953 = vmatprep.subr.bf16.mxu0 %v6051_v58 }
 0x6e5   :  { %2954 = vmatpush1.bf16.msra.mxu0 %v6054_v56 }
 0x6e6   :  { %2955 = vmatprep.subr.bf16.mxu0 %v6057_v57  ;;  %v6864_v57 = vld [vmem:[#allocation46_spill] sm:$0xff] }
 0x6e9   :  { %2956 = vmatpush1.bf16.msra.mxu0 %v6060_v14  ;;  %v6862_v14 = vld [vmem:[#allocation45_spill] sm:$0xff] }
 0x6ea   :  { %2957 = vmatprep.subr.bf16.mxu0 %v6063_v63  ;;  %v6860_v63 = vld [vmem:[#allocation29_spill] sm:$0xff] }
 0x6ed   :  { %2958 = vmatpush1.bf16.msra.mxu0 %v6066_v46  ;;  %v6858_v46 = vld [vmem:[#allocation43_spill] sm:$0xff] }
 0x6ee   :  { %2959 = vmatprep.subr.bf16.mxu0 %v6069_v25  ;;  %v6859_v25 = vld [vmem:[#allocation31_spill] sm:$0xff] }
 0x6f1   :  { %2960 = vmatpush1.bf16.msra.mxu0 %v6072_v62  ;;  %v6861_v62 = vld [vmem:[#allocation44_spill] sm:$0xff] }
 0x6f2   :  { %2961 = vmatprep.subr.bf16.mxu0 %v6075_v50  ;;  %v6863_v50 = vld [vmem:[#allocation32_spill] sm:$0xff] }
 0x6f5   :  { %2962 = vmatpush1.bf16.msra.mxu0 %v6078_v51  ;;  %v6865_v51 = vld [vmem:[#allocation47_spill] sm:$0xff] }
 0x6f6   :  { %2963 = vmatprep.subr.bf16.mxu0 %v6855_v17  ;;  %v6866_v17 = vld [vmem:[#allocation33_spill] sm:$0xff] }
 0x6f9   :  { %2964 = vmatpush2.bf16.msra.mxu0 %v6856_v28  ;;  %v6867_v28 = vld [vmem:[#allocation25_spill] sm:$0xff] }
 0x6fa   :  { %2965 = vmatprep.subr.bf16.mxu0 %v6857_v18  ;;  %v6868_v18 = vld [vmem:[#allocation51_spill] sm:$0xff] }
 0x6fd   :  { %2966 = vmatpush2.bf16.msra.mxu0 %v6858_v46  ;;  %v6869_v46 = vld [vmem:[#allocation26_spill] sm:$0xff] }
 0x6fe   :  { %2967 = vmatprep.subr.bf16.mxu0 %v6859_v25  ;;  %v6870_v25 = vld [vmem:[#allocation70_spill] sm:$0xff] }
 0x701   :  { %2968 = vmatpush2.bf16.msra.mxu0 %v6860_v63  ;;  %v6871_v63 = vld [vmem:[#allocation72_spill] sm:$0xff] }
 0x702   :  { %2969 = vmatprep.subr.bf16.mxu0 %v6861_v62 }
 0x705   :  { %2970 = vmatpush2.bf16.msra.mxu0 %v6862_v14 }
 0x706   :  { %2971 = vmatprep.subr.bf16.mxu0 %v6863_v50 }
 0x709   :  { %2972 = vmatpush2.bf16.msra.mxu0 %v6864_v57 }
 0x70a   :  { %2973 = vmatprep.subr.bf16.mxu0 %v6865_v51 }
 0x70d   :  { %2974 = vmatpush2.bf16.msra.mxu0 %v6866_v17 }
 0x70e   :  { %2975 = vmatprep.subr.bf16.mxu0 %v6867_v28  ;;  %v6872_v28 = vld [vmem:[#allocation28_spill] sm:$0xff] }
 0x711   :  { %2976 = vmatpush2.bf16.msra.mxu0 %v6868_v18 }
 0x712   :  { %2977 = vmatprep.subr.bf16.mxu0 %v6869_v46  ;;  %v6873_v46 = vld [vmem:[#allocation27_spill] sm:$0xff] }
 0x715   :  { %2978 = vmatpush2.bf16.msra.mxu0 %v6870_v25 }
 0x716   :  { %3141 = vmatprep.subr.bf16.mxu0 %v6871_v63 }
 0x758   :  { %v2705_v14 = vpop.f32.mrf.mxu0  ;;  %v2746_v62 = vpop.f32.mrf.mxu1 }
 0x759   :  { %v2706_v25 = vadd.f32 %v2705_v14, %v6873_v46  ;;  %v2747_v24 = vadd.f32 %v2746_v62, %v5174_v29 }
 0x75a   :  { %v2707_v50 = vpop.f32.mrf.mxu0  ;;  %v2748_v56 = vpop.f32.mrf.mxu1 }
 0x75b   :  { %v2708_v18 = vadd.f32 %v2707_v50, %v6872_v28 }
 0x75c   :  { %v2709_v57 = vpop.f32.mrf.mxu0  ;;  %v2750_v51 = vpop.f32.mrf.mxu1 }
 0x75d   :  { %v2796_v63 = vcombine.low %v2706_v25, %v2708_v18  ;;  %v2656_v57 = vld [vmem:[%s2654_s28] ss:$8 sm:$0x30] }
 0x75e   :  { %v2710_v17 = vpop.f32.mrf.mxu0  ;;  %v2751_v58 = vpop.f32.mrf.mxu1 }
 0x75f   :  { %v2803_v44 = vrot.slane %v2796_v63, %v5168_v34  ;;  %v2657_v17 = vor.u32 %v2656_v57, %v2655_v61  ;;  %v2749_v58 = vadd.f32 %v2748_v56, %v5178_v26 }
 0x761   :  { %v2810_v51 = vrot.slane %v2803_v44, %v5168_v34  ;;  %v2824_v50 = vcombine.low %v2747_v24, %v2749_v58  ;;  %v2820_v25 = vrot.slane %v2657_v17, 2 }
 0x763   :  { %v2812_v22 = vadd.f32 %v2810_v51, %v2657_v17  ;;  %v2831_v14 = vrot.slane %v2824_v50, %v5168_v34 }
 0x765   :  { %v3837_v28 = vmul.f32 -1.442695, %v2812_v22  ;;  %v2838_v18 = vrot.slane %v2831_v14, %v5168_v34 }
 0x767   :  { %4280 = vpow2.f32 %v3837_v28  ;;  %v2840_v63 = vadd.f32 %v2838_v18, %v2820_v25 }
 0x769   :  { %v3838_v46 = vmul.f32 -1.442695, %v2840_v63 }
 0x76b   :  { %4282 = vpow2.f32 %v3838_v46 }
 0x774   :  { %v4281_v0 = vpop.eup %4280 }
 0x775   :  { %v2816_v43 = vadd.f32 1.0, %v4281_v0  ;;  %v2866_v0 = vrot.slane %v2657_v17, 4 }
 0x777   :  { %4284 = vrcp.f32 %v2816_v43 }
 0x778   :  { %v4283_v24 = vpop.eup %4282 }
 0x779   :  { %v2844_v28 = vadd.f32 1.0, %v4283_v24 }
 0x77b   :  { %4286 = vrcp.f32 %v2844_v28  ;;  %v6880_v28 = vld [vmem:[#allocation36_spill] sm:$0xff] }
 0x784   :  { %v4285_v14 = vpop.eup %4284 }
 0x788   :  { %v4287_v18 = vpop.eup %4286 }
 0x789   :  { %v2870_v25 = vsub.f32 1.0, %v4287_v18 }
 0x798   :  { %v2787_v61 = vpop.f32.mrf.mxu0 }
 0x799   :  { %v2788_v56 = vadd.f32 %v2787_v61, %v5182_v15 }
 0x79a   :  { %v2789_v44 = vpop.f32.mrf.mxu0 }
 0x79b   :  { %v2790_v62 = vadd.f32 %v2789_v44, %v5184_v20  ;;  %v2872_v44 = vmul.f32 %v4287_v18, %v5914_v21  ;;  %v6132_v21 = vld [vmem:[#allocation11 + $0x100] ss:$24 sps:$4 sm:$0xff]   ;;  %v6889_v18 = vld [vmem:[#allocation59_spill] sm:$0xff] }
 0x79c   :  { %v2791_v22 = vpop.f32.mrf.mxu0 }
 0x79d   :  { %v2849_v57 = vcombine.low %v2788_v56, %v2790_v62 }
 0x79e   :  { %v2792_v51 = vpop.f32.mrf.mxu0 }
 0x79f   :  { %v2856_v58 = vrot.slane %v2849_v57, %v5168_v34  ;;  %v6135_v57 = vld [vmem:[#allocation11 + $0xd4] ss:$24 sps:$4 sm:$0xff]  }
 0x7a0   :  { %v6877_v51 = vld [vmem:[#allocation76_spill] sm:$0xff] }
 0x7a1   :  { %v2863_v50 = vrot.slane %v2856_v58, %v5168_v34  ;;  %v6881_v58 = vld [vmem:[#allocation37_spill] sm:$0xff] }
 0x7a3   :  { %v2865_v46 = vmul.f32 %v4285_v14, %v2863_v50  ;;  %v6884_v50 = vld [vmem:[#allocation40_spill] sm:$0xff]  ;;  %v6885_v14 = vld [vmem:[#allocation49_spill] sm:$0xff] }
 0x7a5   :  { %v2868_v43 = vadd.f32 %v2866_v0, %v2865_v46  ;;  %v6886_v46 = vld [vmem:[#allocation53_spill] sm:$0xff]  ;;  %v6887_v0 = vld [vmem:[#allocation55_spill] sm:$0xff] }
 0x7a7   :  { %4288 = vtanh.f32 %v2868_v43  ;;  %v6888_v43 = vld [vmem:[#allocation57_spill] sm:$0xff] }
 0x7b4   :  { %v4289_v63 = vpop.eup %4288 }
 0x7b5   :  { %v2871_v61 = vmul.f32 %v4289_v63, %v2870_v25  ;;  %v4490_v25 = vld [vmem:[#allocation11 + $0x2dc] ss:$24 sps:$4 sm:$0xff]   ;;  %v4491_v63 = vld [vmem:[#allocation11 + $0x2d8] ss:$24 sps:$4 sm:$0xff]  }
 0x7b7   :  { %v6111_v22 = vadd.f32 %v2872_v44, %v2871_v61  ;;  %v4492_v61 = vld [vmem:[#allocation11 + $0x2ac] ss:$24 sps:$4 sm:$0xff]   ;;  %v4493_v44 = vld [vmem:[#allocation11 + $0x2a8] ss:$24 sps:$4 sm:$0xff]  }
 0x7b9   :  { %2875 = vst.msk [vmem:[#allocation3 + $0x5] ss:$8 sm:$0x3] %vm5194_vm0, %v6111_v22  ;;  %v2901_v56 = vrot.slane %v6111_v22, %v6634_v41  ;;  %v2897_v17 = vrot.slane %v6111_v22, %v6631_v27 }
 0x7bb   :  { %v2905_v62 = vpack.c.bf16 %v2901_v56, %v2901_v56  ;;  %v6120_v24 = vpack.c.bf16 %v2897_v17, %v2897_v17  ;;  %v4494_v56 = vld [vmem:[#allocation11 + $0x27c] ss:$24 sps:$4 sm:$0xff]   ;;  %v4495_v17 = vld [vmem:[#allocation11 + $0x278] ss:$24 sps:$4 sm:$0xff]  }
 0x7bd   :  { %2938 = vmatprep.mubr.bf16.mxu1 %v2905_v62  ;;  %2979 = vmatprep.mubr.bf16.mxu0 %v2905_v62 }
 0x7be   :  { %2939 = vmatmul.mubr.bf16.vlgmr.msra.gmra.mxu1 %v6120_v24  ;;  %2980 = vmatmul.mubr.bf16.vlgmr.msra.gmra.mxu0 %v6120_v24 }
 0x7bf   :  { %2989 = vmatpush1.bf16.msra.mxu1 %v5927_v1  ;;  %3020 = vmatprep.mubr.bf16.mxu1 %v2905_v62  ;;  %v4496_v62 = vld [vmem:[#allocation11 + $0x24c] ss:$24 sps:$4 sm:$0xff]  }
 0x7c0   :  { %2990 = vmatprep.subr.bf16.mxu1 %v5930_v45  ;;  %3142 = vmatpush1.bf16.msra.mxu0 %v5774_v4  ;;  %v6140_v4 = vld [vmem:[#allocation11 + $0xd0] ss:$24 sps:$4 sm:$0xff]  }
 0x7c1   :  { %3143 = vmatprep.subr.bf16.mxu0 %v5777_v31  ;;  %v6143_v31 = vld [vmem:[#allocation11 + $0xa4] ss:$24 sps:$4 sm:$0xff]  }
 0x7c3   :  { %2991 = vmatpush1.bf16.msra.mxu1 %v5935_v3 }
 0x7c4   :  { %2992 = vmatprep.subr.bf16.mxu1 %v5938_v12  ;;  %3144 = vmatpush1.bf16.msra.mxu0 %v5782_v23  ;;  %v6148_v23 = vld [vmem:[#allocation11 + $0xa0] ss:$24 sps:$4 sm:$0xff]  }
 0x7c5   :  { %3145 = vmatprep.subr.bf16.mxu0 %v5785_v42  ;;  %v6151_v42 = vld [vmem:[#allocation11 + $0x74] ss:$24 sps:$4 sm:$0xff]  }
 0x7c7   :  { %2993 = vmatpush1.bf16.msra.mxu1 %v6132_v21 }
 0x7c8   :  { %2994 = vmatprep.subr.bf16.mxu1 %v6135_v57  ;;  %3146 = vmatpush1.bf16.msra.mxu0 %v5790_v7  ;;  %v6156_v7 = vld [vmem:[#allocation11 + $0x70] ss:$24 sps:$4 sm:$0xff]  }
 0x7c9   :  { %3147 = vmatprep.subr.bf16.mxu0 %v5793_v10  ;;  %v6159_v10 = vld [vmem:[#allocation11 + $0x44] ss:$24 sps:$4 sm:$0xff]  }
 0x7cb   :  { %2995 = vmatpush1.bf16.msra.mxu1 %v6140_v4 }
 0x7cc   :  { %2996 = vmatprep.subr.bf16.mxu1 %v6143_v31  ;;  %3148 = vmatpush1.bf16.msra.mxu0 %v5798_v11  ;;  %v6164_v11 = vld [vmem:[#allocation11 + $0x40] ss:$24 sps:$4 sm:$0xff]  }
 0x7cd   :  { %3149 = vmatprep.subr.bf16.mxu0 %v5801_v36  ;;  %v6167_v36 = vld [vmem:[#allocation11 + $0x14] ss:$24 sps:$4 sm:$0xff]  }
 0x7cf   :  { %2997 = vmatpush1.bf16.msra.mxu1 %v6148_v23 }
 0x7d0   :  { %2998 = vmatprep.subr.bf16.mxu1 %v6151_v42  ;;  %3150 = vmatpush1.bf16.msra.mxu0 %v5806_v49  ;;  %v6172_v49 = vld [vmem:[#allocation11 + $0x10] ss:$24 sps:$4 sm:$0xff]  }
 0x7d1   :  { %3151 = vmatprep.subr.bf16.mxu0 %v5809_v30  ;;  %v6175_v30 = vld [vmem:[#allocation11 + $0x2e4] ss:$24 sps:$4 sm:$0xff]  }
 0x7d3   :  { %2999 = vmatpush1.bf16.msra.mxu1 %v6156_v7 }
 0x7d4   :  { %3000 = vmatprep.subr.bf16.mxu1 %v6159_v10  ;;  %3152 = vmatpush1.bf16.msra.mxu0 %v5814_v53  ;;  %v6180_v53 = vld [vmem:[#allocation11 + $0x2e0] ss:$24 sps:$4 sm:$0xff]  }
 0x7d5   :  { %3153 = vmatprep.subr.bf16.mxu0 %v5817_v38  ;;  %v6183_v38 = vld [vmem:[#allocation11 + $0x2b4] ss:$24 sps:$4 sm:$0xff]  }
 0x7d7   :  { %3001 = vmatpush1.bf16.msra.mxu1 %v6164_v11 }
 0x7d8   :  { %3002 = vmatprep.subr.bf16.mxu1 %v6167_v36  ;;  %3154 = vmatpush1.bf16.msra.mxu0 %v5822_v59  ;;  %v6188_v59 = vld [vmem:[#allocation11 + $0x2b0] ss:$24 sps:$4 sm:$0xff]  }
 0x7d9   :  { %3155 = vmatprep.subr.bf16.mxu0 %v5825_v9  ;;  %v6191_v9 = vld [vmem:[#allocation11 + $0x284] ss:$24 sps:$4 sm:$0xff]  }
 0x7db   :  { %3003 = vmatpush1.bf16.msra.mxu1 %v6172_v49 }
 0x7dc   :  { %3004 = vmatprep.subr.bf16.mxu1 %v6175_v30  ;;  %3156 = vmatpush1.bf16.msra.mxu0 %v5830_v47  ;;  %v6196_v47 = vld [vmem:[#allocation11 + $0x280] ss:$24 sps:$4 sm:$0xff]  }
 0x7dd   :  { %3157 = vmatprep.subr.bf16.mxu0 %v5966_v48  ;;  %v6199_v48 = vld [vmem:[#allocation11 + $0x254] ss:$24 sps:$4 sm:$0xff]  }
 0x7df   :  { %3005 = vmatpush2.bf16.msra.mxu1 %v6180_v53 }
 0x7e0   :  { %3006 = vmatprep.subr.bf16.mxu1 %v6183_v38  ;;  %3158 = vmatpush2.bf16.msra.mxu0 %v5971_v35  ;;  %v6204_v35 = vld [vmem:[#allocation11 + $0x250] ss:$24 sps:$4 sm:$0xff]  }
 0x7e1   :  { %3159 = vmatprep.subr.bf16.mxu0 %v5974_v52  ;;  %v6207_v52 = vld [vmem:[#allocation11 + $0x224] ss:$24 sps:$4 sm:$0xff]  }
 0x7e3   :  { %3007 = vmatpush2.bf16.msra.mxu1 %v6188_v59 }
 0x7e4   :  { %3008 = vmatprep.subr.bf16.mxu1 %v6191_v9  ;;  %3160 = vmatpush2.bf16.msra.mxu0 %v5979_v37  ;;  %v6212_v37 = vld [vmem:[#allocation11 + $0x220] ss:$24 sps:$4 sm:$0xff]  }
 0x7e5   :  { %3161 = vmatprep.subr.bf16.mxu0 %v5982_v32  ;;  %v6215_v32 = vld [vmem:[#allocation11 + $0x1f4] ss:$24 sps:$4 sm:$0xff]  }
 0x7e7   :  { %3009 = vmatpush2.bf16.msra.mxu1 %v6196_v47 }
 0x7e8   :  { %3010 = vmatprep.subr.bf16.mxu1 %v6199_v48  ;;  %3162 = vmatpush2.bf16.msra.mxu0 %v5987_v19  ;;  %v6220_v19 = vld [vmem:[#allocation11 + $0x1f0] ss:$24 sps:$4 sm:$0xff]  }
 0x7e9   :  { %3163 = vmatprep.subr.bf16.mxu0 %v5990_v6  ;;  %v6223_v6 = vld [vmem:[#allocation11 + $0x1c4] ss:$24 sps:$4 sm:$0xff]  }
 0x7eb   :  { %3011 = vmatpush2.bf16.msra.mxu1 %v6204_v35 }
 0x7ec   :  { %3012 = vmatprep.subr.bf16.mxu1 %v6207_v52  ;;  %3164 = vmatpush2.bf16.msra.mxu0 %v5995_v2  ;;  %v6228_v2 = vld [vmem:[#allocation11 + $0x1c0] ss:$24 sps:$4 sm:$0xff]  }
 0x7ed   :  { %3165 = vmatprep.subr.bf16.mxu0 %v5998_v8  ;;  %v6231_v8 = vld [vmem:[#allocation11 + $0x194] ss:$24 sps:$4 sm:$0xff]  }
 0x7ef   :  { %3013 = vmatpush2.bf16.msra.mxu1 %v6212_v37 }
 0x7f0   :  { %3014 = vmatprep.subr.bf16.mxu1 %v6215_v32  ;;  %3166 = vmatpush2.bf16.msra.mxu0 %v6003_v40  ;;  %v6236_v40 = vld [vmem:[#allocation11 + $0x190] ss:$24 sps:$4 sm:$0xff]  }
 0x7f1   :  { %3167 = vmatprep.subr.bf16.mxu0 %v6006_v13  ;;  %v6874_v13 = vld [vmem:[#allocation73_spill] sm:$0xff] }
 0x7f3   :  { %3015 = vmatpush2.bf16.msra.mxu1 %v6220_v19 }
 0x7f4   :  { %3016 = vmatprep.subr.bf16.mxu1 %v6223_v6  ;;  %3168 = vmatpush2.bf16.msra.mxu0 %v6011_v54  ;;  %v6875_v54 = vld [vmem:[#allocation74_spill] sm:$0xff] }
 0x7f5   :  { %3169 = vmatprep.subr.bf16.mxu0 %v6014_v39  ;;  %v6876_v39 = vld [vmem:[#allocation75_spill] sm:$0xff] }
 0x7f7   :  { %3017 = vmatpush2.bf16.msra.mxu1 %v6228_v2 }
 0x7f8   :  { %3018 = vmatprep.subr.bf16.mxu1 %v6231_v8  ;;  %3170 = vmatpush2.bf16.msra.mxu0 %v6019_v55  ;;  %v6878_v55 = vld [vmem:[#allocation34_spill] sm:$0xff] }
 0x7f9   :  { %3171 = vmatprep.subr.bf16.mxu0 %v6022_v60  ;;  %v6879_v60 = vld [vmem:[#allocation35_spill] sm:$0xff] }
 0x7fb   :  { %3019 = vmatpush2.bf16.msra.mxu1 %v6236_v40 }
 0x7fc   :  { %3182 = vmatprep.subr.bf16.mxu1 %v6026_v16  ;;  %3172 = vmatpush2.bf16.msra.mxu0 %v6029_v5  ;;  %v6882_v16 = vld [vmem:[#allocation38_spill] sm:$0xff]  ;;  %v6883_v5 = vld [vmem:[#allocation39_spill] sm:$0xff] }
 0x7fd   :  { %3223 = vmatprep.subr.bf16.mxu0 %v6874_v13  ;;  %v4498_v13 = vld [vmem:[#allocation11 + $0x21c] ss:$24 sps:$4 sm:$0xff]  }
 0x7fe   :  { %3021 = vmatmul.mubr.bf16.vlgmr.msra.gmra.mxu1 %v6120_v24  ;;  %v4497_v24 = vld [vmem:[#allocation11 + $0x248] ss:$24 sps:$4 sm:$0xff]  }
 0x7ff   :  { %3183 = vmatpush1.bf16.msra.mxu1 %v6875_v54  ;;  %v4499_v54 = vld [vmem:[#allocation11 + $0x218] ss:$24 sps:$4 sm:$0xff]  }
 0x800   :  { %3184 = vmatprep.subr.bf16.mxu1 %v6876_v39  ;;  %v4500_v39 = vld [vmem:[#allocation11 + $0x1ec] ss:$24 sps:$4 sm:$0xff]  }
 0x803   :  { %3185 = vmatpush1.bf16.msra.mxu1 %v6877_v51  ;;  %v4501_v51 = vld [vmem:[#allocation11 + $0x1e8] ss:$24 sps:$4 sm:$0xff]  }
 0x804   :  { %3186 = vmatprep.subr.bf16.mxu1 %v6878_v55  ;;  %v4502_v55 = vld [vmem:[#allocation11 + $0x1bc] ss:$24 sps:$4 sm:$0xff]  }
 0x807   :  { %3187 = vmatpush1.bf16.msra.mxu1 %v6879_v60  ;;  %v4503_v60 = vld [vmem:[#allocation11 + $0x1b8] ss:$24 sps:$4 sm:$0xff]  }
 0x808   :  { %3188 = vmatprep.subr.bf16.mxu1 %v6880_v28  ;;  %v4504_v28 = vld [vmem:[#allocation11 + $0x18c] ss:$24 sps:$4 sm:$0xff]  }
 0x80b   :  { %3189 = vmatpush1.bf16.msra.mxu1 %v6881_v58  ;;  %v4505_v58 = vld [vmem:[#allocation11 + $0x188] ss:$24 sps:$4 sm:$0xff]  }
 0x80c   :  { %3190 = vmatprep.subr.bf16.mxu1 %v6882_v16 }
 0x80f   :  { %3191 = vmatpush1.bf16.msra.mxu1 %v6883_v5 }
 0x810   :  { %3192 = vmatprep.subr.bf16.mxu1 %v6884_v50 }
 0x813   :  { %3193 = vmatpush1.bf16.msra.mxu1 %v6885_v14 }
 0x814   :  { %3194 = vmatprep.subr.bf16.mxu1 %v6886_v46 }
 0x817   :  { %3195 = vmatpush1.bf16.msra.mxu1 %v6887_v0 }
 0x818   :  { %3196 = vmatprep.subr.bf16.mxu1 %v6888_v43 }
 0x81b   :  { %3197 = vmatpush1.bf16.msra.mxu1 %v6889_v18 }
 0x81c   :  { %3198 = vmatprep.subr.bf16.mxu1 %v4490_v25  ;;  %v6890_v25 = vld [vmem:[#allocation28_spill] sm:$0xff] }
 0x81f   :  { %3199 = vmatpush2.bf16.msra.mxu1 %v4491_v63 }
 0x820   :  { %3200 = vmatprep.subr.bf16.mxu1 %v4492_v61  ;;  %v6891_v61 = vld [vmem:[#allocation27_spill] sm:$0xff] }
 0x823   :  { %3201 = vmatpush2.bf16.msra.mxu1 %v4493_v44 }
 0x824   :  { %3202 = vmatprep.subr.bf16.mxu1 %v4494_v56 }
 0x827   :  { %3203 = vmatpush2.bf16.msra.mxu1 %v4495_v17 }
 0x828   :  { %3204 = vmatprep.subr.bf16.mxu1 %v4496_v62  ;;  %v2890_v62 = vld [vmem:[%s2889_s6] ss:$8 sm:$0xf] }
 0x82b   :  { %3205 = vmatpush2.bf16.msra.mxu1 %v4497_v24  ;;  %v2891_v24 = vld [vmem:[%s2889_s6] ss:$8 sm:$0x30] }
 0x82c   :  { %3206 = vmatprep.subr.bf16.mxu1 %v4498_v13 }
 0x82f   :  { %3207 = vmatpush2.bf16.msra.mxu1 %v4499_v54  ;;  %v2892_v54 = vor.u32 %v2891_v24, %v2890_v62 }
 0x830   :  { %3208 = vmatprep.subr.bf16.mxu1 %v4500_v39 }
 0x833   :  { %3209 = vmatpush2.bf16.msra.mxu1 %v4501_v51 }
 0x834   :  { %3210 = vmatprep.subr.bf16.mxu1 %v4502_v55 }
 0x837   :  { %3211 = vmatpush2.bf16.msra.mxu1 %v4503_v60 }
 0x838   :  { %3212 = vmatprep.subr.bf16.mxu1 %v4504_v28 }
 0x83b   :  { %3213 = vmatpush2.bf16.msra.mxu1 %v4505_v58 }
 0x87e   :  { %v2940_v16 = vpop.f32.mrf.mxu1  ;;  %v2981_v5 = vpop.f32.mrf.mxu0 }
 0x87f   :  { %v2941_v44 = vadd.f32 %v2940_v16, %v6891_v61  ;;  %v2982_v51 = vadd.f32 %v2981_v5, %v5174_v29 }
 0x880   :  { %v2942_v50 = vpop.f32.mrf.mxu1  ;;  %v2983_v14 = vpop.f32.mrf.mxu0 }
 0x881   :  { %v2943_v63 = vadd.f32 %v2942_v50, %v6890_v25  ;;  %v2984_v39 = vadd.f32 %v2983_v14, %v5178_v26  ;;  %v3055_v50 = vrot.slane %v2892_v54, 2 }
 0x882   :  { %v2944_v46 = vpop.f32.mrf.mxu1  ;;  %v2985_v0 = vpop.f32.mrf.mxu0 }
 0x883   :  { %v3031_v56 = vcombine.low %v2941_v44, %v2943_v63  ;;  %v3059_v60 = vcombine.low %v2982_v51, %v2984_v39 }
 0x884   :  { %v2945_v43 = vpop.f32.mrf.mxu1  ;;  %v2986_v18 = vpop.f32.mrf.mxu0 }
 0x885   :  { %v3038_v17 = vrot.slane %v3031_v56, %v5168_v34  ;;  %v3066_v58 = vrot.slane %v3059_v60, %v5168_v34 }
 0x887   :  { %v3045_v13 = vrot.slane %v3038_v17, %v5168_v34  ;;  %v3073_v16 = vrot.slane %v3066_v58, %v5168_v34 }
 0x889   :  { %v3047_v55 = vadd.f32 %v3045_v13, %v2892_v54  ;;  %v3075_v46 = vadd.f32 %v3073_v16, %v3055_v50 }
 0x88b   :  { %v3846_v28 = vmul.f32 -1.442695, %v3047_v55  ;;  %v3847_v0 = vmul.f32 -1.442695, %v3075_v46 }
 0x88d   :  { %4290 = vpow2.f32 %v3846_v28  ;;  %v3101_v28 = vrot.slane %v2892_v54, 4 }
 0x88e   :  { %4292 = vpow2.f32 %v3847_v0 }
 0x89a   :  { %v4291_v43 = vpop.eup %4290 }
 0x89b   :  { %v3051_v18 = vadd.f32 1.0, %v4291_v43  ;;  %v4293_v56 = vpop.eup %4292 }
 0x89c   :  { %v3079_v13 = vadd.f32 1.0, %v4293_v56 }
 0x89d   :  { %4294 = vrcp.f32 %v3051_v18 }
 0x89e   :  { %4296 = vrcp.f32 %v3079_v13 }
 0x8aa   :  { %v4295_v55 = vpop.eup %4294 }
 0x8ab   :  { %v4297_v16 = vpop.eup %4296 }
 0x8ac   :  { %v3105_v50 = vsub.f32 1.0, %v4297_v16  ;;  %v3107_v43 = vmul.f32 %v4297_v16, %v6111_v22  ;;  %v4220_v22 = vld [vmem:[#allocation14 + $0x60] sm:$0xff]  }
 0x8be   :  { %v3022_v63 = vpop.f32.mrf.mxu1 }
 0x8bf   :  { %v3023_v14 = vadd.f32 %v3022_v63, %v5182_v15 }
 0x8c0   :  { %v3024_v44 = vpop.f32.mrf.mxu1 }
 0x8c1   :  { %v3025_v5 = vadd.f32 %v3024_v44, %v5184_v20 }
 0x8c2   :  { %v3026_v17 = vpop.f32.mrf.mxu1 }
 0x8c3   :  { %v3084_v62 = vcombine.low %v3023_v14, %v3025_v5 }
 0x8c4   :  { %v3027_v24 = vpop.f32.mrf.mxu1 }
 0x8c5   :  { %v3091_v39 = vrot.slane %v3084_v62, %v5168_v34 }
 0x8c7   :  { %v3098_v51 = vrot.slane %v3091_v39, %v5168_v34 }
 0x8c9   :  { %v3100_v60 = vmul.f32 %v4295_v55, %v3098_v51 }
 0x8cb   :  { %v3103_v58 = vadd.f32 %v3101_v28, %v3100_v60 }
 0x8cd   :  { %4298 = vtanh.f32 %v3103_v58 }
 0x8da   :  { %v4299_v46 = vpop.eup %4298 }
 0x8db   :  { %v3106_v0 = vmul.f32 %v4299_v46, %v3105_v50 }
 0x8dd   :  { %v6271_v18 = vadd.f32 %v3107_v43, %v3106_v0 }
 0x8df   :  { %3110 = vst.msk [vmem:[#allocation3 + $0x6] ss:$8 sm:$0x3] %vm5194_vm0, %v6271_v18  ;;  %v3136_v63 = vrot.slane %v6271_v18, %v6634_v41  ;;  %v3132_v54 = vrot.slane %v6271_v18, %v6631_v27  ;;  %v4214_v27 = vld [vmem:[#allocation14 + $0x78] sm:$0xff]  }
 0x8e0   :  { %v4215_v41 = vld [vmem:[#allocation14 + $0x38] sm:$0xff]   ;;  %3890 = vmatprep.subr.bf16.mxu1 %v4214_v27 }
 0x8e1   :  { %v3140_v44 = vpack.c.bf16 %v3136_v63, %v3136_v63  ;;  %v3139_v14 = vpack.c.bf16 %v3132_v54, %v3132_v54 }
 0x8e3   :  { %3173 = vmatprep.mubr.bf16.mxu0 %v3140_v44  ;;  %3214 = vmatprep.mubr.bf16.mxu1 %v3140_v44 }
 0x8e4   :  { %3174 = vmatmul.mubr.bf16.vlgmr.msra.gmra.mxu0 %v3139_v14  ;;  %3215 = vmatmul.mubr.bf16.vlgmr.msra.gmra.mxu1 %v3139_v14 }
 0x8e5   :  { %3224 = vmatpush1.bf16.msra.mxu0 %v5927_v1  ;;  %3255 = vmatprep.mubr.bf16.mxu0 %v3140_v44  ;;  %v4216_v1 = vld [vmem:[#allocation14 + $0x70] sm:$0xff]  }
 0x8e6   :  { %3225 = vmatprep.subr.bf16.mxu0 %v5930_v45  ;;  %3891 = vmatpush3.bf16.msra.mxu1 %v4215_v41  ;;  %v4217_v45 = vld [vmem:[#allocation14 + $0x30] sm:$0xff]  }
 0x8e7   :  { %3892 = vmatprep.subr.bf16.mxu1 %v4216_v1 }
 0x8e9   :  { %3226 = vmatpush1.bf16.msra.mxu0 %v5935_v3  ;;  %v4218_v3 = vld [vmem:[#allocation14 + $0x68] sm:$0xff]  }
 0x8ea   :  { %3227 = vmatprep.subr.bf16.mxu0 %v5938_v12  ;;  %3893 = vmatpush3.bf16.msra.mxu1 %v4217_v45  ;;  %v4219_v12 = vld [vmem:[#allocation14 + $0x28] sm:$0xff]  }
 0x8eb   :  { %3894 = vmatprep.subr.bf16.mxu1 %v4218_v3 }
 0x8ed   :  { %3228 = vmatpush1.bf16.msra.mxu0 %v6132_v21  ;;  %v4221_v21 = vld [vmem:[#allocation14 + $0x20] sm:$0xff]  }
 0x8ee   :  { %3229 = vmatprep.subr.bf16.mxu0 %v6135_v57  ;;  %3895 = vmatpush3.bf16.msra.mxu1 %v4219_v12  ;;  %v4222_v57 = vld [vmem:[#allocation14 + $0x58] sm:$0xff]  }
 0x8ef   :  { %3896 = vmatprep.subr.bf16.mxu1 %v4220_v22 }
 0x8f1   :  { %3230 = vmatpush1.bf16.msra.mxu0 %v6140_v4  ;;  %v4223_v4 = vld [vmem:[#allocation14 + $0x18] sm:$0xff]  }
 0x8f2   :  { %3231 = vmatprep.subr.bf16.mxu0 %v6143_v31  ;;  %3897 = vmatpush3.bf16.msra.mxu1 %v4221_v21  ;;  %v4224_v31 = vld [vmem:[#allocation14 + $0x50] sm:$0xff]  }
 0x8f3   :  { %3898 = vmatprep.subr.bf16.mxu1 %v4222_v57 }
 0x8f5   :  { %3232 = vmatpush1.bf16.msra.mxu0 %v6148_v23  ;;  %v4225_v23 = vld [vmem:[#allocation14 + $0x10] sm:$0xff]  }
 0x8f6   :  { %3233 = vmatprep.subr.bf16.mxu0 %v6151_v42  ;;  %3899 = vmatpush3.bf16.msra.mxu1 %v4223_v4  ;;  %v4226_v42 = vld [vmem:[#allocation14 + $0x48] sm:$0xff]  }
 0x8f7   :  { %3900 = vmatprep.subr.bf16.mxu1 %v4224_v31 }
 0x8f9   :  { %3234 = vmatpush1.bf16.msra.mxu0 %v6156_v7  ;;  %v4227_v7 = vld [vmem:[#allocation14 + $0x8] sm:$0xff]  }
 0x8fa   :  { %3235 = vmatprep.subr.bf16.mxu0 %v6159_v10  ;;  %3901 = vmatpush3.bf16.msra.mxu1 %v4225_v23  ;;  %v4228_v10 = vld [vmem:[#allocation14 + $0x40] sm:$0xff]  }
 0x8fb   :  { %3902 = vmatprep.subr.bf16.mxu1 %v4226_v42 }
 0x8fd   :  { %3236 = vmatpush1.bf16.msra.mxu0 %v6164_v11  ;;  %v4229_v11 = vld [vmem:[#allocation14] sm:$0xff]  }
 0x8fe   :  { %3237 = vmatprep.subr.bf16.mxu0 %v6167_v36  ;;  %3903 = vmatpush3.bf16.msra.mxu1 %v4227_v7 }
 0x8ff   :  { %3904 = vmatprep.subr.bf16.mxu1 %v4228_v10 }
 0x901   :  { %3238 = vmatpush1.bf16.msra.mxu0 %v6172_v49 }
 0x902   :  { %3239 = vmatprep.subr.bf16.mxu0 %v6175_v30  ;;  %3905 = vmatpush3.bf16.msra.mxu1 %v4229_v11 }
 0x905   :  { %3240 = vmatpush2.bf16.msra.mxu0 %v6180_v53 }
 0x906   :  { %3241 = vmatprep.subr.bf16.mxu0 %v6183_v38 }
 0x909   :  { %3242 = vmatpush2.bf16.msra.mxu0 %v6188_v59 }
 0x90a   :  { %3243 = vmatprep.subr.bf16.mxu0 %v6191_v9 }
 0x90d   :  { %3244 = vmatpush2.bf16.msra.mxu0 %v6196_v47 }
 0x90e   :  { %3245 = vmatprep.subr.bf16.mxu0 %v6199_v48 }
 0x911   :  { %3246 = vmatpush2.bf16.msra.mxu0 %v6204_v35 }
 0x912   :  { %3247 = vmatprep.subr.bf16.mxu0 %v6207_v52 }
 0x915   :  { %3248 = vmatpush2.bf16.msra.mxu0 %v6212_v37 }
 0x916   :  { %3249 = vmatprep.subr.bf16.mxu0 %v6215_v32  ;;  %v3125_v32 = vld [vmem:[%s3124_s1] ss:$8 sm:$0xf] }
 0x919   :  { %3250 = vmatpush2.bf16.msra.mxu0 %v6220_v19  ;;  %v3126_v19 = vld [vmem:[%s3124_s1] ss:$8 sm:$0x30] }
 0x91a   :  { %3251 = vmatprep.subr.bf16.mxu0 %v6223_v6 }
 0x91d   :  { %3252 = vmatpush2.bf16.msra.mxu0 %v6228_v2  ;;  %v3127_v2 = vor.u32 %v3126_v19, %v3125_v32 }
 0x91e   :  { %3253 = vmatprep.subr.bf16.mxu0 %v6231_v8 }
 0x91f   :  { %v3290_v62 = vrot.slane %v3127_v2, 2  ;;  %v3336_v44 = vrot.slane %v3127_v2, 4 }
 0x921   :  { %3254 = vmatpush2.bf16.msra.mxu0 %v6236_v40 }
 0x924   :  { %3256 = vmatmul.mubr.bf16.vlgmr.msra.gmra.mxu0 %v3139_v14 }
 0x9a4   :  { %v3175_v36 = vpop.f32.mrf.mxu0  ;;  %v3216_v49 = vpop.f32.mrf.mxu1 }
 0x9a5   :  { %v3176_v35 = vadd.f32 %v3175_v36, %v6891_v61  ;;  %v3217_v40 = vadd.f32 %v3216_v49, %v5174_v29 }
 0x9a6   :  { %v3177_v30 = vpop.f32.mrf.mxu0  ;;  %v3218_v53 = vpop.f32.mrf.mxu1 }
 0x9a7   :  { %v3178_v48 = vadd.f32 %v3177_v30, %v6890_v25  ;;  %v3219_v8 = vadd.f32 %v3218_v53, %v5178_v26 }
 0x9a8   :  { %v3179_v38 = vpop.f32.mrf.mxu0  ;;  %v3220_v59 = vpop.f32.mrf.mxu1 }
 0x9a9   :  { %v3266_v52 = vcombine.low %v3176_v35, %v3178_v48  ;;  %v3294_v25 = vcombine.low %v3217_v40, %v3219_v8 }
 0x9aa   :  { %v3180_v9 = vpop.f32.mrf.mxu0  ;;  %v3221_v47 = vpop.f32.mrf.mxu1 }
 0x9ab   :  { %v3273_v37 = vrot.slane %v3266_v52, %v5168_v34  ;;  %v3301_v61 = vrot.slane %v3294_v25, %v5168_v34 }
 0x9ad   :  { %v3280_v6 = vrot.slane %v3273_v37, %v5168_v34  ;;  %v3308_v17 = vrot.slane %v3301_v61, %v5168_v34 }
 0x9af   :  { %v3282_v5 = vadd.f32 %v3280_v6, %v3127_v2  ;;  %v3310_v24 = vadd.f32 %v3308_v17, %v3290_v62 }
 0x9b1   :  { %v3855_v56 = vmul.f32 -1.442695, %v3282_v5  ;;  %v3856_v13 = vmul.f32 -1.442695, %v3310_v24 }
 0x9b3   :  { %4300 = vpow2.f32 %v3855_v56 }
 0x9b4   :  { %4302 = vpow2.f32 %v3856_v13 }
 0x9c0   :  { %v4301_v39 = vpop.eup %4300 }
 0x9c1   :  { %v3286_v51 = vadd.f32 1.0, %v4301_v39  ;;  %v4303_v28 = vpop.eup %4302 }
 0x9c2   :  { %v3314_v46 = vadd.f32 1.0, %v4303_v28 }
 0x9c3   :  { %4304 = vrcp.f32 %v3286_v51 }
 0x9c4   :  { %4306 = vrcp.f32 %v3314_v46 }
 0x9d0   :  { %v4305_v63 = vpop.eup %4304 }
 0x9d1   :  { %v4307_v27 = vpop.eup %4306 }
 0x9d2   :  { %v3340_v41 = vsub.f32 1.0, %v4307_v27 }
 0x9e4   :  { %v3257_v55 = vpop.f32.mrf.mxu0 }
 0x9e5   :  { %v3258_v26 = vadd.f32 %v3257_v55, %v5182_v15 }
 0x9e6   :  { %v3259_v60 = vpop.f32.mrf.mxu0 }
 0x9e7   :  { %v3260_v29 = vadd.f32 %v3259_v60, %v5184_v20  ;;  %v3342_v20 = vmul.f32 %v4307_v27, %v6271_v18  ;;  %v3857_v18 = vld [vmem:[%s6345_s8] ss:$0 sm:$0xff] }
 0x9e8   :  { %v3261_v58 = vpop.f32.mrf.mxu0 }
 0x9e9   :  { %v3319_v16 = vcombine.low %v3258_v26, %v3260_v29 }
 0x9ea   :  { %v3262_v50 = vpop.f32.mrf.mxu0 }
 0x9eb   :  { %v3326_v0 = vrot.slane %v3319_v16, %v5168_v34 }
 0x9ed   :  { %v3333_v43 = vrot.slane %v3326_v0, %v5168_v34 }
 0x9ef   :  { %v3335_v54 = vmul.f32 %v4305_v63, %v3333_v43 }
 0x9f1   :  { %v3338_v14 = vadd.f32 %v3336_v44, %v3335_v54 }
 0x9f3   :  { %4308 = vtanh.f32 %v3338_v14 }
 0xa00   :  { %v4309_v15 = vpop.eup %4308 }
 0xa01   :  { %v3341_v1 = vmul.f32 %v4309_v15, %v3340_v41 }
 0xa03   :  { %v3343_v45 = vadd.f32 %v3342_v20, %v3341_v1 }
 0xa05   :  { %3345 = vst.msk [vmem:[#allocation3 + $0x7] ss:$8 sm:$0x3] %vm5194_vm0, %v3343_v45  ;;  %3347 = vst.msk [vmem:[#allocation16] sm:$0x3] %vm5194_vm0, %v3343_v45 }
 0xa0c   :  { %v3349_v34 = vld [vmem:[#allocation3 + $0x8] sm:$0xff]  ;;  %v3348_v3 = vld [vmem:[#allocation3] sm:$0xff] }
 0xa0d   :  { %v3351_v12 = vpack.c.bf16 %v3349_v34, %v3349_v34  ;;  %v3350_v22 = vpack.c.bf16 %v3348_v3, %v3348_v3 }
 0xa0f   :  { %3519 = vmatprep.mubr.bf16.mxu1 %v3351_v12 }
 0xa10   :  { %3520 = vmatmul.mubr.bf16.vlgmr.msra.gmra.mxu1 %v3350_v22 }
 0xad0   :  { %v3906_v21 = vpop.f32.mrf.mxu1 }
 0xad2   :  { %v3907_v57 = vpop.f32.mrf.mxu1 }
 0xad3   :  { %v3908_v4 = vadd.f32 %v3907_v57, %v3906_v21 }
 0xad4   :  { %v3909_v31 = vpop.f32.mrf.mxu1 }
 0xad5   :  { %v3522_v23 = vadd.f32 %v3908_v4, %v3857_v18 }
 0xad6   :  { %v3910_v42 = vpop.f32.mrf.mxu1 }
 0xad7   :  { %3527 = vmax.xlane.f32.xlu0 %v3522_v23 }
 0xb60   :  { %v3528_v7 = vpop.xlane.xlu0 %3527 }
 0xb61   :  { %v3529_v33 = vsub.f32 %v3522_v23, %v3528_v7 }
 0xb63   :  { %v3530_v10 = vmul.f32 1.442695, %v3529_v33 }
 0xb65   :  { %4310 = vpow2.f32 %v3530_v10 }
 0xb72   :  { %v4311_v11 = vpop.eup %4310 }
 0xb73   :  { %3532 = vadd.xlane.f32.xlu0 %v4311_v11 }
 0xb74   :  { %4625 = shalt.err (!%p4622_p3)
}
 0xb75   :  { %3557 = dma.vmem_to_hbm [thread:$0]  %s3555_s4, 32, %s6347_s10, [#allocation17]  }
 0xb76   :  { %s4679_s16 = smov [#allocation15]  }
 0xb77   :  { %s3544_s5 = sshll.u32 %s4679_s16, 4  ;;  %s3545_s5 = int_to_ptr.vmem [resolvable:$true] %s3544_s5 }
 0xb78   :  { %s4634_s17 = scalar_lea.vmem %s3545_s5, 128  ;;  %p4639_p5 = scmp.lt.s32.totalorder %s3545_s5, %s3545_s5 }
 0xb79   :  { %p4635_p4 = scmp.ne.s32.totalorder %s3545_s5, %s4634_s17  ;;  %p4640_p6 = scmp.lt.s32.totalorder %s4634_s17, %s4634_s17 }
 0xb7b   :  { %p4641_p7 = por %p4640_p6, %p4639_p5 }
 0xb7d   :  { %p4642_p8 = pnand %p4641_p7, %p4635_p4 }
 0xbfc   :  { %v3533_v36 = vpop.xlane.xlu0 %3532 }
 0xbfd   :  { %4312 = vlog2.f32 %v3533_v36 }
 0xc0a   :  { %v4313_v49 = vpop.eup %4312 }
 0xc0b   :  { %v3535_v30 = vmul.f32 0.6931472, %v4313_v49 }
 0xc0d   :  { %v3536_v53 = vsub.f32 %v3529_v33, %v3535_v30 }
 0xc0f   :  { %3537 = vst [vmem:[#allocation15] sm:$0xff] %v3536_v53 }
 0xc10   :  { %4645 = shalt.err (!%p4642_p8)
}
 0xc11   :  { %3547 = dma.vmem_to_hbm [thread:$0]  %s3545_s5, 128, %s6346_s9, [#allocation6]  }
 0xc12   :  { %4662 = dma.done.wait [#allocation6], 128  }
 0xc13   :  { %4663 = vsyncadd [#allocation6], 4294967168 }
 0xc14   :  { %4664 = dma.done.wait [#allocation17], 32  }
 0xc15   :  { %4665 = vsyncadd [#allocation17], 4294967264 }
 0xc16   :  { %3564 = vsyncpa [#allocation5], 1 }
 0xc17   :  { %3565 = vsyncpa [#allocation10], 1 }
 0xc18   :  { %3566 = vsyncpa [#allocation13], 1 }
 0xc19   :  { %3567 = vsyncpa [#allocation6], 1 }
 0xc1a   :  { %3568 = vsyncpa [#allocation17], 1 }
 0xc1b   :  { %3569 = vsyncpa [#allocation7], 1 }

</bundles_post_ra>
